<compile_context>
chip_gen: v5e
topology: v5e:2x2
jax: 0.10.0
libtpu: 0.0.40
codegen_flags: <defaults>
</compile_context>

<pallas_src>
import functools

import jax
import jax.numpy as jnp
from jax.experimental import pallas as pl
from jax.experimental.pallas import tpu as pltpu

LANE = 128   # TPU vreg lane width


def _round_up(x, m):
    return (x + m - 1) // m * m


def _head_pad(heads, out_ch):
    """Per-head padded width so heads * c_pad is a multiple of 128."""
    assert LANE % heads == 0, "heads must divide 128 for the padded layout"
    return _round_up(out_ch, LANE // heads)


def _pick_tile(n, desired):
    """Largest power-of-two tile <= desired that divides n (n % 128 == 0)."""
    t = desired
    while n % t != 0:
        t //= 2
    return t


# -----------------------------------------------------------------------------
# Kernel 1: per-layer linear transform + (folded) attention projections
# -----------------------------------------------------------------------------
def _gat_transform_kernel(x_ref, w_ref, adstw_ref, asrcTw_ref,
                          h_ref, adst_ref, asrcT_ref):
    x = x_ref[...].astype(jnp.bfloat16)                       # [TN, F_pad]
    w = w_ref[...].astype(jnp.bfloat16)                       # [F_pad, HCP]
    h = jnp.dot(x, w, preferred_element_type=jnp.float32)     # [TN, HCP]

    # Attention projections folded into the input matmul (W@A precomputed on
    # host), all bf16 MXU operands with f32 accumulation.
    adst_ref[...] = jnp.dot(x, adstw_ref[...].astype(jnp.bfloat16),
                            preferred_element_type=jnp.float32)      # [TN, H]
    # alpha_src stored transposed ([H, TN]) so the attention kernel never
    # transposes in-kernel.
    asrcT_ref[...] = jax.lax.dot_general(
        asrcTw_ref[...].astype(jnp.bfloat16), x, (((1,), (1,)), ((), ())),
        preferred_element_type=jnp.float32)                          # [H, TN]

    h_ref[...] = h.astype(jnp.bfloat16)


def gat_transform(x, w, adst_w, asrcT_w, *, tile_n):
    n_pad, f_pad = x.shape
    hcp = w.shape[1]
    heads = adst_w.shape[1]
    grid = (n_pad // tile_n,)
    return pl.pallas_call(
        _gat_transform_kernel,
        grid_spec=pltpu.PrefetchScalarGridSpec(
            num_scalar_prefetch=0,
            grid=grid,
            in_specs=[
                pl.BlockSpec((tile_n, f_pad), lambda n: (n, 0)),   # x tile
                pl.BlockSpec((f_pad, hcp), lambda n: (0, 0)),      # W (resident)
                pl.BlockSpec((f_pad, heads), lambda n: (0, 0)),    # W @ A_dst
                pl.BlockSpec((heads, f_pad), lambda n: (0, 0)),    # (W @ A_src)^T
            ],
            out_specs=[
                pl.BlockSpec((tile_n, hcp), lambda n: (n, 0)),     # h
                pl.BlockSpec((tile_n, heads), lambda n: (n, 0)),   # alpha_dst
                pl.BlockSpec((heads, tile_n), lambda n: (0, n)),   # alpha_src^T
            ],
        ),
        out_shape=(
            jax.ShapeDtypeStruct((n_pad, hcp), jnp.bfloat16),
            jax.ShapeDtypeStruct((n_pad, heads), jnp.float32),
            jax.ShapeDtypeStruct((heads, n_pad), jnp.float32),
        ),
        compiler_params=pltpu.CompilerParams(
            dimension_semantics=("parallel",)),
    )(x, w, adst_w, asrcT_w)


# -----------------------------------------------------------------------------
# Kernel 2: masked attention softmax (flash-style, tile-skipping) + aggregation
# -----------------------------------------------------------------------------
def _gat_attn_kernel(nnz_ref, adj_ref, adst_ref, asrcT_ref, h_ref, b_ref,
                     hexp_ref, out_ref, m_sc, l_sc, acc_sc, *, heads, c_pad):
    i = pl.program_id(0)
    j = pl.program_id(1)

    @pl.when(j == 0)
    def _init():
        m_sc[...] = jnp.full_like(m_sc, -jnp.inf)
        l_sc[...] = jnp.zeros_like(l_sc)
        acc_sc[...] = jnp.zeros_like(acc_sc)

    # Skip tiles whose adjacency block is entirely zero (block-diagonal
    # batched graphs -> most (i, j) tiles).  Masked logits in processed tiles
    # go to -1e9; the bogus exp(0)=1 mass they can temporarily create is
    # wiped by corr = exp(-1e9 - m_real) == 0 once a real logit arrives
    # (every row carries a self-loop, so one always does).
    @pl.when(nnz_ref[i, j] > 0)
    def _compute():
        adjf = adj_ref[...].astype(jnp.float32)          # [TI, TJ] (int8 in HBM)
        mask = adjf > 0.0
        a_dst = adst_ref[...]                            # [TI, H]
        a_srcT = asrcT_ref[...]                          # [H, TJ]
        h_src = h_ref[...]                               # [TJ, HCP]  bf16
        hexp = hexp_ref[...]                             # [H, HCP]   0/1

        m_prev = m_sc[...]                               # [TI, HCP] (head-bcast)
        l_prev = l_sc[...]
        acc_prev = acc_sc[...]

        neg_slope = jnp.float32(0.2)
        neg_big = jnp.float32(-1e9)

        m_new_full = jnp.zeros_like(m_prev)
        l_new_full = jnp.zeros_like(l_prev)
        corr_full = jnp.zeros_like(m_prev)
        contrib_full = jnp.zeros_like(acc_prev)

        for hd in range(heads):
            col = hd * c_pad
            sel = hexp[hd:hd + 1, :]                                 # [1, HCP]

            # e[i, j] = leaky_relu(alpha_dst[i] + alpha_src[j])
            e = a_dst[:, hd:hd + 1] + a_srcT[hd:hd + 1, :]           # [TI, TJ]
            e = jnp.where(e > 0, e, e * neg_slope)
            logits = jnp.where(mask, e, neg_big)

            # online-softmax update (per head, assembled lane-densely below)
            m_prev_h = m_prev[:, col:col + 1]                        # [TI, 1]
            m_new_h = jnp.maximum(m_prev_h,
                                  jnp.max(logits, axis=1, keepdims=True))
            corr_h = jnp.exp(m_prev_h - m_new_h)
            p = jnp.exp(logits - m_new_h)                            # [TI, TJ]
            l_new_h = (corr_h * l_prev[:, col:col + 1]
                       + jnp.sum(p, axis=1, keepdims=True))

            # Full-width aggregation matmul (same MXU pushes as the narrow
            # per-head slice for HCP<=MXU width), head-masked afterwards so
            # the accumulator update is one dense 128-lane store.
            contrib = jnp.dot(p.astype(jnp.bfloat16), h_src,
                              preferred_element_type=jnp.float32)    # [TI, HCP]
            contrib_full = contrib_full + contrib * sel
            corr_full = corr_full + corr_h * sel
            m_new_full = m_new_full + m_new_h * sel
            l_new_full = l_new_full + l_new_h * sel

        # single lane-dense store per scratch per step
        m_sc[...] = m_new_full
        l_sc[...] = l_new_full
        acc_sc[...] = corr_full * acc_prev + contrib_full

    @pl.when(j == pl.num_programs(1) - 1)
    def _finalize():
        # normalize once after aggregation, via the EUP reciprocal
        inv = pl.reciprocal(l_sc[...], approx=True)                  # [TI, HCP]
        out_ref[...] = jnp.maximum(acc_sc[...] * inv + b_ref[...], 0.0)


def gat_attention(tile_nnz, adj, a_dst, a_srcT, h, bias, hexp, *, heads,
                  c_pad, tile_i, tile_j):
    n_pad = adj.shape[0]
    hcp = h.shape[1]
    grid = (n_pad // tile_i, n_pad // tile_j)

    cost = pl.CostEstimate(
        flops=int(heads * n_pad * n_pad * (2 * hcp + 8)),
        transcendentals=int(heads * n_pad * n_pad),
        bytes_accessed=int(adj.size                     # int8 adjacency
                           + h.size * 2 * grid[0]       # h re-read per dst tile
                           + n_pad * hcp * 4),
    )
    kernel = functools.partial(_gat_attn_kernel, heads=heads, c_pad=c_pad)
    return pl.pallas_call(
        kernel,
        grid_spec=pltpu.PrefetchScalarGridSpec(
            num_scalar_prefetch=1,       # tile_nnz -> SMEM
            grid=grid,
            in_specs=[
                pl.BlockSpec((tile_i, tile_j), lambda i, j, nnz: (i, j)),  # adj
                pl.BlockSpec((tile_i, heads), lambda i, j, nnz: (i, 0)),   # a_dst
                pl.BlockSpec((heads, tile_j), lambda i, j, nnz: (0, j)),   # a_src^T
                pl.BlockSpec((tile_j, hcp), lambda i, j, nnz: (j, 0)),     # h (src)
                pl.BlockSpec((1, hcp), lambda i, j, nnz: (0, 0)),          # bias
                pl.BlockSpec((heads, hcp), lambda i, j, nnz: (0, 0)),      # head expand
            ],
            out_specs=pl.BlockSpec((tile_i, hcp), lambda i, j, nnz: (i, 0)),
            scratch_shapes=[
                pltpu.VMEM((tile_i, hcp), jnp.float32),   # running max (bcast)
                pltpu.VMEM((tile_i, hcp), jnp.float32),   # running denom (bcast)
                pltpu.VMEM((tile_i, hcp), jnp.float32),   # accumulator
            ],
        ),
        out_shape=jax.ShapeDtypeStruct((n_pad, hcp), jnp.float32),
        compiler_params=pltpu.CompilerParams(
            dimension_semantics=("parallel", "arbitrary")),
        cost_estimate=cost,
    )(tile_nnz, adj, a_dst, a_srcT, h, bias, hexp)


def gat_layer(x_pad, adj, tile_nnz, packed, hexp, *, heads, c_pad, tile_n,
              tile_i, tile_j):
    h, a_dst, a_srcT = gat_transform(x_pad, packed['w'], packed['adst_w'],
                                     packed['asrcT_w'], tile_n=tile_n)
    return gat_attention(tile_nnz, adj, a_dst, a_srcT, h, packed['bias'],
                         hexp, heads=heads, c_pad=c_pad,
                         tile_i=tile_i, tile_j=tile_j)


# -----------------------------------------------------------------------------
# Kernel 3: residual add + global_mean_pool + final Linear (accumulating grid)
# -----------------------------------------------------------------------------
def _pool_fc_kernel(x1_ref, x3_ref, pool_ref, fcw_ref, fcb_ref, out_ref,
                    acc_sc):
    k = pl.program_id(0)

    @pl.when(k == 0)
    def _init():
        acc_sc[...] = jnp.zeros_like(acc_sc)

    xr = x1_ref[...] + x3_ref[...]                               # residual
    acc_sc[...] += jnp.dot(pool_ref[...], xr,
                           preferred_element_type=jnp.float32)   # [G, HCP]

    @pl.when(k == pl.num_programs(0) - 1)
    def _finalize():
        out_ref[...] = (jnp.dot(acc_sc[...], fcw_ref[...],
                                preferred_element_type=jnp.float32)
                        + fcb_ref[...])


def pool_fc(x1, x3, pool_mat, fc_w, fc_b, *, tile_n):
    # TODO(synk): grid axis is "arbitrary" (single core); fine while tiny —
    #             add a parallel leading axis if num_graphs / HCP ever grows.
    n_pad, hcp = x1.shape
    g = pool_mat.shape[0]
    nc_pad = fc_w.shape[1]
    grid = (n_pad // tile_n,)
    return pl.pallas_call(
        _pool_fc_kernel,
        grid_spec=pltpu.PrefetchScalarGridSpec(
            num_scalar_prefetch=0,
            grid=grid,
            in_specs=[
                pl.BlockSpec((tile_n, hcp), lambda k: (k, 0)),   # x1 tile
                pl.BlockSpec((tile_n, hcp), lambda k: (k, 0)),   # x3 tile
                pl.BlockSpec((g, tile_n), lambda k: (0, k)),     # pool tile
                pl.BlockSpec((hcp, nc_pad), lambda k: (0, 0)),   # fc W
                pl.BlockSpec((1, nc_pad), lambda k: (0, 0)),     # fc b
            ],
            out_specs=pl.BlockSpec((g, nc_pad), lambda k: (0, 0)),
            scratch_shapes=[pltpu.VMEM((g, hcp), jnp.float32)],
        ),
        out_shape=jax.ShapeDtypeStruct((g, nc_pad), jnp.float32),
        compiler_params=pltpu.CompilerParams(
            dimension_semantics=("arbitrary",)),
    )(x1, x3, pool_mat, fc_w, fc_b)


# -----------------------------------------------------------------------------
# Host-side parameter packing into the lane-padded per-head layout
# -----------------------------------------------------------------------------
def _col_index(heads, out_ch, c_pad):
    # logical column hd*out_ch + c  ->  padded column hd*c_pad + c
    return (jnp.arange(heads)[:, None] * c_pad
            + jnp.arange(out_ch)[None, :]).reshape(-1)


def _pack_gat_layer(w, att_src, att_dst, bias, *, heads, out_ch, c_pad,
                    f_in, f_in_pad, in_is_padded_layout):
    hcp = heads * c_pad
    col_idx = _col_index(heads, out_ch, c_pad)

    w_pad = jnp.zeros((f_in_pad, hcp), jnp.float32)
    if in_is_padded_layout:
        w_pad = w_pad.at[col_idx[:, None], col_idx[None, :]].set(w)
    else:
        w_pad = w_pad.at[jnp.arange(f_in)[:, None], col_idx[None, :]].set(w)

    adst_w = jnp.zeros((hcp, heads), jnp.float32)
    asrc_w = jnp.zeros((hcp, heads), jnp.float32)
    for hd in range(heads):
        rows = jnp.arange(out_ch) + hd * c_pad
        adst_w = adst_w.at[rows, hd].set(att_dst[hd])
        asrc_w = asrc_w.at[rows, hd].set(att_src[hd])

    # Fold attention projections into the input matmul: (x@W)@A == x@(W@A).
    adst_fold = w_pad @ adst_w          # [f_in_pad, heads]
    asrc_fold = w_pad @ asrc_w          # [f_in_pad, heads]

    bias_pad = jnp.zeros((1, hcp), jnp.float32)
    bias_pad = bias_pad.at[0, col_idx].set(bias.reshape(-1))

    return dict(w=w_pad, adst_w=adst_fold, asrcT_w=asrc_fold.T, bias=bias_pad)


def _pack_fc(fc_w, fc_b, *, heads, out_ch, c_pad, num_classes, nc_pad):
    hcp = heads * c_pad
    col_idx = _col_index(heads, out_ch, c_pad)
    fcw_pad = jnp.zeros((hcp, nc_pad), jnp.float32)
    fcw_pad = fcw_pad.at[col_idx[:, None],
                         jnp.arange(num_classes)[None, :]].set(fc_w)
    fcb_pad = jnp.zeros((1, nc_pad), jnp.float32)
    fcb_pad = fcb_pad.at[0, :num_classes].set(fc_b.reshape(-1))
    return fcw_pad, fcb_pad


# -----------------------------------------------------------------------------
# Full forward
# -----------------------------------------------------------------------------
def astgcn_gat_forward(params, x, edge_index, batch, *, heads, out_ch,
                       num_graphs):
    n, f_in = x.shape
    hc = heads * out_ch
    num_classes = params['fc_w'].shape[1]

    c_pad = _head_pad(heads, out_ch)
    hcp = heads * c_pad
    nc_pad = _round_up(num_classes, LANE)
    n_pad = _round_up(n, LANE)
    f_in_pad = _round_up(f_in, LANE)

    # Tile sizes (512 dst / node, 256 src), adaptive fallback for small graphs.
    tile_i = _pick_tile(n_pad, 512)
    tile_j = _pick_tile(n_pad, 256)
    tile_n = tile_i

    # Padded node features (zero rows / columns for padding).
    x_pad = jnp.zeros((n_pad, f_in_pad), jnp.float32)
    x_pad = x_pad.at[:n, :f_in].set(x)

    # Dense int8 adjacency adj[dst, src] with self-loops on EVERY row
    # (including padded nodes) so every masked-softmax row has >=1 real logit.
    src, dst = edge_index[0], edge_index[1]
    adj = jnp.zeros((n_pad, n_pad), jnp.int8)
    adj = adj.at[dst, src].set(1)
    adj = adj.at[jnp.arange(n_pad), jnp.arange(n_pad)].set(1)

    # Per-(dst_tile, src_tile) nonzero counts for the empty-tile skip (SMEM).
    n_i, n_j = n_pad // tile_i, n_pad // tile_j
    tile_nnz = adj.astype(jnp.int32).reshape(
        n_i, tile_i, n_j, tile_j).sum(axis=(1, 3))

    # Head-expansion matrix: hexp[hd, c] = 1 iff padded column c belongs to
    # head hd.  Used for lane-dense assembly of per-head scalars.
    hexp = (jnp.arange(hcp)[None, :] // c_pad
            == jnp.arange(heads)[:, None]).astype(jnp.float32)

    # Mean-pool matrix; padded nodes get zero weight.
    one_hot = (batch[None, :] == jnp.arange(num_graphs)[:, None]).astype(
        jnp.float32)                                             # [G, N]
    counts = jnp.maximum(jnp.sum(one_hot, axis=1, keepdims=True), 1.0)
    pool_mat = jnp.zeros((num_graphs, n_pad), jnp.float32)
    pool_mat = pool_mat.at[:, :n].set(one_hot / counts)

    p1 = _pack_gat_layer(params['w1'], params['as1'], params['ad1'],
                         params['b1'], heads=heads, out_ch=out_ch,
                         c_pad=c_pad, f_in=f_in, f_in_pad=f_in_pad,
                         in_is_padded_layout=False)
    p2 = _pack_gat_layer(params['w2'], params['as2'], params['ad2'],
                         params['b2'], heads=heads, out_ch=out_ch,
                         c_pad=c_pad, f_in=hc, f_in_pad=hcp,
                         in_is_padded_layout=True)
    p3 = _pack_gat_layer(params['w3'], params['as3'], params['ad3'],
                         params['b3'], heads=heads, out_ch=out_ch,
                         c_pad=c_pad, f_in=hc, f_in_pad=hcp,
                         in_is_padded_layout=True)
    fcw_pad, fcb_pad = _pack_fc(params['fc_w'], params['fc_b'],
                                heads=heads, out_ch=out_ch, c_pad=c_pad,
                                num_classes=num_classes, nc_pad=nc_pad)

    kw = dict(heads=heads, c_pad=c_pad, tile_n=tile_n,
              tile_i=tile_i, tile_j=tile_j)
    x1 = gat_layer(x_pad, adj, tile_nnz, p1, hexp, **kw)   # dropout: eval no-op
    x2 = gat_layer(x1, adj, tile_nnz, p2, hexp, **kw)
    x3 = gat_layer(x2, adj, tile_nnz, p3, hexp, **kw)

    out = pool_fc(x1, x3, pool_mat, fcw_pad, fcb_pad, tile_n=tile_n)
    return out[:, :num_classes]


# -----------------------------------------------------------------------------
# Parameter init (logical / unpadded layout)
# -----------------------------------------------------------------------------
def init_params(key, in_channels, out_channels, num_classes, heads):
    hc = heads * out_channels
    ks = jax.random.split(key, 12)

    def glorot(k, shape):
        fan_in, fan_out = shape[0], shape[-1]
        scale = jnp.sqrt(2.0 / (fan_in + fan_out))
        return jax.random.normal(k, shape, jnp.float32) * scale

    return {
        'w1': glorot(ks[0], (in_channels, hc)),
        'as1': glorot(ks[1], (heads, out_channels)),
        'ad1': glorot(ks[2], (heads, out_channels)),
        'b1': jnp.zeros((1, hc), jnp.float32),
        'w2': glorot(ks[3], (hc, hc)),
        'as2': glorot(ks[4], (heads, out_channels)),
        'ad2': glorot(ks[5], (heads, out_channels)),
        'b2': jnp.zeros((1, hc), jnp.float32),
        'w3': glorot(ks[6], (hc, hc)),
        'as3': glorot(ks[7], (heads, out_channels)),
        'ad3': glorot(ks[8], (heads, out_channels)),
        'b3': jnp.zeros((1, hc), jnp.float32),
        'fc_w': glorot(ks[9], (hc, num_classes)),
        'fc_b': glorot(ks[10], (1, num_classes)) * 0.1,
    }


# -----------------------------------------------------------------------------
# Pure-JAX reference (dense eval-mode GATConv) for a correctness sanity check
# -----------------------------------------------------------------------------
def _reference_forward(params, x, edge_index, batch, *, heads, out_ch,
                       num_graphs):
    n = x.shape[0]
    src, dst = edge_index[0], edge_index[1]
    adj = jnp.zeros((n, n), jnp.float32).at[dst, src].set(1.0)
    adj = adj.at[jnp.arange(n), jnp.arange(n)].set(1.0)

    def gat(xf, w, a_s, a_d, b):
        h = xf @ w
        outs = []
        for hd in range(heads):
            hh = h[:, hd * out_ch:(hd + 1) * out_ch]
            e = (hh @ a_d[hd])[:, None] + (hh @ a_s[hd])[None, :]
            e = jnp.where(e > 0, e, 0.2 * e)
            e = jnp.where(adj > 0, e, -jnp.inf)
            p = jax.nn.softmax(e, axis=1)
            outs.append(p @ hh)
        return jnp.maximum(jnp.concatenate(outs, axis=1) + b, 0.0)

    x1 = gat(x, params['w1'], params['as1'], params['ad1'], params['b1'])
    x2 = gat(x1, params['w2'], params['as2'], params['ad2'], params['b2'])
    x3 = gat(x2, params['w3'], params['as3'], params['ad3'], params['b3'])
    xr = x3 + x1
    one_hot = (batch[None, :] == jnp.arange(num_graphs)[:, None]).astype(
        jnp.float32)
    pool = one_hot / jnp.maximum(one_hot.sum(axis=1, keepdims=True), 1.0)
    return pool @ xr @ params['fc_w'] + params['fc_b']


if __name__ == "__main__":
    # Small deterministic example: 2 graphs of 8 nodes each (N=16),
    # in_channels=8, out_channels=8, heads=4, num_classes=6.
    N, IN_C, OUT_C, HEADS, NUM_CLASSES, NUM_GRAPHS = 16, 8, 8, 4, 6, 2

    key = jax.random.PRNGKey(0)
    k_x, k_p = jax.random.split(key)

    x = jax.random.normal(k_x, (N, IN_C), jnp.float32)

    # Bidirectional ring edges within each graph of 8 nodes.
    srcs, dsts = [], []
    for g in range(NUM_GRAPHS):
        base = g * 8
        for j in range(8):
            a, b = base + j, base + (j + 1) % 8
            srcs += [a, b]
            dsts += [b, a]
    edge_index = jnp.array([srcs, dsts], dtype=jnp.int32)           # [2, 32]
    batch = jnp.array([i // 8 for i in range(N)], dtype=jnp.int32)  # [16]

    params = init_params(k_p, IN_C, OUT_C, NUM_CLASSES, HEADS)

    forward = jax.jit(functools.partial(
        astgcn_gat_forward, heads=HEADS, out_ch=OUT_C,
        num_graphs=NUM_GRAPHS))
    out = forward(params, x, edge_index, batch)
    out = jax.block_until_ready(out)

    assert out.shape == (NUM_GRAPHS, NUM_CLASSES)
    assert bool(jnp.all(jnp.isfinite(out)))

    ref = _reference_forward(params, x, edge_index, batch,
                             heads=HEADS, out_ch=OUT_C,
                             num_graphs=NUM_GRAPHS)
    max_err = float(jnp.max(jnp.abs(out - ref)))
    assert max_err < 0.15, f"mismatch vs reference: {max_err}"

    print("KERNEL_OK")
</pallas_src>

<mosaic_0001>
module attributes {stable_mosaic.version = 11 : i64} {
  func.func @_gat_transform_kernel(%arg0: i32, %arg1: memref<128x128xf32, #tpu.memory_space<vmem>>, %arg2: memref<128x128xf32, #tpu.memory_space<vmem>>, %arg3: memref<128x4xf32, #tpu.memory_space<vmem>>, %arg4: memref<4x128xf32, #tpu.memory_space<vmem>>, %arg5: memref<128x128xbf16, #tpu.memory_space<vmem>>, %arg6: memref<128x4xf32, #tpu.memory_space<vmem>>, %arg7: memref<4x128xf32, #tpu.memory_space<vmem>>) attributes {dimension_semantics = [#tpu.dimension_semantics<parallel>], iteration_bounds = array<i64: 1>, scalar_prefetch = 0 : i64, scratch_operands = 0 : i64, tpu.core_type = #tpu.core_type<tc>, window_params = [{transform_indices = @transform_0, window_bounds = array<i64: 128, 128>}, {pipeline_mode = #tpu.pipeline_mode<synchronous>, transform_indices = @transform_1, window_bounds = array<i64: 128, 128>}, {pipeline_mode = #tpu.pipeline_mode<synchronous>, transform_indices = @transform_2, window_bounds = array<i64: 128, 4>}, {pipeline_mode = #tpu.pipeline_mode<synchronous>, transform_indices = @transform_3, window_bounds = array<i64: 4, 128>}, {transform_indices = @transform_4, window_bounds = array<i64: 128, 128>}, {transform_indices = @transform_5, window_bounds = array<i64: 128, 4>}, {transform_indices = @transform_6, window_bounds = array<i64: 4, 128>}]} {
    %c0 = arith.constant 0 : index
    %c0_0 = arith.constant 0 : index
    %0 = vector.load %arg1[%c0, %c0_0] : memref<128x128xf32, #tpu.memory_space<vmem>>, vector<128x128xf32>
    %1 = arith.truncf %0 : vector<128x128xf32> to vector<128x128xbf16>
    %c0_1 = arith.constant 0 : index
    %c0_2 = arith.constant 0 : index
    %2 = vector.load %arg2[%c0_1, %c0_2] : memref<128x128xf32, #tpu.memory_space<vmem>>, vector<128x128xf32>
    %3 = arith.truncf %2 : vector<128x128xf32> to vector<128x128xbf16>
    %cst = arith.constant dense<0.000000e+00> : vector<128x128xf32>
    %4 = tpu.matmul %1, %3, %cst {dimension_numbers = #tpu.dot_dimension_numbers<[1], [0], [0], [1], [0, 0, 1, 1], [], []>} : vector<128x128xbf16>, vector<128x128xbf16>, vector<128x128xf32> -> vector<128x128xf32>
    %c0_3 = arith.constant 0 : index
    %c0_4 = arith.constant 0 : index
    %5 = vector.load %arg3[%c0_3, %c0_4] : memref<128x4xf32, #tpu.memory_space<vmem>>, vector<128x4xf32>
    %6 = arith.truncf %5 : vector<128x4xf32> to vector<128x4xbf16>
    %cst_5 = arith.constant dense<0.000000e+00> : vector<128x4xf32>
    %7 = tpu.matmul %1, %6, %cst_5 {dimension_numbers = #tpu.dot_dimension_numbers<[1], [0], [0], [1], [0, 0, 1, 1], [], []>} : vector<128x128xbf16>, vector<128x4xbf16>, vector<128x4xf32> -> vector<128x4xf32>
    %c0_6 = arith.constant 0 : index
    %c0_7 = arith.constant 0 : index
    %8 = vector.load %arg6[%c0_6, %c0_7] : memref<128x4xf32, #tpu.memory_space<vmem>>, vector<128x4xf32>
    tpu.vector_store %arg6[%c0_6, %c0_7], %7 {strides = array<i32>} : memref<128x4xf32, #tpu.memory_space<vmem>>, vector<128x4xf32>,
    %c0_8 = arith.constant 0 : index
    %c0_9 = arith.constant 0 : index
    %9 = vector.load %arg4[%c0_8, %c0_9] : memref<4x128xf32, #tpu.memory_space<vmem>>, vector<4x128xf32>
    %10 = arith.truncf %9 : vector<4x128xf32> to vector<4x128xbf16>
    %cst_10 = arith.constant dense<0.000000e+00> : vector<4x128xf32>
    %11 = tpu.matmul %10, %1, %cst_10 {dimension_numbers = #tpu.dot_dimension_numbers<[1], [1], [0], [0], [0, 0, 1, 0], [], []>} : vector<4x128xbf16>, vector<128x128xbf16>, vector<4x128xf32> -> vector<4x128xf32>
    %c0_11 = arith.constant 0 : index
    %c0_12 = arith.constant 0 : index
    %12 = vector.load %arg7[%c0_11, %c0_12] : memref<4x128xf32, #tpu.memory_space<vmem>>, vector<4x128xf32>
    tpu.vector_store %arg7[%c0_11, %c0_12], %11 {strides = array<i32>} : memref<4x128xf32, #tpu.memory_space<vmem>>, vector<4x128xf32>,
    %13 = arith.truncf %4 : vector<128x128xf32> to vector<128x128xbf16>
    %c0_13 = arith.constant 0 : index
    %c0_14 = arith.constant 0 : index
    %14 = vector.load %arg5[%c0_13, %c0_14] : memref<128x128xbf16, #tpu.memory_space<vmem>>, vector<128x128xbf16>
    tpu.vector_store %arg5[%c0_13, %c0_14], %13 {strides = array<i32>} : memref<128x128xbf16, #tpu.memory_space<vmem>>, vector<128x128xbf16>,
    return
  }
  func.func @transform_0(%arg0: i32) -> (i32, i32) {
    %c0_i32 = arith.constant 0 : i32
    %c0_i32_0 = arith.constant 0 : i32
    return %arg0, %c0_i32 : i32, i32
  }
  func.func @transform_1(%arg0: i32) -> (i32, i32) {
    %c0_i32 = arith.constant 0 : i32
    %c0_i32_0 = arith.constant 0 : i32
    %c0_i32_1 = arith.constant 0 : i32
    return %c0_i32, %c0_i32_0 : i32, i32
  }
  func.func @transform_2(%arg0: i32) -> (i32, i32) {
    %c0_i32 = arith.constant 0 : i32
    %c0_i32_0 = arith.constant 0 : i32
    %c0_i32_1 = arith.constant 0 : i32
    return %c0_i32, %c0_i32_0 : i32, i32
  }
  func.func @transform_3(%arg0: i32) -> (i32, i32) {
    %c0_i32 = arith.constant 0 : i32
    %c0_i32_0 = arith.constant 0 : i32
    %c0_i32_1 = arith.constant 0 : i32
    return %c0_i32, %c0_i32_0 : i32, i32
  }
  func.func @transform_4(%arg0: i32) -> (i32, i32) {
    %c0_i32 = arith.constant 0 : i32
    %c0_i32_0 = arith.constant 0 : i32
    return %arg0, %c0_i32 : i32, i32
  }
  func.func @transform_5(%arg0: i32) -> (i32, i32) {
    %c0_i32 = arith.constant 0 : i32
    %c0_i32_0 = arith.constant 0 : i32
    return %arg0, %c0_i32 : i32, i32
  }
  func.func @transform_6(%arg0: i32) -> (i32, i32) {
    %c0_i32 = arith.constant 0 : i32
    %c0_i32_0 = arith.constant 0 : i32
    return %c0_i32, %arg0 : i32, i32
  }
}

module attributes {stable_mosaic.version = 11 : i64} {
  func.func @_gat_attn_kernel(%arg0: i32, %arg1: i32, %arg2: memref<1x1xi32, #tpu.memory_space<smem>>, %arg3: memref<128x128xi8, #tpu.memory_space<vmem>>, %arg4: memref<128x4xf32, #tpu.memory_space<vmem>>, %arg5: memref<4x128xf32, #tpu.memory_space<vmem>>, %arg6: memref<128x128xbf16, #tpu.memory_space<vmem>>, %arg7: memref<1x128xf32, #tpu.memory_space<vmem>>, %arg8: memref<4x128xf32, #tpu.memory_space<vmem>>, %arg9: memref<128x128xf32, #tpu.memory_space<vmem>>, %arg10: memref<128x128xf32, #tpu.memory_space<vmem>>, %arg11: memref<128x128xf32, #tpu.memory_space<vmem>>, %arg12: memref<128x128xf32, #tpu.memory_space<vmem>>) attributes {dimension_semantics = [#tpu.dimension_semantics<parallel>, #tpu.dimension_semantics<arbitrary>], iteration_bounds = array<i64: 1, 1>, scalar_prefetch = 1 : i64, scratch_operands = 3 : i64, tpu.core_type = #tpu.core_type<tc>, window_params = [{transform_indices = @transform_0, window_bounds = array<i64: 128, 128>}, {transform_indices = @transform_1, window_bounds = array<i64: 128, 4>}, {transform_indices = @transform_2, window_bounds = array<i64: 4, 128>}, {transform_indices = @transform_3, window_bounds = array<i64: 128, 128>}, {pipeline_mode = #tpu.pipeline_mode<synchronous>, transform_indices = @transform_4, window_bounds = array<i64: 1, 128>}, {pipeline_mode = #tpu.pipeline_mode<synchronous>, transform_indices = @transform_5, window_bounds = array<i64: 4, 128>}, {transform_indices = @transform_6, window_bounds = array<i64: 128, 128>}]} {
    %c0_i32 = arith.constant 0 : i32
    %0 = arith.cmpi eq, %arg1, %c0_i32 : i32
    %1 = arith.extui %0 : i1 to i32
    %c0_i32_0 = arith.constant 0 : i32
    %2 = arith.cmpi ne, %1, %c0_i32_0 : i32
    scf.if %2 {
      %cst = arith.constant 0xFF800000 : f32
      %12 = vector.broadcast %cst : f32 to vector<128x128xf32>
      %c0 = arith.constant 0 : index
      %c0_5 = arith.constant 0 : index
      %13 = vector.load %arg10[%c0, %c0_5] : memref<128x128xf32, #tpu.memory_space<vmem>>, vector<128x128xf32>
      tpu.vector_store %arg10[%c0, %c0_5], %12 {strides = array<i32>} : memref<128x128xf32, #tpu.memory_space<vmem>>, vector<128x128xf32>,
      %cst_6 = arith.constant 0.000000e+00 : f32
      %14 = vector.broadcast %cst_6 : f32 to vector<128x128xf32>
      %c0_7 = arith.constant 0 : index
      %c0_8 = arith.constant 0 : index
      %15 = vector.load %arg11[%c0_7, %c0_8] : memref<128x128xf32, #tpu.memory_space<vmem>>, vector<128x128xf32>
      tpu.vector_store %arg11[%c0_7, %c0_8], %14 {strides = array<i32>} : memref<128x128xf32, #tpu.memory_space<vmem>>, vector<128x128xf32>,
      %cst_9 = arith.constant 0.000000e+00 : f32
      %16 = vector.broadcast %cst_9 : f32 to vector<128x128xf32>
      %c0_10 = arith.constant 0 : index
      %c0_11 = arith.constant 0 : index
      %17 = vector.load %arg12[%c0_10, %c0_11] : memref<128x128xf32, #tpu.memory_space<vmem>>, vector<128x128xf32>
      tpu.vector_store %arg12[%c0_10, %c0_11], %16 {strides = array<i32>} : memref<128x128xf32, #tpu.memory_space<vmem>>, vector<128x128xf32>,
    } else {
    }
    %3 = arith.index_cast %arg0 : i32 to index
    %4 = arith.index_cast %arg1 : i32 to index
    %5 = memref.load %arg2[%3, %4] : memref<1x1xi32, #tpu.memory_space<smem>>
    %c0_i32_1 = arith.constant 0 : i32
    %6 = arith.cmpi sgt, %5, %c0_i32_1 : i32
    %7 = arith.extui %6 : i1 to i32
    %c0_i32_2 = arith.constant 0 : i32
    %8 = arith.cmpi ne, %7, %c0_i32_2 : i32
    scf.if %8 {
      %c0 = arith.constant 0 : index
      %c0_5 = arith.constant 0 : index
      %12 = vector.load %arg3[%c0, %c0_5] : memref<128x128xi8, #tpu.memory_space<vmem>>, vector<128x128xi8>
      %13 = arith.sitofp %12 : vector<128x128xi8> to vector<128x128xf32>
      %cst = arith.constant 0.000000e+00 : f32
      %14 = vector.broadcast %cst : f32 to vector<128x128xf32>
      %15 = arith.cmpf ogt, %13, %14 : vector<128x128xf32>
      %c0_6 = arith.constant 0 : index
      %c0_7 = arith.constant 0 : index
      %16 = vector.load %arg4[%c0_6, %c0_7] : memref<128x4xf32, #tpu.memory_space<vmem>>, vector<128x4xf32>
      %c0_8 = arith.constant 0 : index
      %c0_9 = arith.constant 0 : index
      %17 = vector.load %arg5[%c0_8, %c0_9] : memref<4x128xf32, #tpu.memory_space<vmem>>, vector<4x128xf32>
      %c0_10 = arith.constant 0 : index
      %c0_11 = arith.constant 0 : index
      %18 = vector.load %arg6[%c0_10, %c0_11] : memref<128x128xbf16, #tpu.memory_space<vmem>>, vector<128x128xbf16>
      %c0_12 = arith.constant 0 : index
      %c0_13 = arith.constant 0 : index
      %19 = vector.load %arg8[%c0_12, %c0_13] : memref<4x128xf32, #tpu.memory_space<vmem>>, vector<4x128xf32>
      %c0_14 = arith.constant 0 : index
      %c0_15 = arith.constant 0 : index
      %20 = vector.load %arg10[%c0_14, %c0_15] : memref<128x128xf32, #tpu.memory_space<vmem>>, vector<128x128xf32>
      %c0_16 = arith.constant 0 : index
      %c0_17 = arith.constant 0 : index
      %21 = vector.load %arg11[%c0_16, %c0_17] : memref<128x128xf32, #tpu.memory_space<vmem>>, vector<128x128xf32>
      %c0_18 = arith.constant 0 : index
      %c0_19 = arith.constant 0 : index
      %22 = vector.load %arg12[%c0_18, %c0_19] : memref<128x128xf32, #tpu.memory_space<vmem>>, vector<128x128xf32>
      %cst_20 = arith.constant 0.000000e+00 : f32
      %23 = vector.broadcast %cst_20 : f32 to vector<128x128xf32>
      %cst_21 = arith.constant 0.000000e+00 : f32
      %24 = vector.broadcast %cst_21 : f32 to vector<128x128xf32>
      %cst_22 = arith.constant 0.000000e+00 : f32
      %25 = vector.broadcast %cst_22 : f32 to vector<128x128xf32>
      %cst_23 = arith.constant 0.000000e+00 : f32
      %26 = vector.broadcast %cst_23 : f32 to vector<128x128xf32>
      %27 = vector.extract_strided_slice %19 {offsets = [0, 0], sizes = [1, 128], strides = [1, 1]} : vector<4x128xf32> to vector<1x128xf32>
      %28 = vector.extract_strided_slice %16 {offsets = [0, 0], sizes = [128, 1], strides = [1, 1]} : vector<128x4xf32> to vector<128x1xf32>
      %29 = vector.extract_strided_slice %17 {offsets = [0, 0], sizes = [1, 128], strides = [1, 1]} : vector<4x128xf32> to vector<1x128xf32>
      %30 = vector.broadcast %28 : vector<128x1xf32> to vector<128x128xf32>
      %31 = vector.broadcast %29 : vector<1x128xf32> to vector<128x128xf32>
      %32 = arith.addf %30, %31 : vector<128x128xf32>
      %cst_24 = arith.constant 0.000000e+00 : f32
      %33 = vector.broadcast %cst_24 : f32 to vector<128x128xf32>
      %34 = arith.cmpf ogt, %32, %33 : vector<128x128xf32>
      %cst_25 = arith.constant 2.000000e-01 : f32
      %35 = vector.broadcast %cst_25 : f32 to vector<128x128xf32>
      %36 = arith.mulf %32, %35 : vector<128x128xf32>
      %37 = arith.select %34, %32, %36 : vector<128x128xi1>, vector<128x128xf32>
      %cst_26 = arith.constant -1.000000e+09 : f32
      %38 = vector.broadcast %cst_26 : f32 to vector<128x128xf32>
      %39 = arith.select %15, %37, %38 : vector<128x128xi1>, vector<128x128xf32>
      %40 = vector.extract_strided_slice %20 {offsets = [0, 0], sizes = [128, 1], strides = [1, 1]} : vector<128x128xf32> to vector<128x1xf32>
      %cst_27 = arith.constant dense<0xFF800000> : vector<128xf32>
      %41 = vector.multi_reduction <maximumf>, %39, %cst_27 [1] : vector<128x128xf32> to vector<128xf32>
      %42 = vector.shape_cast %41 : vector<128xf32> to vector<128x1xf32>
      %43 = arith.maximumf %40, %42 : vector<128x1xf32>
      %44 = arith.subf %40, %43 : vector<128x1xf32>
      %45 = math.exp %44 : vector<128x1xf32>
      %46 = vector.broadcast %43 : vector<128x1xf32> to vector<128x128xf32>
      %47 = arith.subf %39, %46 : vector<128x128xf32>
      %48 = math.exp %47 : vector<128x128xf32>
      %49 = vector.extract_strided_slice %21 {offsets = [0, 0], sizes = [128, 1], strides = [1, 1]} : vector<128x128xf32> to vector<128x1xf32>
      %50 = arith.mulf %45, %49 : vector<128x1xf32>
      %cst_28 = arith.constant dense<0.000000e+00> : vector<128xf32>
      %51 = vector.multi_reduction <add>, %48, %cst_28 [1] : vector<128x128xf32> to vector<128xf32>
      %52 = vector.shape_cast %51 : vector<128xf32> to vector<128x1xf32>
      %53 = arith.addf %50, %52 : vector<128x1xf32>
      %54 = arith.truncf %48 : vector<128x128xf32> to vector<128x128xbf16>
      %cst_29 = arith.constant dense<0.000000e+00> : vector<128x128xf32>
      %55 = tpu.matmul %54, %18, %cst_29 {dimension_numbers = #tpu.dot_dimension_numbers<[1], [0], [0], [1], [0, 0, 1, 1], [], []>} : vector<128x128xbf16>, vector<128x128xbf16>, vector<128x128xf32> -> vector<128x128xf32>
      %56 = vector.broadcast %27 : vector<1x128xf32> to vector<128x128xf32>
      %57 = arith.mulf %55, %56 : vector<128x128xf32>
      %58 = arith.addf %26, %57 : vector<128x128xf32>
      %59 = vector.broadcast %45 : vector<128x1xf32> to vector<128x128xf32>
      %60 = vector.broadcast %27 : vector<1x128xf32> to vector<128x128xf32>
      %61 = arith.mulf %59, %60 : vector<128x128xf32>
      %62 = arith.addf %25, %61 : vector<128x128xf32>
      %63 = vector.broadcast %43 : vector<128x1xf32> to vector<128x128xf32>
      %64 = vector.broadcast %27 : vector<1x128xf32> to vector<128x128xf32>
      %65 = arith.mulf %63, %64 : vector<128x128xf32>
      %66 = arith.addf %23, %65 : vector<128x128xf32>
      %67 = vector.broadcast %53 : vector<128x1xf32> to vector<128x128xf32>
      %68 = vector.broadcast %27 : vector<1x128xf32> to vector<128x128xf32>
      %69 = arith.mulf %67, %68 : vector<128x128xf32>
      %70 = arith.addf %24, %69 : vector<128x128xf32>
      %71 = vector.extract_strided_slice %19 {offsets = [1, 0], sizes = [1, 128], strides = [1, 1]} : vector<4x128xf32> to vector<1x128xf32>
      %72 = vector.extract_strided_slice %16 {offsets = [0, 1], sizes = [128, 1], strides = [1, 1]} : vector<128x4xf32> to vector<128x1xf32>
      %73 = vector.extract_strided_slice %17 {offsets = [1, 0], sizes = [1, 128], strides = [1, 1]} : vector<4x128xf32> to vector<1x128xf32>
      %74 = vector.broadcast %72 : vector<128x1xf32> to vector<128x128xf32>
      %75 = vector.broadcast %73 : vector<1x128xf32> to vector<128x128xf32>
      %76 = arith.addf %74, %75 : vector<128x128xf32>
      %cst_30 = arith.constant 0.000000e+00 : f32
      %77 = vector.broadcast %cst_30 : f32 to vector<128x128xf32>
      %78 = arith.cmpf ogt, %76, %77 : vector<128x128xf32>
      %cst_31 = arith.constant 2.000000e-01 : f32
      %79 = vector.broadcast %cst_31 : f32 to vector<128x128xf32>
      %80 = arith.mulf %76, %79 : vector<128x128xf32>
      %81 = arith.select %78, %76, %80 : vector<128x128xi1>, vector<128x128xf32>
      %cst_32 = arith.constant -1.000000e+09 : f32
      %82 = vector.broadcast %cst_32 : f32 to vector<128x128xf32>
      %83 = arith.select %15, %81, %82 : vector<128x128xi1>, vector<128x128xf32>
      %84 = vector.extract_strided_slice %20 {offsets = [0, 32], sizes = [128, 1], strides = [1, 1]} : vector<128x128xf32> to vector<128x1xf32>
      %cst_33 = arith.constant dense<0xFF800000> : vector<128xf32>
      %85 = vector.multi_reduction <maximumf>, %83, %cst_33 [1] : vector<128x128xf32> to vector<128xf32>
      %86 = vector.shape_cast %85 : vector<128xf32> to vector<128x1xf32>
      %87 = arith.maximumf %84, %86 : vector<128x1xf32>
      %88 = arith.subf %84, %87 : vector<128x1xf32>
      %89 = math.exp %88 : vector<128x1xf32>
      %90 = vector.broadcast %87 : vector<128x1xf32> to vector<128x128xf32>
      %91 = arith.subf %83, %90 : vector<128x128xf32>
      %92 = math.exp %91 : vector<128x128xf32>
      %93 = vector.extract_strided_slice %21 {offsets = [0, 32], sizes = [128, 1], strides = [1, 1]} : vector<128x128xf32> to vector<128x1xf32>
      %94 = arith.mulf %89, %93 : vector<128x1xf32>
      %cst_34 = arith.constant dense<0.000000e+00> : vector<128xf32>
      %95 = vector.multi_reduction <add>, %92, %cst_34 [1] : vector<128x128xf32> to vector<128xf32>
      %96 = vector.shape_cast %95 : vector<128xf32> to vector<128x1xf32>
      %97 = arith.addf %94, %96 : vector<128x1xf32>
      %98 = arith.truncf %92 : vector<128x128xf32> to vector<128x128xbf16>
      %cst_35 = arith.constant dense<0.000000e+00> : vector<128x128xf32>
      %99 = tpu.matmul %98, %18, %cst_35 {dimension_numbers = #tpu.dot_dimension_numbers<[1], [0], [0], [1], [0, 0, 1, 1], [], []>} : vector<128x128xbf16>, vector<128x128xbf16>, vector<128x128xf32> -> vector<128x128xf32>
      %100 = vector.broadcast %71 : vector<1x128xf32> to vector<128x128xf32>
      %101 = arith.mulf %99, %100 : vector<128x128xf32>
      %102 = arith.addf %58, %101 : vector<128x128xf32>
      %103 = vector.broadcast %89 : vector<128x1xf32> to vector<128x128xf32>
      %104 = vector.broadcast %71 : vector<1x128xf32> to vector<128x128xf32>
      %105 = arith.mulf %103, %104 : vector<128x128xf32>
      %106 = arith.addf %62, %105 : vector<128x128xf32>
      %107 = vector.broadcast %87 : vector<128x1xf32> to vector<128x128xf32>
      %108 = vector.broadcast %71 : vector<1x128xf32> to vector<128x128xf32>
      %109 = arith.mulf %107, %108 : vector<128x128xf32>
      %110 = arith.addf %66, %109 : vector<128x128xf32>
      %111 = vector.broadcast %97 : vector<128x1xf32> to vector<128x128xf32>
      %112 = vector.broadcast %71 : vector<1x128xf32> to vector<128x128xf32>
      %113 = arith.mulf %111, %112 : vector<128x128xf32>
      %114 = arith.addf %70, %113 : vector<128x128xf32>
      %115 = vector.extract_strided_slice %19 {offsets = [2, 0], sizes = [1, 128], strides = [1, 1]} : vector<4x128xf32> to vector<1x128xf32>
      %116 = vector.extract_strided_slice %16 {offsets = [0, 2], sizes = [128, 1], strides = [1, 1]} : vector<128x4xf32> to vector<128x1xf32>
      %117 = vector.extract_strided_slice %17 {offsets = [2, 0], sizes = [1, 128], strides = [1, 1]} : vector<4x128xf32> to vector<1x128xf32>
      %118 = vector.broadcast %116 : vector<128x1xf32> to vector<128x128xf32>
      %119 = vector.broadcast %117 : vector<1x128xf32> to vector<128x128xf32>
      %120 = arith.addf %118, %119 : vector<128x128xf32>
      %cst_36 = arith.constant 0.000000e+00 : f32
      %121 = vector.broadcast %cst_36 : f32 to vector<128x128xf32>
      %122 = arith.cmpf ogt, %120, %121 : vector<128x128xf32>
      %cst_37 = arith.constant 2.000000e-01 : f32
      %123 = vector.broadcast %cst_37 : f32 to vector<128x128xf32>
      %124 = arith.mulf %120, %123 : vector<128x128xf32>
      %125 = arith.select %122, %120, %124 : vector<128x128xi1>, vector<128x128xf32>
      %cst_38 = arith.constant -1.000000e+09 : f32
      %126 = vector.broadcast %cst_38 : f32 to vector<128x128xf32>
      %127 = arith.select %15, %125, %126 : vector<128x128xi1>, vector<128x128xf32>
      %128 = vector.extract_strided_slice %20 {offsets = [0, 64], sizes = [128, 1], strides = [1, 1]} : vector<128x128xf32> to vector<128x1xf32>
      %cst_39 = arith.constant dense<0xFF800000> : vector<128xf32>
      %129 = vector.multi_reduction <maximumf>, %127, %cst_39 [1] : vector<128x128xf32> to vector<128xf32>
      %130 = vector.shape_cast %129 : vector<128xf32> to vector<128x1xf32>
      %131 = arith.maximumf %128, %130 : vector<128x1xf32>
      %132 = arith.subf %128, %131 : vector<128x1xf32>
      %133 = math.exp %132 : vector<128x1xf32>
      %134 = vector.broadcast %131 : vector<128x1xf32> to vector<128x128xf32>
      %135 = arith.subf %127, %134 : vector<128x128xf32>
      %136 = math.exp %135 : vector<128x128xf32>
      %137 = vector.extract_strided_slice %21 {offsets = [0, 64], sizes = [128, 1], strides = [1, 1]} : vector<128x128xf32> to vector<128x1xf32>
      %138 = arith.mulf %133, %137 : vector<128x1xf32>
      %cst_40 = arith.constant dense<0.000000e+00> : vector<128xf32>
      %139 = vector.multi_reduction <add>, %136, %cst_40 [1] : vector<128x128xf32> to vector<128xf32>
      %140 = vector.shape_cast %139 : vector<128xf32> to vector<128x1xf32>
      %141 = arith.addf %138, %140 : vector<128x1xf32>
      %142 = arith.truncf %136 : vector<128x128xf32> to vector<128x128xbf16>
      %cst_41 = arith.constant dense<0.000000e+00> : vector<128x128xf32>
      %143 = tpu.matmul %142, %18, %cst_41 {dimension_numbers = #tpu.dot_dimension_numbers<[1], [0], [0], [1], [0, 0, 1, 1], [], []>} : vector<128x128xbf16>, vector<128x128xbf16>, vector<128x128xf32> -> vector<128x128xf32>
      %144 = vector.broadcast %115 : vector<1x128xf32> to vector<128x128xf32>
      %145 = arith.mulf %143, %144 : vector<128x128xf32>
      %146 = arith.addf %102, %145 : vector<128x128xf32>
      %147 = vector.broadcast %133 : vector<128x1xf32> to vector<128x128xf32>
      %148 = vector.broadcast %115 : vector<1x128xf32> to vector<128x128xf32>
      %149 = arith.mulf %147, %148 : vector<128x128xf32>
      %150 = arith.addf %106, %149 : vector<128x128xf32>
      %151 = vector.broadcast %131 : vector<128x1xf32> to vector<128x128xf32>
      %152 = vector.broadcast %115 : vector<1x128xf32> to vector<128x128xf32>
      %153 = arith.mulf %151, %152 : vector<128x128xf32>
      %154 = arith.addf %110, %153 : vector<128x128xf32>
      %155 = vector.broadcast %141 : vector<128x1xf32> to vector<128x128xf32>
      %156 = vector.broadcast %115 : vector<1x128xf32> to vector<128x128xf32>
      %157 = arith.mulf %155, %156 : vector<128x128xf32>
      %158 = arith.addf %114, %157 : vector<128x128xf32>
      %159 = vector.extract_strided_slice %19 {offsets = [3, 0], sizes = [1, 128], strides = [1, 1]} : vector<4x128xf32> to vector<1x128xf32>
      %160 = vector.extract_strided_slice %16 {offsets = [0, 3], sizes = [128, 1], strides = [1, 1]} : vector<128x4xf32> to vector<128x1xf32>
      %161 = vector.extract_strided_slice %17 {offsets = [3, 0], sizes = [1, 128], strides = [1, 1]} : vector<4x128xf32> to vector<1x128xf32>
      %162 = vector.broadcast %160 : vector<128x1xf32> to vector<128x128xf32>
      %163 = vector.broadcast %161 : vector<1x128xf32> to vector<128x128xf32>
      %164 = arith.addf %162, %163 : vector<128x128xf32>
      %cst_42 = arith.constant 0.000000e+00 : f32
      %165 = vector.broadcast %cst_42 : f32 to vector<128x128xf32>
      %166 = arith.cmpf ogt, %164, %165 : vector<128x128xf32>
      %cst_43 = arith.constant 2.000000e-01 : f32
      %167 = vector.broadcast %cst_43 : f32 to vector<128x128xf32>
      %168 = arith.mulf %164, %167 : vector<128x128xf32>
      %169 = arith.select %166, %164, %168 : vector<128x128xi1>, vector<128x128xf32>
      %cst_44 = arith.constant -1.000000e+09 : f32
      %170 = vector.broadcast %cst_44 : f32 to vector<128x128xf32>
      %171 = arith.select %15, %169, %170 : vector<128x128xi1>, vector<128x128xf32>
      %172 = vector.extract_strided_slice %20 {offsets = [0, 96], sizes = [128, 1], strides = [1, 1]} : vector<128x128xf32> to vector<128x1xf32>
      %cst_45 = arith.constant dense<0xFF800000> : vector<128xf32>
      %173 = vector.multi_reduction <maximumf>, %171, %cst_45 [1] : vector<128x128xf32> to vector<128xf32>
      %174 = vector.shape_cast %173 : vector<128xf32> to vector<128x1xf32>
      %175 = arith.maximumf %172, %174 : vector<128x1xf32>
      %176 = arith.subf %172, %175 : vector<128x1xf32>
      %177 = math.exp %176 : vector<128x1xf32>
      %178 = vector.broadcast %175 : vector<128x1xf32> to vector<128x128xf32>
      %179 = arith.subf %171, %178 : vector<128x128xf32>
      %180 = math.exp %179 : vector<128x128xf32>
      %181 = vector.extract_strided_slice %21 {offsets = [0, 96], sizes = [128, 1], strides = [1, 1]} : vector<128x128xf32> to vector<128x1xf32>
      %182 = arith.mulf %177, %181 : vector<128x1xf32>
      %cst_46 = arith.constant dense<0.000000e+00> : vector<128xf32>
      %183 = vector.multi_reduction <add>, %180, %cst_46 [1] : vector<128x128xf32> to vector<128xf32>
      %184 = vector.shape_cast %183 : vector<128xf32> to vector<128x1xf32>
      %185 = arith.addf %182, %184 : vector<128x1xf32>
      %186 = arith.truncf %180 : vector<128x128xf32> to vector<128x128xbf16>
      %cst_47 = arith.constant dense<0.000000e+00> : vector<128x128xf32>
      %187 = tpu.matmul %186, %18, %cst_47 {dimension_numbers = #tpu.dot_dimension_numbers<[1], [0], [0], [1], [0, 0, 1, 1], [], []>} : vector<128x128xbf16>, vector<128x128xbf16>, vector<128x128xf32> -> vector<128x128xf32>
      %188 = vector.broadcast %159 : vector<1x128xf32> to vector<128x128xf32>
      %189 = arith.mulf %187, %188 : vector<128x128xf32>
      %190 = arith.addf %146, %189 : vector<128x128xf32>
      %191 = vector.broadcast %177 : vector<128x1xf32> to vector<128x128xf32>
      %192 = vector.broadcast %159 : vector<1x128xf32> to vector<128x128xf32>
      %193 = arith.mulf %191, %192 : vector<128x128xf32>
      %194 = arith.addf %150, %193 : vector<128x128xf32>
      %195 = vector.broadcast %175 : vector<128x1xf32> to vector<128x128xf32>
      %196 = vector.broadcast %159 : vector<1x128xf32> to vector<128x128xf32>
      %197 = arith.mulf %195, %196 : vector<128x128xf32>
      %198 = arith.addf %154, %197 : vector<128x128xf32>
      %199 = vector.broadcast %185 : vector<128x1xf32> to vector<128x128xf32>
      %200 = vector.broadcast %159 : vector<1x128xf32> to vector<128x128xf32>
      %201 = arith.mulf %199, %200 : vector<128x128xf32>
      %202 = arith.addf %158, %201 : vector<128x128xf32>
      %c0_48 = arith.constant 0 : index
      %c0_49 = arith.constant 0 : index
      %203 = vector.load %arg10[%c0_48, %c0_49] : memref<128x128xf32, #tpu.memory_space<vmem>>, vector<128x128xf32>
      tpu.vector_store %arg10[%c0_48, %c0_49], %198 {strides = array<i32>} : memref<128x128xf32, #tpu.memory_space<vmem>>, vector<128x128xf32>,
      %c0_50 = arith.constant 0 : index
      %c0_51 = arith.constant 0 : index
      %204 = vector.load %arg11[%c0_50, %c0_51] : memref<128x128xf32, #tpu.memory_space<vmem>>, vector<128x128xf32>
      tpu.vector_store %arg11[%c0_50, %c0_51], %202 {strides = array<i32>} : memref<128x128xf32, #tpu.memory_space<vmem>>, vector<128x128xf32>,
      %205 = arith.mulf %194, %22 : vector<128x128xf32>
      %206 = arith.addf %205, %190 : vector<128x128xf32>
      %c0_52 = arith.constant 0 : index
      %c0_53 = arith.constant 0 : index
      %207 = vector.load %arg12[%c0_52, %c0_53] : memref<128x128xf32, #tpu.memory_space<vmem>>, vector<128x128xf32>
      tpu.vector_store %arg12[%c0_52, %c0_53], %206 {strides = array<i32>} : memref<128x128xf32, #tpu.memory_space<vmem>>, vector<128x128xf32>,
    } else {
    }
    %c0_i32_3 = arith.constant 0 : i32
    %9 = arith.cmpi eq, %arg1, %c0_i32_3 : i32
    %10 = arith.extui %9 : i1 to i32
    %c0_i32_4 = arith.constant 0 : i32
    %11 = arith.cmpi ne, %10, %c0_i32_4 : i32
    scf.if %11 {
      %c0 = arith.constant 0 : index
      %c0_5 = arith.constant 0 : index
      %12 = vector.load %arg11[%c0, %c0_5] : memref<128x128xf32, #tpu.memory_space<vmem>>, vector<128x128xf32>
      %13 = tpu.reciprocal %12 {approx = true} : vector<128x128xf32> -> vector<128x128xf32>
      %c0_6 = arith.constant 0 : index
      %c0_7 = arith.constant 0 : index
      %14 = vector.load %arg12[%c0_6, %c0_7] : memref<128x128xf32, #tpu.memory_space<vmem>>, vector<128x128xf32>
      %15 = arith.mulf %14, %13 : vector<128x128xf32>
      %c0_8 = arith.constant 0 : index
      %c0_9 = arith.constant 0 : index
      %16 = vector.load %arg7[%c0_8, %c0_9] : memref<1x128xf32, #tpu.memory_space<vmem>>, vector<1x128xf32>
      %17 = vector.broadcast %16 : vector<1x128xf32> to vector<128x128xf32>
      %18 = arith.addf %15, %17 : vector<128x128xf32>
      %cst = arith.constant 0.000000e+00 : f32
      %19 = vector.broadcast %cst : f32 to vector<128x128xf32>
      %20 = arith.maximumf %18, %19 : vector<128x128xf32>
      %c0_10 = arith.constant 0 : index
      %c0_11 = arith.constant 0 : index
      %21 = vector.load %arg9[%c0_10, %c0_11] : memref<128x128xf32, #tpu.memory_space<vmem>>, vector<128x128xf32>
      tpu.vector_store %arg9[%c0_10, %c0_11], %20 {strides = array<i32>} : memref<128x128xf32, #tpu.memory_space<vmem>>, vector<128x128xf32>,
    } else {
    }
    return
  }
  func.func @transform_0(%arg0: i32, %arg1: i32, %arg2: memref<1x1xi32, #tpu.memory_space<smem>>) -> (i32, i32) {
    %c0_i32 = arith.constant 0 : i32
    return %arg0, %arg1 : i32, i32
  }
  func.func @transform_1(%arg0: i32, %arg1: i32, %arg2: memref<1x1xi32, #tpu.memory_space<smem>>) -> (i32, i32) {
    %c0_i32 = arith.constant 0 : i32
    %c0_i32_0 = arith.constant 0 : i32
    return %arg0, %c0_i32 : i32, i32
  }
  func.func @transform_2(%arg0: i32, %arg1: i32, %arg2: memref<1x1xi32, #tpu.memory_space<smem>>) -> (i32, i32) {
    %c0_i32 = arith.constant 0 : i32
    %c0_i32_0 = arith.constant 0 : i32
    return %c0_i32, %arg1 : i32, i32
  }
  func.func @transform_3(%arg0: i32, %arg1: i32, %arg2: memref<1x1xi32, #tpu.memory_space<smem>>) -> (i32, i32) {
    %c0_i32 = arith.constant 0 : i32
    %c0_i32_0 = arith.constant 0 : i32
    return %arg1, %c0_i32 : i32, i32
  }
  func.func @transform_4(%arg0: i32, %arg1: i32, %arg2: memref<1x1xi32, #tpu.memory_space<smem>>) -> (i32, i32) {
    %c0_i32 = arith.constant 0 : i32
    %c0_i32_0 = arith.constant 0 : i32
    %c0_i32_1 = arith.constant 0 : i32
    return %c0_i32, %c0_i32_0 : i32, i32
  }
  func.func @transform_5(%arg0: i32, %arg1: i32, %arg2: memref<1x1xi32, #tpu.memory_space<smem>>) -> (i32, i32) {
    %c0_i32 = arith.constant 0 : i32
    %c0_i32_0 = arith.constant 0 : i32
    %c0_i32_1 = arith.constant 0 : i32
    return %c0_i32, %c0_i32_0 : i32, i32
  }
  func.func @transform_6(%arg0: i32, %arg1: i32, %arg2: memref<1x1xi32, #tpu.memory_space<smem>>) -> (i32, i32) {
    %c0_i32 = arith.constant 0 : i32
    %c0_i32_0 = arith.constant 0 : i32
    return %arg0, %c0_i32 : i32, i32
  }
}

module attributes {stable_mosaic.version = 11 : i64} {
  func.func @_pool_fc_kernel(%arg0: i32, %arg1: memref<128x128xf32, #tpu.memory_space<vmem>>, %arg2: memref<128x128xf32, #tpu.memory_space<vmem>>, %arg3: memref<2x128xf32, #tpu.memory_space<vmem>>, %arg4: memref<128x128xf32, #tpu.memory_space<vmem>>, %arg5: memref<1x128xf32, #tpu.memory_space<vmem>>, %arg6: memref<2x128xf32, #tpu.memory_space<vmem>>, %arg7: memref<2x128xf32, #tpu.memory_space<vmem>>) attributes {dimension_semantics = [#tpu.dimension_semantics<arbitrary>], iteration_bounds = array<i64: 1>, scalar_prefetch = 0 : i64, scratch_operands = 1 : i64, tpu.core_type = #tpu.core_type<tc>, window_params = [{transform_indices = @transform_0, window_bounds = array<i64: 128, 128>}, {transform_indices = @transform_1, window_bounds = array<i64: 128, 128>}, {transform_indices = @transform_2, window_bounds = array<i64: 2, 128>}, {pipeline_mode = #tpu.pipeline_mode<synchronous>, transform_indices = @transform_3, window_bounds = array<i64: 128, 128>}, {pipeline_mode = #tpu.pipeline_mode<synchronous>, transform_indices = @transform_4, window_bounds = array<i64: 1, 128>}, {pipeline_mode = #tpu.pipeline_mode<synchronous>, transform_indices = @transform_5, window_bounds = array<i64: 2, 128>}]} {
    %c0_i32 = arith.constant 0 : i32
    %0 = arith.cmpi eq, %arg0, %c0_i32 : i32
    %1 = arith.extui %0 : i1 to i32
    %c0_i32_0 = arith.constant 0 : i32
    %2 = arith.cmpi ne, %1, %c0_i32_0 : i32
    scf.if %2 {
      %cst_12 = arith.constant 0.000000e+00 : f32
      %14 = vector.broadcast %cst_12 : f32 to vector<2x128xf32>
      %c0_13 = arith.constant 0 : index
      %c0_14 = arith.constant 0 : index
      %15 = vector.load %arg7[%c0_13, %c0_14] : memref<2x128xf32, #tpu.memory_space<vmem>>, vector<2x128xf32>
      tpu.vector_store %arg7[%c0_13, %c0_14], %14 {strides = array<i32>} : memref<2x128xf32, #tpu.memory_space<vmem>>, vector<2x128xf32>,
    } else {
    }
    %c0 = arith.constant 0 : index
    %c0_1 = arith.constant 0 : index
    %3 = vector.load %arg1[%c0, %c0_1] : memref<128x128xf32, #tpu.memory_space<vmem>>, vector<128x128xf32>
    %c0_2 = arith.constant 0 : index
    %c0_3 = arith.constant 0 : index
    %4 = vector.load %arg2[%c0_2, %c0_3] : memref<128x128xf32, #tpu.memory_space<vmem>>, vector<128x128xf32>
    %5 = arith.addf %3, %4 : vector<128x128xf32>
    %c0_4 = arith.constant 0 : index
    %c0_5 = arith.constant 0 : index
    %6 = vector.load %arg7[%c0_4, %c0_5] : memref<2x128xf32, #tpu.memory_space<vmem>>, vector<2x128xf32>
    %c0_6 = arith.constant 0 : index
    %c0_7 = arith.constant 0 : index
    %7 = vector.load %arg3[%c0_6, %c0_7] : memref<2x128xf32, #tpu.memory_space<vmem>>, vector<2x128xf32>
    %cst = arith.constant dense<0.000000e+00> : vector<2x128xf32>
    %8 = tpu.matmul %7, %5, %cst {dimension_numbers = #tpu.dot_dimension_numbers<[1], [0], [0], [1], [0, 0, 1, 1], [], []>} : vector<2x128xf32>, vector<128x128xf32>, vector<2x128xf32> -> vector<2x128xf32>
    %9 = arith.addf %6, %8 : vector<2x128xf32>
    %c0_8 = arith.constant 0 : index
    %c0_9 = arith.constant 0 : index
    %10 = vector.load %arg7[%c0_8, %c0_9] : memref<2x128xf32, #tpu.memory_space<vmem>>, vector<2x128xf32>
    tpu.vector_store %arg7[%c0_8, %c0_9], %9 {strides = array<i32>} : memref<2x128xf32, #tpu.memory_space<vmem>>, vector<2x128xf32>,
    %c0_i32_10 = arith.constant 0 : i32
    %11 = arith.cmpi eq, %arg0, %c0_i32_10 : i32
    %12 = arith.extui %11 : i1 to i32
    %c0_i32_11 = arith.constant 0 : i32
    %13 = arith.cmpi ne, %12, %c0_i32_11 : i32
    scf.if %13 {
      %c0_12 = arith.constant 0 : index
      %c0_13 = arith.constant 0 : index
      %14 = vector.load %arg7[%c0_12, %c0_13] : memref<2x128xf32, #tpu.memory_space<vmem>>, vector<2x128xf32>
      %c0_14 = arith.constant 0 : index
      %c0_15 = arith.constant 0 : index
      %15 = vector.load %arg4[%c0_14, %c0_15] : memref<128x128xf32, #tpu.memory_space<vmem>>, vector<128x128xf32>
      %cst_16 = arith.constant dense<0.000000e+00> : vector<2x128xf32>
      %16 = tpu.matmul %14, %15, %cst_16 {dimension_numbers = #tpu.dot_dimension_numbers<[1], [0], [0], [1], [0, 0, 1, 1], [], []>} : vector<2x128xf32>, vector<128x128xf32>, vector<2x128xf32> -> vector<2x128xf32>
      %c0_17 = arith.constant 0 : index
      %c0_18 = arith.constant 0 : index
      %17 = vector.load %arg5[%c0_17, %c0_18] : memref<1x128xf32, #tpu.memory_space<vmem>>, vector<1x128xf32>
      %18 = vector.broadcast %17 : vector<1x128xf32> to vector<2x128xf32>
      %19 = arith.addf %16, %18 : vector<2x128xf32>
      %c0_19 = arith.constant 0 : index
      %c0_20 = arith.constant 0 : index
      %20 = vector.load %arg6[%c0_19, %c0_20] : memref<2x128xf32, #tpu.memory_space<vmem>>, vector<2x128xf32>
      tpu.vector_store %arg6[%c0_19, %c0_20], %19 {strides = array<i32>} : memref<2x128xf32, #tpu.memory_space<vmem>>, vector<2x128xf32>,
    } else {
    }
    return
  }
  func.func @transform_0(%arg0: i32) -> (i32, i32) {
    %c0_i32 = arith.constant 0 : i32
    %c0_i32_0 = arith.constant 0 : i32
    return %arg0, %c0_i32 : i32, i32
  }
  func.func @transform_1(%arg0: i32) -> (i32, i32) {
    %c0_i32 = arith.constant 0 : i32
    %c0_i32_0 = arith.constant 0 : i32
    return %arg0, %c0_i32 : i32, i32
  }
  func.func @transform_2(%arg0: i32) -> (i32, i32) {
    %c0_i32 = arith.constant 0 : i32
    %c0_i32_0 = arith.constant 0 : i32
    return %c0_i32, %arg0 : i32, i32
  }
  func.func @transform_3(%arg0: i32) -> (i32, i32) {
    %c0_i32 = arith.constant 0 : i32
    %c0_i32_0 = arith.constant 0 : i32
    %c0_i32_1 = arith.constant 0 : i32
    return %c0_i32, %c0_i32_0 : i32, i32
  }
  func.func @transform_4(%arg0: i32) -> (i32, i32) {
    %c0_i32 = arith.constant 0 : i32
    %c0_i32_0 = arith.constant 0 : i32
    %c0_i32_1 = arith.constant 0 : i32
    return %c0_i32, %c0_i32_0 : i32, i32
  }
  func.func @transform_5(%arg0: i32) -> (i32, i32) {
    %c0_i32 = arith.constant 0 : i32
    %c0_i32_0 = arith.constant 0 : i32
    %c0_i32_1 = arith.constant 0 : i32
    return %c0_i32, %c0_i32_0 : i32, i32
  }
}

</mosaic_0001>

<bundles_post_ra>
// kernel: astgcn_gat_forward.7
= control target key start
LH: loop header
LB: loop body
LE: loop exit
PB: predicated region body
PF: predicated region fallthrough
CT: control target
= control target key end

     0   :  { %vm190_vm0 = vcmask 31744   ;;  %s595_s2 = inlined_call_operand.vmem [shape: f32[128,4], index: 2, kind: input, shape index: {}]   ;;  %s596_s1 = inlined_call_operand.vmem [shape: f32[128,128], index: 1, kind: input, shape index: {}]   ;;  %s597_s0 = inlined_call_operand.vmem [shape: f32[128,128], index: 0, kind: input, shape index: {}]   ;;  %s598_s3 = inlined_call_operand.vmem [shape: f32[4,128], index: 3, kind: input, shape index: {}]   ;;  %s599_s5 = inlined_call_operand.vmem [shape: f32[128,4], index: 5, kind: output, shape index: {1}]   ;;  %s600_s4 = inlined_call_operand.vmem [shape: bf16[128,128], index: 4, kind: output, shape index: {0}]   ;;  %s601_s6 = inlined_call_operand.vmem [shape: f32[4,128], index: 6, kind: output, shape index: {2}]  }
   0x1   :  { %v131_v0 = vld [vmem:[%s595_s2 + $0x70] sm:$0xff]  ;;  %v132_v1 = vld [vmem:[%s595_s2 + $0x78] sm:$0xff]  ;;  %v129_v2 = vld [vmem:[%s595_s2 + $0x60] sm:$0xff] }
   0x2   :  { %v140_v3 = vpack.c.bf16 %v132_v1, %v131_v0  ;;  %v130_v4 = vld [vmem:[%s595_s2 + $0x68] sm:$0xff]  ;;  %v127_v6 = vld [vmem:[%s595_s2 + $0x50] sm:$0xff]  ;;  %v128_v7 = vld [vmem:[%s595_s2 + $0x58] sm:$0xff] }
   0x3   :  { %v139_v5 = vpack.c.bf16 %v130_v4, %v129_v2  ;;  %v58_v8 = vld [vmem:[%s596_s1 + $0x70] sm:$0xff]  ;;  %v59_v9 = vld [vmem:[%s596_s1 + $0x78] sm:$0xff]  ;;  %v56_v10 = vld [vmem:[%s596_s1 + $0x60] sm:$0xff]  ;;  %v138_v11 = vpack.c.bf16 %v128_v7, %v127_v6 }
   0x4   :  { %141 = vmatpush.bf16.msra.mxu1 %v140_v3  ;;  %v67_v12 = vpack.c.bf16 %v59_v9, %v58_v8  ;;  %v57_v13 = vld [vmem:[%s596_s1 + $0x68] sm:$0xff]  ;;  %v125_v14 = vld [vmem:[%s595_s2 + $0x40] sm:$0xff]  ;;  %v54_v17 = vld [vmem:[%s596_s1 + $0x50] sm:$0xff] }
   0x5   :  { %v126_v15 = vld [vmem:[%s595_s2 + $0x48] sm:$0xff]  ;;  %v66_v16 = vpack.c.bf16 %v57_v13, %v56_v10  ;;  %v55_v18 = vld [vmem:[%s596_s1 + $0x58] sm:$0xff]  ;;  %v123_v20 = vld [vmem:[%s595_s2 + $0x30] sm:$0xff] }
   0x6   :  { %68 = vmatpush.bf16.msra.mxu0 %v67_v12  ;;  %314 = vmatpush.bf16.msra.mxu3 %v67_v12  ;;  %v137_v19 = vpack.c.bf16 %v126_v15, %v125_v14  ;;  %v124_v21 = vld [vmem:[%s595_s2 + $0x38] sm:$0xff]  ;;  %v65_v22 = vpack.c.bf16 %v55_v18, %v54_v17  ;;  %v121_v24 = vld [vmem:[%s595_s2 + $0x20] sm:$0xff]  ;;  %v122_v25 = vld [vmem:[%s595_s2 + $0x28] sm:$0xff] }
   0x7   :  { %v136_v23 = vpack.c.bf16 %v124_v21, %v123_v20  ;;  %v52_v26 = vld [vmem:[%s596_s1 + $0x40] sm:$0xff]  ;;  %v53_v27 = vld [vmem:[%s596_s1 + $0x48] sm:$0xff]  ;;  %v50_v28 = vld [vmem:[%s596_s1 + $0x30] sm:$0xff]  ;;  %v135_v29 = vpack.c.bf16 %v122_v25, %v121_v24 }
   0x8   :  { %142 = vmatpush.bf16.msra.mxu1 %v139_v5  ;;  %v64_v30 = vpack.c.bf16 %v53_v27, %v52_v26  ;;  %v51_v31 = vld [vmem:[%s596_s1 + $0x38] sm:$0xff]  ;;  %v119_v32 = vld [vmem:[%s595_s2 + $0x10] sm:$0xff]  ;;  %v48_v35 = vld [vmem:[%s596_s1 + $0x20] sm:$0xff] }
   0x9   :  { %v120_v33 = vld [vmem:[%s595_s2 + $0x18] sm:$0xff]  ;;  %v63_v34 = vpack.c.bf16 %v51_v31, %v50_v28  ;;  %v49_v36 = vld [vmem:[%s596_s1 + $0x28] sm:$0xff]  ;;  %v117_v38 = vld [vmem:[%s595_s2] sm:$0xff] }
   0xa   :  { %69 = vmatpush.bf16.msra.mxu0 %v66_v16  ;;  %315 = vmatpush.bf16.msra.mxu3 %v66_v16  ;;  %v134_v37 = vpack.c.bf16 %v120_v33, %v119_v32  ;;  %v118_v39 = vld [vmem:[%s595_s2 + $0x8] sm:$0xff]  ;;  %v62_v40 = vpack.c.bf16 %v49_v36, %v48_v35  ;;  %v46_v41 = vld [vmem:[%s596_s1 + $0x10] sm:$0xff]  ;;  %v47_v42 = vld [vmem:[%s596_s1 + $0x18] sm:$0xff] }
   0xb   :  { %v133_v43 = vpack.c.bf16 %v118_v39, %v117_v38  ;;  %v20_v44 = vld [vmem:[%s597_s0] sm:$0xff]  ;;  %v21_v45 = vld [vmem:[%s597_s0 + $0x8] sm:$0xff]  ;;  %v61_v46 = vpack.c.bf16 %v47_v42, %v46_v41  ;;  %v34_v50 = vld [vmem:[%s597_s0 + $0x70] sm:$0xff] }
   0xc   :  { %143 = vmatpush.bf16.msra.mxu1 %v138_v11  ;;  %v36_v47 = vpack.c.bf16 %v21_v45, %v20_v44  ;;  %v44_v48 = vld [vmem:[%s596_s1] sm:$0xff]  ;;  %v45_v49 = vld [vmem:[%s596_s1 + $0x8] sm:$0xff]  ;;  %v35_v52 = vld [vmem:[%s597_s0 + $0x78] sm:$0xff] }
   0xd   :  { %v60_v51 = vpack.c.bf16 %v45_v49, %v44_v48  ;;  %v43_v53 = vpack.c.bf16 %v35_v52, %v34_v50  ;;  %v32_v54 = vld [vmem:[%s597_s0 + $0x60] sm:$0xff]  ;;  %v33_v55 = vld [vmem:[%s597_s0 + $0x68] sm:$0xff]  ;;  %v22_v57 = vld [vmem:[%s597_s0 + $0x10] sm:$0xff] }
   0xe   :  { %70 = vmatpush.bf16.msra.mxu0 %v65_v22  ;;  %316 = vmatpush.bf16.msra.mxu3 %v65_v22  ;;  %v42_v56 = vpack.c.bf16 %v33_v55, %v32_v54  ;;  %v23_v58 = vld [vmem:[%s597_s0 + $0x18] sm:$0xff]  ;;  %v30_v60 = vld [vmem:[%s597_s0 + $0x50] sm:$0xff]  ;;  %v28_v63 = vld [vmem:[%s597_s0 + $0x40] sm:$0xff] }
   0xf   :  { %209 = vmatpush.bf16.xpose.msra.mxu2 %v43_v53  ;;  %v37_v59 = vpack.c.bf16 %v23_v58, %v22_v57  ;;  %v31_v61 = vld [vmem:[%s597_s0 + $0x58] sm:$0xff]  ;;  %v29_v0 = vld [vmem:[%s597_s0 + $0x48] sm:$0xff]  ;;  %v24_v2 = vld [vmem:[%s597_s0 + $0x20] sm:$0xff] }
  0x10   :  { %144 = vmatpush.bf16.msra.mxu1 %v137_v19  ;;  %v41_v62 = vpack.c.bf16 %v31_v61, %v30_v60  ;;  %v40_v1 = vpack.c.bf16 %v29_v0, %v28_v63  ;;  %v25_v3 = vld [vmem:[%s597_s0 + $0x28] sm:$0xff]  ;;  %v26_v5 = vld [vmem:[%s597_s0 + $0x30] sm:$0xff]  ;;  %v27_v6 = vld [vmem:[%s597_s0 + $0x38] sm:$0xff] }
  0x11   :  { %v38_v4 = vpack.c.bf16 %v25_v3, %v24_v2  ;;  %v39_v7 = vpack.c.bf16 %v27_v6, %v26_v5  ;;  %v207_v8 = vld [vmem:[%s598_s3] sm:$0xf] }
  0x12   :  { %71 = vmatpush.bf16.msra.mxu0 %v64_v30  ;;  %317 = vmatpush.bf16.msra.mxu3 %v64_v30  ;;  %v208_v9 = vpack.c.bf16 %v207_v8, %v207_v8 }
  0x14   :  { %145 = vmatpush.bf16.msra.mxu1 %v136_v23 }
  0x16   :  { %72 = vmatpush.bf16.msra.mxu0 %v63_v34  ;;  %318 = vmatpush.bf16.msra.mxu3 %v63_v34 }
  0x17   :  { %210 = vmatpush.bf16.xpose.msra.mxu2 %v42_v56 }
  0x18   :  { %146 = vmatpush.bf16.msra.mxu1 %v135_v29 }
  0x1a   :  { %73 = vmatpush.bf16.msra.mxu0 %v62_v40  ;;  %319 = vmatpush.bf16.msra.mxu3 %v62_v40 }
  0x1c   :  { %147 = vmatpush.bf16.msra.mxu1 %v134_v37 }
  0x1e   :  { %74 = vmatpush.bf16.msra.mxu0 %v61_v46  ;;  %320 = vmatpush.bf16.msra.mxu3 %v61_v46 }
  0x1f   :  { %211 = vmatpush.bf16.xpose.msra.mxu2 %v41_v62 }
  0x20   :  { %148 = vmatpush.bf16.msra.mxu1 %v133_v43 }
  0x22   :  { %75 = vmatpush.bf16.msra.mxu0 %v60_v51  ;;  %321 = vmatpush.bf16.msra.mxu3 %v60_v51 }
  0x23   :  { %149 = vmatmul.bf16.vlgmr.msra.gmra.mxu1 %v36_v47 }
  0x25   :  { %76 = vmatmul.bf16.vlgmr.msra.gmra.mxu0 %v36_v47  ;;  %101 = vmatmul.bf16.vlgmr.msra.gmra.mxu3 %v41_v62 }
  0x27   :  { %212 = vmatpush.bf16.xpose.msra.mxu2 %v40_v1 }
  0x2f   :  { %213 = vmatpush.bf16.xpose.msra.mxu2 %v39_v7 }
  0x33   :  { %154 = vmatmul.bf16.gmra.mxu1 %v37_v59 }
  0x35   :  { %81 = vmatmul.bf16.gmra.mxu0 %v37_v59  ;;  %106 = vmatmul.bf16.gmra.mxu3 %v42_v56 }
  0x37   :  { %214 = vmatpush.bf16.xpose.msra.mxu2 %v38_v4 }
  0x3f   :  { %215 = vmatpush.bf16.xpose.msra.mxu2 %v37_v59 }
  0x43   :  { %159 = vmatmul.bf16.gmra.mxu1 %v38_v4 }
  0x45   :  { %86 = vmatmul.bf16.gmra.mxu0 %v38_v4  ;;  %111 = vmatmul.bf16.gmra.mxu3 %v43_v53 }
  0x47   :  { %216 = vmatpush.bf16.xpose.msra.mxu2 %v36_v47 }
  0x4e   :  { %217 = vmatmul.bf16.vlgmr.msra.gmra.mxu2 %v208_v9 }
  0x53   :  { %164 = vmatmul.bf16.gmra.mxu1 %v39_v7 }
  0x55   :  { %91 = vmatmul.bf16.gmra.mxu0 %v39_v7 }
  0x63   :  { %169 = vmatmul.bf16.gmra.mxu1 %v40_v1 }
  0x65   :  { %96 = vmatmul.bf16.gmra.mxu0 %v40_v1 }
  0x73   :  { %174 = vmatmul.bf16.gmra.mxu1 %v41_v62 }
  0x83   :  { %179 = vmatmul.bf16.gmra.mxu1 %v42_v56 }
  0x93   :  { %184 = vmatmul.bf16.gmra.mxu1 %v43_v53 }
  0xa0   :  { %v150_v10 = vpop.f32.mrf.mxu1 }
  0xa1   :  { %191 = vst.msk [vmem:[%s599_s5] sm:$0xff] %vm190_vm0, %v150_v10 }
  0xa2   :  { %v77_v11 = vpop.f32.mrf.mxu0 }
  0xa8   :  { %v152_v12 = vpop.f32.mrf.mxu1  ;;  %v102_v21 = vpop.f32.mrf.mxu3 }
  0xa9   :  { %192 = vst.msk [vmem:[%s599_s5 + $0x8] sm:$0xff] %vm190_vm0, %v152_v12 }
  0xaa   :  { %v79_v13 = vpop.f32.mrf.mxu0 }
  0xab   :  { %v270_v14 = vpack.c.bf16 %v79_v13, %v77_v11 }
  0xad   :  { %271 = vst [vmem:[%s600_s4] sm:$0xff] %v270_v14  }
  0xb0   :  { %v155_v15 = vpop.f32.mrf.mxu1  ;;  %v104_v24 = vpop.f32.mrf.mxu3 }
  0xb1   :  { %193 = vst.msk [vmem:[%s599_s5 + $0x10] sm:$0xff] %vm190_vm0, %v155_v15  ;;  %v295_v25 = vpack.c.bf16 %v104_v24, %v102_v21 }
  0xb2   :  { %v82_v16 = vpop.f32.mrf.mxu0 }
  0xb3   :  { %311 = vst [vmem:[%s600_s4 + $0x28] sm:$0xff] %v295_v25  }
  0xb8   :  { %v157_v17 = vpop.f32.mrf.mxu1  ;;  %v107_v29 = vpop.f32.mrf.mxu3 }
  0xb9   :  { %194 = vst.msk [vmem:[%s599_s5 + $0x18] sm:$0xff] %vm190_vm0, %v157_v17 }
  0xba   :  { %v84_v18 = vpop.f32.mrf.mxu0 }
  0xbb   :  { %v275_v19 = vpack.c.bf16 %v84_v18, %v82_v16 }
  0xbd   :  { %307 = vst [vmem:[%s600_s4 + $0x8] sm:$0xff] %v275_v19  }
  0xc0   :  { %v160_v20 = vpop.f32.mrf.mxu1  ;;  %v109_v32 = vpop.f32.mrf.mxu3 }
  0xc1   :  { %195 = vst.msk [vmem:[%s599_s5 + $0x20] sm:$0xff] %vm190_vm0, %v160_v20  ;;  %v300_v33 = vpack.c.bf16 %v109_v32, %v107_v29 }
  0xc2   :  { %v87_v22 = vpop.f32.mrf.mxu0 }
  0xc3   :  { %312 = vst [vmem:[%s600_s4 + $0x30] sm:$0xff] %v300_v33  }
  0xc8   :  { %v162_v23 = vpop.f32.mrf.mxu1  ;;  %v112_v37 = vpop.f32.mrf.mxu3 }
  0xc9   :  { %196 = vst.msk [vmem:[%s599_s5 + $0x28] sm:$0xff] %vm190_vm0, %v162_v23 }
  0xca   :  { %v89_v26 = vpop.f32.mrf.mxu0 }
  0xcb   :  { %v280_v27 = vpack.c.bf16 %v89_v26, %v87_v22 }
  0xcd   :  { %308 = vst [vmem:[%s600_s4 + $0x10] sm:$0xff] %v280_v27  }
  0xd0   :  { %v165_v28 = vpop.f32.mrf.mxu1  ;;  %v114_v41 = vpop.f32.mrf.mxu3 }
  0xd1   :  { %197 = vst.msk [vmem:[%s599_s5 + $0x30] sm:$0xff] %vm190_vm0, %v165_v28  ;;  %v218_v40 = vpop.f32.mrf.mxu2  ;;  %v305_v42 = vpack.c.bf16 %v114_v41, %v112_v37 }
  0xd2   :  { %v92_v30 = vpop.f32.mrf.mxu0  ;;  %222 = vst [vmem:[%s601_s6] sm:$0xf] %v218_v40 }
  0xd3   :  { %313 = vst [vmem:[%s600_s4 + $0x38] sm:$0xff] %v305_v42  }
  0xd8   :  { %v167_v31 = vpop.f32.mrf.mxu1 }
  0xd9   :  { %198 = vst.msk [vmem:[%s599_s5 + $0x38] sm:$0xff] %vm190_vm0, %v167_v31  ;;  %v220_v46 = vpop.f32.mrf.mxu2 }
  0xda   :  { %v94_v34 = vpop.f32.mrf.mxu0 }
  0xdb   :  { %v285_v35 = vpack.c.bf16 %v94_v34, %v92_v30 }
  0xdd   :  { %309 = vst [vmem:[%s600_s4 + $0x18] sm:$0xff] %v285_v35  }
  0xe0   :  { %v170_v36 = vpop.f32.mrf.mxu1 }
  0xe1   :  { %199 = vst.msk [vmem:[%s599_s5 + $0x40] sm:$0xff] %vm190_vm0, %v170_v36 }
  0xe2   :  { %v97_v38 = vpop.f32.mrf.mxu0 }
  0xe8   :  { %v172_v39 = vpop.f32.mrf.mxu1 }
  0xe9   :  { %200 = vst.msk [vmem:[%s599_s5 + $0x48] sm:$0xff] %vm190_vm0, %v172_v39 }
  0xea   :  { %v99_v43 = vpop.f32.mrf.mxu0 }
  0xeb   :  { %v290_v44 = vpack.c.bf16 %v99_v43, %v97_v38 }
  0xed   :  { %310 = vst [vmem:[%s600_s4 + $0x20] sm:$0xff] %v290_v44  }
  0xf0   :  { %v175_v45 = vpop.f32.mrf.mxu1 }
  0xf1   :  { %201 = vst.msk [vmem:[%s599_s5 + $0x50] sm:$0xff] %vm190_vm0, %v175_v45 }
  0xf8   :  { %v177_v47 = vpop.f32.mrf.mxu1 }
  0xf9   :  { %202 = vst.msk [vmem:[%s599_s5 + $0x58] sm:$0xff] %vm190_vm0, %v177_v47 }
 0x100   :  { %v180_v48 = vpop.f32.mrf.mxu1 }
 0x101   :  { %203 = vst.msk [vmem:[%s599_s5 + $0x60] sm:$0xff] %vm190_vm0, %v180_v48 }
 0x108   :  { %v182_v49 = vpop.f32.mrf.mxu1 }
 0x109   :  { %204 = vst.msk [vmem:[%s599_s5 + $0x68] sm:$0xff] %vm190_vm0, %v182_v49 }
 0x110   :  { %v185_v50 = vpop.f32.mrf.mxu1 }
 0x111   :  { %205 = vst.msk [vmem:[%s599_s5 + $0x70] sm:$0xff] %vm190_vm0, %v185_v50 }
 0x118   :  { %v187_v51 = vpop.f32.mrf.mxu1 }
 0x119   :  { %206 = vst.msk [vmem:[%s599_s5 + $0x78] sm:$0xff] %vm190_vm0, %v187_v51 }

// kernel: astgcn_gat_forward.13
= control target key start
LH: loop header
LB: loop body
LE: loop exit
PB: predicated region body
PF: predicated region fallthrough
CT: control target
= control target key end

     0   :  { %v188_v11 = vmov 0.0   ;;  %s373_s0 = inlined_call_operand.vmem [shape: f32[128,128], index: 0, kind: input, shape index: {}]   ;;  %s374_s1 = inlined_call_operand.vmem [shape: f32[128,128], index: 1, kind: input, shape index: {}]   ;;  %s375_s2 = inlined_call_operand.vmem [shape: f32[2,128], index: 2, kind: input, shape index: {}]   ;;  %s376_s3 = inlined_call_operand.vmem [shape: f32[128,128], index: 3, kind: input, shape index: {}]   ;;  %s377_s4 = inlined_call_operand.vmem [shape: f32[1,128], index: 4, kind: input, shape index: {}]   ;;  %s378_s5 = inlined_call_operand.hbm [shape: f32[2,128], index: 5, kind: output, shape index: {}]  }
   0x1   :  { %v41_v0 = vld [vmem:[%s373_s0 + $0x78] sm:$0xff]  ;;  %v40_v2 = vld [vmem:[%s373_s0 + $0x70] sm:$0xff]  ;;  %v39_v5 = vld [vmem:[%s373_s0 + $0x68] sm:$0xff]  ;;  %25 = vst [vmem:[#allocation2] sm:$0x3] %v188_v11 }
   0x2   :  { %v57_v1 = vld [vmem:[%s374_s1 + $0x78] sm:$0xff]  ;;  %v56_v4 = vld [vmem:[%s374_s1 + $0x70] sm:$0xff]  ;;  %v55_v6 = vld [vmem:[%s374_s1 + $0x68] sm:$0xff] }
   0x3   :  { %v73_v3 = vadd.f32 %v57_v1, %v41_v0  ;;  %v72_v7 = vadd.f32 %v56_v4, %v40_v2  ;;  %v38_v8 = vld [vmem:[%s373_s0 + $0x60] sm:$0xff]  ;;  %v71_v10 = vadd.f32 %v55_v6, %v39_v5  ;;  %v37_v12 = vld [vmem:[%s373_s0 + $0x58] sm:$0xff]  ;;  %v36_v15 = vld [vmem:[%s373_s0 + $0x50] sm:$0xff] }
   0x4   :  { %v54_v9 = vld [vmem:[%s374_s1 + $0x60] sm:$0xff]  ;;  %v53_v13 = vld [vmem:[%s374_s1 + $0x58] sm:$0xff]  ;;  %v52_v16 = vld [vmem:[%s374_s1 + $0x50] sm:$0xff] }
   0x5   :  { %76 = vmatpush.msra.mxu0 %v73_v3  ;;  %v70_v14 = vadd.f32 %v54_v9, %v38_v8  ;;  %v69_v17 = vadd.f32 %v53_v13, %v37_v12  ;;  %v35_v18 = vld [vmem:[%s373_s0 + $0x48] sm:$0xff]  ;;  %v68_v20 = vadd.f32 %v52_v16, %v36_v15  ;;  %v34_v21 = vld [vmem:[%s373_s0 + $0x40] sm:$0xff]  ;;  %v117_v24 = vld [vmem:[%s376_s3 + $0x78] sm:$0xff] }
   0x6   :  { %v51_v19 = vld [vmem:[%s374_s1 + $0x48] sm:$0xff]  ;;  %v50_v22 = vld [vmem:[%s374_s1 + $0x40] sm:$0xff]  ;;  %v116_v25 = vld [vmem:[%s376_s3 + $0x70] sm:$0xff]  ;;  %122 = vmatpush.msra.mxu1 %v117_v24 }
   0x7   :  { %77 = vmatpush.msra.mxu0 %v72_v7  ;;  %v67_v23 = vadd.f32 %v51_v19, %v35_v18  ;;  %v33_v26 = vld [vmem:[%s373_s0 + $0x38] sm:$0xff]  ;;  %v66_v28 = vadd.f32 %v50_v22, %v34_v21  ;;  %v115_v29 = vld [vmem:[%s376_s3 + $0x68] sm:$0xff]  ;;  %v32_v30 = vld [vmem:[%s373_s0 + $0x30] sm:$0xff] }
   0x8   :  { %v49_v27 = vld [vmem:[%s374_s1 + $0x38] sm:$0xff]  ;;  %v48_v31 = vld [vmem:[%s374_s1 + $0x30] sm:$0xff]  ;;  %123 = vmatpush.msra.mxu1 %v116_v25  ;;  %v114_v33 = vld [vmem:[%s376_s3 + $0x60] sm:$0xff] }
   0x9   :  { %78 = vmatpush.msra.mxu0 %v71_v10  ;;  %v65_v32 = vadd.f32 %v49_v27, %v33_v26 }
   0xb   :  { %79 = vmatpush.msra.mxu0 %v70_v14 }
   0xd   :  { %80 = vmatpush.msra.mxu0 %v69_v17 }
   0xf   :  { %81 = vmatpush.msra.mxu0 %v68_v20 }
  0x11   :  { %82 = vmatpush.msra.mxu0 %v67_v23 }
  0x12   :  { %10 = vsyncpa [#allocation4], 0  ;;  %v31_v34 = vld [vmem:[%s373_s0 + $0x28] sm:$0xff]  ;;  %124 = vmatpush.msra.mxu1 %v115_v29  ;;  %v64_v36 = vadd.f32 %v48_v31, %v32_v30  ;;  %v113_v37 = vld [vmem:[%s376_s3 + $0x58] sm:$0xff]  ;;  %s189_s15 = smov [#allocation3]   ;;  %s150_s19 = sshll.u32 %s378_s5, 4  ;;  %s151_s19 = int_to_ptr.hbm [resolvable:$true] %s150_s19 }
  0x13   :  { %v47_v35 = vld [vmem:[%s374_s1 + $0x28] sm:$0xff]  ;;  %83 = vmatpush.msra.mxu0 %v66_v28  ;;  %v30_v38 = vld [vmem:[%s373_s0 + $0x20] sm:$0xff]  ;;  %v112_v41 = vld [vmem:[%s376_s3 + $0x50] sm:$0xff]  ;;  %s148_s16 = sshll.u32 %s189_s15, 4  ;;  %s149_s16 = int_to_ptr.vmem [resolvable:$true] %s148_s16 }
  0x14   :  { %v46_v39 = vld [vmem:[%s374_s1 + $0x20] sm:$0xff]  ;;  %125 = vmatpush.msra.mxu1 %v114_v33  ;;  %v63_v40 = vadd.f32 %v47_v35, %v31_v34  ;;  %v29_v42 = vld [vmem:[%s373_s0 + $0x18] sm:$0xff]  ;;  %v111_v45 = vld [vmem:[%s376_s3 + $0x48] sm:$0xff] }
  0x15   :  { %84 = vmatpush.msra.mxu0 %v65_v32  ;;  %v45_v43 = vld [vmem:[%s374_s1 + $0x18] sm:$0xff]  ;;  %v62_v44 = vadd.f32 %v46_v39, %v30_v38  ;;  %v28_v46 = vld [vmem:[%s373_s0 + $0x10] sm:$0xff]  ;;  %v110_v49 = vld [vmem:[%s376_s3 + $0x40] sm:$0xff] }
  0x16   :  { %126 = vmatpush.msra.mxu1 %v113_v37  ;;  %v44_v47 = vld [vmem:[%s374_s1 + $0x10] sm:$0xff]  ;;  %v61_v48 = vadd.f32 %v45_v43, %v29_v42  ;;  %v27_v50 = vld [vmem:[%s373_s0 + $0x8] sm:$0xff]  ;;  %v109_v53 = vld [vmem:[%s376_s3 + $0x38] sm:$0xff] }
  0x17   :  { %85 = vmatpush.msra.mxu0 %v64_v36  ;;  %v43_v51 = vld [vmem:[%s374_s1 + $0x8] sm:$0xff]  ;;  %v60_v52 = vadd.f32 %v44_v47, %v28_v46  ;;  %v26_v54 = vld [vmem:[%s373_s0] sm:$0xff]  ;;  %v108_v57 = vld [vmem:[%s376_s3 + $0x30] sm:$0xff] }
  0x18   :  { %127 = vmatpush.msra.mxu1 %v112_v41  ;;  %v42_v55 = vld [vmem:[%s374_s1] sm:$0xff]  ;;  %v59_v56 = vadd.f32 %v43_v51, %v27_v50  ;;  %v107_v60 = vld [vmem:[%s376_s3 + $0x28] sm:$0xff]  ;;  %v105_v62 = vld [vmem:[%s376_s3 + $0x18] sm:$0xff] }
  0x19   :  { %86 = vmatpush.msra.mxu0 %v63_v40  ;;  %v58_v58 = vadd.f32 %v42_v55, %v26_v54  ;;  %v75_v59 = vld [vmem:[%s375_s2] sm:$0x3]  ;;  %v104_v63 = vld [vmem:[%s376_s3 + $0x10] sm:$0xff]  ;;  %v103_v0 = vld [vmem:[%s376_s3 + $0x8] sm:$0xff] }
  0x1a   :  { %128 = vmatpush.msra.mxu1 %v111_v45  ;;  %v106_v61 = vld [vmem:[%s376_s3 + $0x20] sm:$0xff] }
  0x1b   :  { %87 = vmatpush.msra.mxu0 %v62_v44  ;;  %v102_v1 = vld [vmem:[%s376_s3] sm:$0xff] }
  0x1c   :  { %129 = vmatpush.msra.mxu1 %v110_v49  ;;  %v74_v2 = vld [vmem:[#allocation2] sm:$0x3] }
  0x1d   :  { %88 = vmatpush.msra.mxu0 %v61_v48  ;;  %v161_v6 = vld [vmem:[%s377_s4] ss:$0 sm:$0xff] }
  0x1e   :  { %130 = vmatpush.msra.mxu1 %v109_v53 }
  0x1f   :  { %89 = vmatpush.msra.mxu0 %v60_v52 }
  0x20   :  { %131 = vmatpush.msra.mxu1 %v108_v57 }
  0x21   :  { %90 = vmatpush.msra.mxu0 %v59_v56 }
  0x22   :  { %132 = vmatpush.msra.mxu1 %v107_v60 }
  0x23   :  { %91 = vmatpush.msra.mxu0 %v58_v58 }
  0x24   :  { %92 = vmatmul.f32.vlgmr.msra.gmra.mxu0 %v75_v59  ;;  %133 = vmatpush.msra.mxu1 %v106_v61 }
  0x26   :  { %134 = vmatpush.msra.mxu1 %v105_v62 }
  0x28   :  { %135 = vmatpush.msra.mxu1 %v104_v63 }
  0x2a   :  { %136 = vmatpush.msra.mxu1 %v103_v0 }
  0x2c   :  { %137 = vmatpush.msra.mxu1 %v102_v1 }
  0xa1   :  { %v93_v3 = vpop.f32.mrf.mxu0 }
  0xa2   :  { %v96_v4 = vadd.f32 %v93_v3, %v74_v2 }
  0xa4   :  { %97 = vst [vmem:[#allocation2] sm:$0x3] %v96_v4 }
  0xab   :  { %v101_v5 = vld [vmem:[#allocation2] sm:$0x3] }
  0xac   :  { %138 = vmatmul.f32.vlgmr.msra.gmra.mxu1 %v101_v5 }
 0x129   :  { %v139_v7 = vpop.f32.mrf.mxu1 }
 0x12a   :  { %v140_v8 = vadd.f32 %v161_v6, %v139_v7 }
 0x12c   :  { %142 = vst [vmem:[#allocation3] sm:$0x3] %v140_v8 }
 0x12d   :  { %153 = dma.vmem_to_hbm [thread:$0]  %s149_s16, 32, %s151_s19, [#allocation4]  }
 0x12e   :  { %186 = dma.done.wait [#allocation4], 32  }
 0x12f   :  { %187 = vsyncadd [#allocation4], 4294967264 }
 0x130   :  { %158 = vsyncpa [#allocation4], 1 }

// kernel: astgcn_gat_forward.8
= control target key start
LH: loop header
LB: loop body
LE: loop exit
PB: predicated region body
PF: predicated region fallthrough
CT: control target
= control target key end

     0   :  { %v4097_v0 = vmov -inf   ;;  %v4098_v1 = vmov 0.0   ;;  %s6794_s0 = inlined_call_operand.<no memory space> [shape: s32[1,1], index: 0, kind: input, shape index: {}]   ;;  %s6795_s1 = inlined_call_operand.vmem [shape: s8[128,128], index: 1, kind: input, shape index: {}]   ;;  %s6796_s2 = inlined_call_operand.vmem [shape: f32[128,4], index: 2, kind: input, shape index: {}]   ;;  %s6797_s3 = inlined_call_operand.vmem [shape: f32[4,128], index: 3, kind: input, shape index: {}]   ;;  %s6798_s4 = inlined_call_operand.vmem [shape: bf16[128,128], index: 4, kind: input, shape index: {}]   ;;  %s6799_s5 = inlined_call_operand.vmem [shape: f32[1,128], index: 5, kind: input, shape index: {}]   ;;  %s6800_s6 = inlined_call_operand.vmem [shape: f32[4,128], index: 6, kind: input, shape index: {}]   ;;  %s6801_s7 = inlined_call_operand.vmem [shape: f32[128,128], index: 7, kind: output, shape index: {}]  }
   0x1   :  { %29 = vst [vmem:[#allocation2 + $0x30] sm:$0xff] %v4097_v0  ;;  %p3614_p0 = scmp.le.s32.totalorder %s6794_s0, 0 }
   0x2   :  { %30 = vst [vmem:[#allocation2] sm:$0xff] %v4097_v0 }
   0x3   :  { %31 = vst [vmem:[#allocation2 + $0x58] sm:$0xff] %v4097_v0 }
   0x4   :  { %32 = vst [vmem:[#allocation2 + $0x18] sm:$0xff] %v4097_v0 }
   0x5   :  { %33 = vst [vmem:[#allocation2 + $0x50] sm:$0xff] %v4097_v0 }
   0x6   :  { %34 = vst [vmem:[#allocation2 + $0x68] sm:$0xff] %v4097_v0 }
   0x7   :  { %35 = vst [vmem:[#allocation2 + $0x8] sm:$0xff] %v4097_v0 }
   0x8   :  { %36 = vst [vmem:[#allocation2 + $0x48] sm:$0xff] %v4097_v0 }
   0x9   :  { %37 = vst [vmem:[#allocation2 + $0x40] sm:$0xff] %v4097_v0 }
   0xa   :  { %38 = vst [vmem:[#allocation2 + $0x20] sm:$0xff] %v4097_v0 }
   0xb   :  { %39 = vst [vmem:[#allocation2 + $0x10] sm:$0xff] %v4097_v0 }
   0xc   :  { %40 = vst [vmem:[#allocation2 + $0x38] sm:$0xff] %v4097_v0 }
   0xd   :  { %41 = vst [vmem:[#allocation2 + $0x60] sm:$0xff] %v4097_v0 }
   0xe   :  { %42 = vst [vmem:[#allocation2 + $0x70] sm:$0xff] %v4097_v0 }
   0xf   :  { %43 = vst [vmem:[#allocation2 + $0x78] sm:$0xff] %v4097_v0 }
  0x10   :  { %44 = vst [vmem:[#allocation2 + $0x28] sm:$0xff] %v4097_v0 }
  0x11   :  { %45 = vst [vmem:[#allocation3 + $0x28] sm:$0xff] %v4098_v1 }
  0x12   :  { %46 = vst [vmem:[#allocation3 + $0x68] sm:$0xff] %v4098_v1 }
  0x13   :  { %47 = vst [vmem:[#allocation3 + $0x10] sm:$0xff] %v4098_v1 }
  0x14   :  { %48 = vst [vmem:[#allocation3 + $0x40] sm:$0xff] %v4098_v1 }
  0x15   :  { %49 = vst [vmem:[#allocation3 + $0x48] sm:$0xff] %v4098_v1 }
  0x16   :  { %50 = vst [vmem:[#allocation3 + $0x30] sm:$0xff] %v4098_v1 }
  0x17   :  { %51 = vst [vmem:[#allocation3 + $0x70] sm:$0xff] %v4098_v1 }
  0x18   :  { %52 = vst [vmem:[#allocation3 + $0x38] sm:$0xff] %v4098_v1 }
  0x19   :  { %53 = vst [vmem:[#allocation3 + $0x20] sm:$0xff] %v4098_v1 }
  0x1a   :  { %54 = vst [vmem:[#allocation3 + $0x78] sm:$0xff] %v4098_v1 }
  0x1b   :  { %55 = vst [vmem:[#allocation3 + $0x18] sm:$0xff] %v4098_v1 }
  0x1c   :  { %56 = vst [vmem:[#allocation3 + $0x58] sm:$0xff] %v4098_v1 }
  0x1d   :  { %57 = vst [vmem:[#allocation3] sm:$0xff] %v4098_v1 }
  0x1e   :  { %58 = vst [vmem:[#allocation3 + $0x8] sm:$0xff] %v4098_v1 }
  0x1f   :  { %59 = vst [vmem:[#allocation3 + $0x60] sm:$0xff] %v4098_v1 }
  0x20   :  { %60 = vst [vmem:[#allocation3 + $0x50] sm:$0xff] %v4098_v1 }
  0x21   :  { %61 = vst [vmem:[#allocation4 + $0x8] sm:$0xff] %v4098_v1 }
  0x22   :  { %62 = vst [vmem:[#allocation4] sm:$0xff] %v4098_v1 }
  0x23   :  { %63 = vst [vmem:[#allocation4 + $0x48] sm:$0xff] %v4098_v1 }
  0x24   :  { %64 = vst [vmem:[#allocation4 + $0x60] sm:$0xff] %v4098_v1 }
  0x25   :  { %65 = vst [vmem:[#allocation4 + $0x68] sm:$0xff] %v4098_v1 }
  0x26   :  { %66 = vst [vmem:[#allocation4 + $0x18] sm:$0xff] %v4098_v1 }
  0x27   :  { %67 = vst [vmem:[#allocation4 + $0x10] sm:$0xff] %v4098_v1 }
  0x28   :  { %68 = vst [vmem:[#allocation4 + $0x38] sm:$0xff] %v4098_v1 }
  0x29   :  { %69 = vst [vmem:[#allocation4 + $0x40] sm:$0xff] %v4098_v1 }
  0x2a   :  { %70 = vst [vmem:[#allocation4 + $0x28] sm:$0xff] %v4098_v1 }
  0x2b   :  { %71 = vst [vmem:[#allocation4 + $0x70] sm:$0xff] %v4098_v1 }
  0x2c   :  { %72 = vst [vmem:[#allocation4 + $0x20] sm:$0xff] %v4098_v1  ;;  %84 = sbr.rel (%p3614_p0) target bundleno = 2605 (0xa2d), region = 33 }
  0x2d   :  { %73 = vst [vmem:[#allocation4 + $0x58] sm:$0xff] %v4098_v1 }
  0x2e   :  { %74 = vst [vmem:[#allocation4 + $0x30] sm:$0xff] %v4098_v1 }
  0x2f   :  { %75 = vst [vmem:[#allocation4 + $0x50] sm:$0xff] %v4098_v1 }
  0x30   :  { %76 = vst [vmem:[#allocation4 + $0x78] sm:$0xff] %v4098_v1 }
  0x31   :  { %v4152_v2 = vld [vmem:[%s6796_s2 + $0x20] sm:$0xff]  ;;  %v4157_v3 = vld [vmem:[%s6796_s2 + $0x10] sm:$0xff]  ;;  %v4099_v5 = vmov 0   ;;  %v4170_v6 = vld [vmem:[%s6796_s2 + $0x28] sm:$0xff]  ;;  %v4100_v19 = vmov 1  }
  0x32   :  { %v149_v4 = vld [vmem:[%s6796_s2] sm:$0xff]  ;;  %3705 = vset.pattern.permute.xlu2 %v4099_v5  ;;  %3704 = vset.pattern.permute.xlu1 %v4099_v5  ;;  %v4175_v7 = vld [vmem:[%s6796_s2 + $0x18] sm:$0xff]  ;;  %v150_v8 = vld [vmem:[%s6796_s2 + $0x8] sm:$0xff] }
  0x33   :  { %3703 = vset.pattern.permute.xlu0 %v4099_v5  ;;  %253 = vperm.xlu2 %3705, %v4152_v2   ;;  %v4185_v9 = vld [vmem:[%s6796_s2 + $0x40] sm:$0xff]  ;;  %v4190_v10 = vld [vmem:[%s6796_s2 + $0x38] sm:$0xff]  ;;  %v4195_v11 = vld [vmem:[%s6796_s2 + $0x30] sm:$0xff] }
  0x34   :  { %243 = vperm.xlu1 %3704, %v4157_v3   ;;  %233 = vperm.xlu0 %3703, %v149_v4   ;;  %v4203_v12 = vld [vmem:[%s6796_s2 + $0x58] sm:$0xff]  ;;  %v4208_v13 = vld [vmem:[%s6796_s2 + $0x50] sm:$0xff]  ;;  %v4213_v14 = vld [vmem:[%s6796_s2 + $0x48] sm:$0xff] }
  0x35   :  { %v4221_v15 = vld [vmem:[%s6796_s2 + $0x70] sm:$0xff]  ;;  %v4226_v16 = vld [vmem:[%s6796_s2 + $0x68] sm:$0xff]  ;;  %v4231_v17 = vld [vmem:[%s6796_s2 + $0x60] sm:$0xff] }
  0x36   :  { %v4239_v18 = vld [vmem:[%s6796_s2 + $0x78] sm:$0xff]  ;;  %v4245_v20 = vld [vmem:[%s6795_s1 + $0x4] sm:$0xff]   ;;  %v3656_v21 = vld [vmem:[%s6795_s1] sm:$0xf]  }
  0x37   :  { %v4253_v22 = vld [vmem:[%s6797_s3] sm:$0xf]  ;;  %v3661_v23 = vunpack.c.0.s8 %v4245_v20  ;;  %v3657_v24 = vunpack.c.0.s8 %v3656_v21  ;;  %v3665_v33 = vunpack.c.2.s8 %v4245_v20  ;;  %v3658_v35 = vunpack.c.1.s8 %v3656_v21  ;;  %v4288_v48 = vld [vmem:[%s6795_s1 + $0xc] sm:$0xff]  }
  0x38   :  { %v4257_v25 = vperm.slane %v4253_v22, 0  ;;  %v3662_v49 = vunpack.c.1.s8 %v4245_v20  ;;  %v3669_v53 = vunpack.c.0.s8 %v4288_v48  ;;  %v3670_v54 = vunpack.c.1.s8 %v4288_v48 }
  0x39   :  { %v4259_v26 = vcvt.s32.f32 %v3661_v23  ;;  %v4261_v27 = vcvt.s32.f32 %v3657_v24  ;;  %v4269_v40 = vcvt.s32.f32 %v3665_v33  ;;  %v4281_v44 = vcvt.s32.f32 %v3658_v35  ;;  %v4320_v23 = vld [vmem:[%s6795_s1 + $0x14] sm:$0xff]  }
  0x3a   :  { %v4299_v58 = vcvt.s32.f32 %v3662_v49  ;;  %v4305_v60 = vcvt.s32.f32 %v3669_v53  ;;  %v4307_v62 = vcvt.s32.f32 %v3670_v54  ;;  %v3674_v21 = vunpack.c.3.s8 %v4288_v48 }
  0x3b   :  { %258 = vperm.xlu2 %3705, %v4170_v6   ;;  %6935 = vst [vmem:[#allocation7_spill] sm:$0xff] %v4259_v26  ;;  %vm135_vm0 = vcmp.gt.f32.partialorder %v4259_v26, 0.0  ;;  %vm6829_vm1 = vcmp.gt.f32.partialorder %v4261_v27, 0.0  ;;  %vm137_vm5 = vcmp.gt.f32.partialorder %v4269_v40, 0.0  ;;  %vm134_vm6 = vcmp.gt.f32.partialorder %v4281_v44, 0.0 }
  0x3c   :  { %248 = vperm.xlu1 %3704, %v4175_v7   ;;  %238 = vperm.xlu0 %3703, %v150_v8   ;;  %6936 = vst [vmem:[#allocation8_spill] sm:$0xff] %v4261_v27  ;;  %vm136_vm9 = vcmp.gt.f32.partialorder %v4299_v58, 0.0  ;;  %vm139_vm10 = vcmp.gt.f32.partialorder %v4305_v60, 0.0  ;;  %vm140_vm11 = vcmp.gt.f32.partialorder %v4307_v62, 0.0  ;;  %v3682_v53 = vunpack.c.3.s8 %v4320_v23 }
  0x3d   :  { %6937 = vst [vmem:[#allocation9_spill] sm:$0xff] %v4269_v40 }
  0x3e   :  { %6938 = vst [vmem:[#allocation10_spill] sm:$0xff] %v4281_v44 }
  0x3f   :  { %6939 = vst [vmem:[#allocation11_spill] sm:$0xff] %v4299_v58 }
  0x40   :  { %6940 = vst [vmem:[#allocation12_spill] sm:$0xff] %v4305_v60 }
  0x41   :  { %6941 = vst [vmem:[#allocation13_spill] sm:$0xff] %v4307_v62 }
  0x43   :  { %273 = vperm.xlu2 %3705, %v4185_v9  }
  0x44   :  { %268 = vperm.xlu1 %3704, %v4190_v10   ;;  %263 = vperm.xlu0 %3703, %v4195_v11  }
  0x4b   :  { %288 = vperm.xlu2 %3705, %v4203_v12  }
  0x4c   :  { %283 = vperm.xlu1 %3704, %v4208_v13   ;;  %278 = vperm.xlu0 %3703, %v4213_v14  }
  0x53   :  { %303 = vperm.xlu2 %3705, %v4221_v15  }
  0x54   :  { %298 = vperm.xlu1 %3704, %v4226_v16   ;;  %293 = vperm.xlu0 %3703, %v4231_v17  }
  0x5b   :  { %3707 = vset.pattern.permute.xlu2 %v4100_v19 }
  0x5c   :  { %308 = vperm.xlu0 %3703, %v4239_v18   ;;  %3706 = vset.pattern.permute.xlu1 %v4100_v19 }
  0x5d   :  { %1075 = vperm.xlu1 %3706, %v149_v4   ;;  %1079 = vperm.xlu2 %3707, %v150_v8   ;;  %v3666_v4 = vunpack.c.3.s8 %v4245_v20  ;;  %v3677_v20 = vunpack.c.0.s8 %v4320_v23 }
  0x64   :  { %3708 = vset.pattern.permute.xlu0 %v4100_v19 }
  0x8d   :  { %v254_v28 = vpop.permute.xlu2 %253 }
  0x8e   :  { %v316_v34 = vadd.f32 %v4257_v25, %v254_v28 }
  0x90   :  { %v348_v43 = vmul.f32 0.2, %v316_v34  ;;  %vm332_vm4 = vcmp.gt.f32.partialorder %v316_v34, 0.0 }
  0x92   :  { %v364_v52 = vsel %vm332_vm4, %v316_v34, %v348_v43  ;;  %v4327_v34 = vcvt.s32.f32 %v3674_v21  ;;  %v4372_v21 = vcvt.s32.f32 %v3682_v53 }
  0x93   :  { %v4297_v57 = vsel %vm137_vm5, %v364_v52, -1e+09  ;;  %v3681_v52 = vunpack.c.2.s8 %v4320_v23 }
  0x94   :  { %6943 = vst [vmem:[#allocation15_spill] sm:$0xff] %v4327_v34 }
  0x95   :  { %v259_v50 = vpop.permute.xlu2 %258  ;;  %6947 = vst [vmem:[#allocation19_spill] sm:$0xff] %v4372_v21 }
  0x96   :  { %v317_v63 = vadd.f32 %v4257_v25, %v259_v50 }
  0x98   :  { %vm333_vm14 = vcmp.gt.f32.partialorder %v317_v63, 0.0  ;;  %v349_v35 = vmul.f32 0.2, %v317_v63 }
  0xa6   :  { %v244_v29 = vpop.permute.xlu1 %243  ;;  %v234_v30 = vpop.permute.xlu0 %233 }
  0xa7   :  { %v314_v31 = vadd.f32 %v4257_v25, %v244_v29  ;;  %v312_v32 = vadd.f32 %v4257_v25, %v234_v30  ;;  %v274_v30 = vpop.permute.xlu2 %273 }
  0xa9   :  { %vm330_vm2 = vcmp.gt.f32.partialorder %v314_v31, 0.0  ;;  %v346_v36 = vmul.f32 0.2, %v314_v31  ;;  %vm328_vm3 = vcmp.gt.f32.partialorder %v312_v32, 0.0  ;;  %v344_v37 = vmul.f32 0.2, %v312_v32 }
  0xab   :  { %v362_v38 = vsel %vm330_vm2, %v314_v31, %v346_v36  ;;  %v360_v39 = vsel %vm328_vm3, %v312_v32, %v344_v37  ;;  %v4325_v31 = vcvt.s32.f32 %v3666_v4  ;;  %vm142_vm2 = vcmp.gt.f32.partialorder %v4327_v34, 0.0 }
  0xac   :  { %v4273_v41 = vsel %vm135_vm0, %v362_v38, -1e+09  ;;  %v4277_v42 = vsel %vm6829_vm1, %v360_v39, -1e+09  ;;  %v4341_v39 = vcvt.s32.f32 %v3677_v20 }
  0xad   :  { %396 = vmax.xlane.f32.xlu0 %v4273_v41  ;;  %392 = vmax.xlane.f32.xlu1 %v4277_v42  ;;  %6942 = vst [vmem:[#allocation14_spill] sm:$0xff] %v4325_v31  ;;  %vm138_vm15 = vcmp.gt.f32.partialorder %v4325_v31, 0.0  ;;  %v4865_v31 = vld [vmem:[#allocation3 + $0x68] sm:$0xff] }
  0xae   :  { %v249_v45 = vpop.permute.xlu1 %248  ;;  %v239_v46 = vpop.permute.xlu0 %238  ;;  %6944 = vst [vmem:[#allocation16_spill] sm:$0xff] %v4341_v39  ;;  %vm6803_vm3 = vcmp.gt.f32.partialorder %v4341_v39, 0.0 }
  0xaf   :  { %v313_v47 = vadd.f32 %v4257_v25, %v239_v46  ;;  %v315_v51 = vadd.f32 %v4257_v25, %v249_v45  ;;  %v3673_v46 = vunpack.c.2.s8 %v4288_v48 }
  0xb1   :  { %vm329_vm7 = vcmp.gt.f32.partialorder %v313_v47, 0.0  ;;  %v345_v55 = vmul.f32 0.2, %v313_v47  ;;  %v347_v61 = vmul.f32 0.2, %v315_v51  ;;  %vm331_vm8 = vcmp.gt.f32.partialorder %v315_v51, 0.0 }
  0xb3   :  { %v361_v56 = vsel %vm329_vm7, %v313_v47, %v345_v55  ;;  %v363_v24 = vsel %vm331_vm8, %v315_v51, %v347_v61  ;;  %v320_v47 = vadd.f32 %v4257_v25, %v274_v30  ;;  %v365_v51 = vsel %vm333_vm14, %v317_v63, %v349_v35 }
  0xb4   :  { %v4303_v59 = vsel %vm134_vm6, %v361_v56, -1e+09  ;;  %v4335_v37 = vsel %vm136_vm9, %v363_v24, -1e+09  ;;  %v4358_v55 = vsel %vm138_vm15, %v365_v51, -1e+09  ;;  %v4360_v56 = vcvt.s32.f32 %v3673_v46 }
  0xb5   :  { %394 = vmax.xlane.f32.xlu2 %v4303_v59  ;;  %400 = vmax.xlane.f32.xlu1 %v4297_v57  ;;  %vm336_vm8 = vcmp.gt.f32.partialorder %v320_v47, 0.0  ;;  %vm6802_vm14 = vcmp.gt.f32.partialorder %v4372_v21, 0.0 }
  0xb6   :  { %v269_v0 = vpop.permute.xlu1 %268  ;;  %v264_v1 = vpop.permute.xlu0 %263  ;;  %6945 = vst [vmem:[#allocation17_spill] sm:$0xff] %v4360_v56 }
  0xb7   :  { %v319_v8 = vadd.f32 %v4257_v25, %v269_v0  ;;  %v318_v19 = vadd.f32 %v4257_v25, %v264_v1  ;;  %v352_v0 = vmul.f32 0.2, %v320_v47  ;;  %v289_v1 = vpop.permute.xlu2 %288 }
  0xb8   :  { %v323_v35 = vadd.f32 %v4257_v25, %v289_v1 }
  0xb9   :  { %vm334_vm12 = vcmp.gt.f32.partialorder %v318_v19, 0.0  ;;  %v350_v28 = vmul.f32 0.2, %v318_v19  ;;  %vm335_vm13 = vcmp.gt.f32.partialorder %v319_v8, 0.0  ;;  %v351_v29 = vmul.f32 0.2, %v319_v8 }
  0xba   :  { %v355_v53 = vmul.f32 0.2, %v323_v35 }
  0xbb   :  { %v366_v32 = vsel %vm334_vm12, %v318_v19, %v350_v28  ;;  %v367_v33 = vsel %vm335_vm13, %v319_v8, %v351_v29  ;;  %v4370_v19 = vcvt.s32.f32 %v3681_v52  ;;  %v3678_v28 = vunpack.c.1.s8 %v4320_v23 }
  0xbc   :  { %v4331_v36 = vsel %vm139_vm10, %v366_v32, -1e+09  ;;  %v4339_v38 = vsel %vm140_vm11, %v367_v33, -1e+09  ;;  %vm141_vm12 = vcmp.gt.f32.partialorder %v4360_v56, 0.0  ;;  %v368_v32 = vsel %vm336_vm8, %v320_v47, %v352_v0 }
  0xbd   :  { %404 = vmax.xlane.f32.xlu0 %v4331_v36  ;;  %398 = vmax.xlane.f32.xlu2 %v4335_v37  ;;  %6946 = vst [vmem:[#allocation18_spill] sm:$0xff] %v4370_v19  ;;  %v3693_v33 = vld [vmem:[%s6795_s1 + $0x1c] sm:$0xf]   ;;  %vm145_vm13 = vcmp.gt.f32.partialorder %v4370_v19, 0.0  ;;  %v4400_v52 = vcvt.s32.f32 %v3678_v28  ;;  %vm339_vm8 = vcmp.gt.f32.partialorder %v323_v35, 0.0 }
  0xbe   :  { %406 = vmax.xlane.f32.xlu1 %v4339_v38  ;;  %v284_v43 = vpop.permute.xlu1 %283  ;;  %v279_v45 = vpop.permute.xlu0 %278  ;;  %v371_v0 = vsel %vm339_vm8, %v323_v35, %v355_v53  ;;  %v3685_v1 = vunpack.c.0.s8 %v3693_v33 }
  0xbf   :  { %v322_v49 = vadd.f32 %v4257_v25, %v284_v43  ;;  %v321_v50 = vadd.f32 %v4257_v25, %v279_v45  ;;  %v3686_v43 = vunpack.c.1.s8 %v3693_v33  ;;  %6948 = vst [vmem:[#allocation20_spill] sm:$0xff] %v4400_v52 }
  0xc1   :  { %vm337_vm4 = vcmp.gt.f32.partialorder %v321_v50, 0.0  ;;  %v353_v54 = vmul.f32 0.2, %v321_v50  ;;  %vm338_vm7 = vcmp.gt.f32.partialorder %v322_v49, 0.0  ;;  %v354_v48 = vmul.f32 0.2, %v322_v49 }
  0xc3   :  { %v369_v61 = vsel %vm337_vm4, %v321_v50, %v353_v54  ;;  %v370_v63 = vsel %vm338_vm7, %v322_v49, %v354_v48  ;;  %v4390_v49 = vsel %vm141_vm12, %v368_v32, -1e+09  ;;  %v4404_v54 = vcvt.s32.f32 %v3686_v43  ;;  %v304_v48 = vpop.permute.xlu2 %303  ;;  %v4476_v43 = vld [vmem:[#allocation2 + $0x48] sm:$0xff] }
  0xc4   :  { %v4364_v4 = vsel %vm142_vm2, %v369_v61, -1e+09  ;;  %v4368_v8 = vsel %vm6803_vm3, %v370_v63, -1e+09  ;;  %v4421_v32 = vcvt.s32.f32 %v3685_v1  ;;  %6953 = vst [vmem:[#allocation25_spill] sm:$0xff] %v4476_v43 }
  0xc5   :  { %410 = vmax.xlane.f32.xlu0 %v4364_v4  ;;  %402 = vmax.xlane.f32.xlu2 %v4358_v55  ;;  %6949 = vst [vmem:[#allocation21_spill] sm:$0xff] %v4404_v54 }
  0xc6   :  { %412 = vmax.xlane.f32.xlu1 %v4368_v8  ;;  %v299_v24 = vpop.permute.xlu1 %298  ;;  %v294_v20 = vpop.permute.xlu0 %293  ;;  %6950 = vst [vmem:[#allocation22_spill] sm:$0xff] %v4421_v32  ;;  %vm147_vm3 = vcmp.gt.f32.partialorder %v4421_v32, 0.0 }
  0xc7   :  { %v325_v29 = vadd.f32 %v4257_v25, %v299_v24  ;;  %v324_v30 = vadd.f32 %v4257_v25, %v294_v20  ;;  %v326_v24 = vadd.f32 %v4257_v25, %v304_v48  ;;  %v4486_v48 = vld [vmem:[#allocation2 + $0x8] sm:$0xff] }
  0xc8   :  { %6955 = vst [vmem:[#allocation27_spill] sm:$0xff] %v4486_v48 }
  0xc9   :  { %vm340_vm4 = vcmp.gt.f32.partialorder %v324_v30, 0.0  ;;  %v356_v23 = vmul.f32 0.2, %v324_v30  ;;  %vm341_vm7 = vcmp.gt.f32.partialorder %v325_v29, 0.0  ;;  %v357_v45 = vmul.f32 0.2, %v325_v29 }
  0xca   :  { %vm342_vm8 = vcmp.gt.f32.partialorder %v326_v24, 0.0 }
  0xcb   :  { %v372_v46 = vsel %vm340_vm4, %v324_v30, %v356_v23  ;;  %v373_v47 = vsel %vm341_vm7, %v325_v29, %v357_v45  ;;  %vm6907_vm4 = vcmp.gt.f32.partialorder %v4400_v52, 0.0  ;;  %vm148_vm7 = vcmp.gt.f32.partialorder %v4404_v54, 0.0 }
  0xcc   :  { %v4394_v50 = vsel %vm145_vm13, %v372_v46, -1e+09  ;;  %v4398_v51 = vsel %vm6802_vm14, %v373_v47, -1e+09  ;;  %v4417_v30 = vsel %vm6907_vm4, %v371_v0, -1e+09 }
  0xcd   :  { %416 = vmax.xlane.f32.xlu0 %v4394_v50  ;;  %408 = vmax.xlane.f32.xlu2 %v4390_v49 }
  0xce   :  { %418 = vmax.xlane.f32.xlu1 %v4398_v51  ;;  %v309_v61 = vpop.permute.xlu0 %308 }
  0xcf   :  { %v327_v63 = vadd.f32 %v4257_v25, %v309_v61  ;;  %v358_v25 = vmul.f32 0.2, %v326_v24  ;;  %v4488_v61 = vld [vmem:[#allocation2 + $0x68] sm:$0xff] }
  0xd1   :  { %vm343_vm14 = vcmp.gt.f32.partialorder %v327_v63, 0.0  ;;  %v359_v20 = vmul.f32 0.2, %v327_v63  ;;  %v374_v33 = vsel %vm342_vm8, %v326_v24, %v358_v25 }
  0xd2   :  { %v4426_v35 = vsel %vm147_vm3, %v374_v33, -1e+09  ;;  %v4504_v33 = vld [vmem:[#allocation2 + $0x20] sm:$0xff] }
  0xd3   :  { %v375_v28 = vsel %vm343_vm14, %v327_v63, %v359_v20  ;;  %v4490_v63 = vld [vmem:[#allocation2 + $0x10] sm:$0xff]  ;;  %6959 = vst [vmem:[#allocation31_spill] sm:$0xff] %v4504_v33 }
  0xd4   :  { %v4413_v29 = vsel %vm148_vm7, %v375_v28, -1e+09  ;;  %6956 = vst [vmem:[#allocation28_spill] sm:$0xff] %v4490_v63 }
  0xd5   :  { %422 = vmax.xlane.f32.xlu0 %v4413_v29  ;;  %414 = vmax.xlane.f32.xlu2 %v4417_v30 }
  0xdb   :  { %v7012_v54 = vld [vmem:[#allocation28_spill] sm:$0xff] }
  0xdd   :  { %420 = vmax.xlane.f32.xlu2 %v4426_v35 }
  0xe7   :  { %1087 = vperm.xlu1 %3706, %v4175_v7   ;;  %v4452_v7 = vpop.permute.xlu2 %1079 }
  0xe9   :  { %1083 = vperm.xlu0 %3708, %v4157_v3   ;;  %v4448_v3 = vld [vmem:[#allocation2 + $0x58] sm:$0xff] }
  0xef   :  { %1095 = vperm.xlu1 %3706, %v4170_v6   ;;  %v4450_v6 = vld [vmem:[#allocation2 + $0x30] sm:$0xff] }
  0xf1   :  { %1103 = vperm.xlu0 %3708, %v4190_v10  }
  0xf5   :  { %1091 = vperm.xlu2 %3707, %v4152_v2   ;;  %v4445_v2 = vpop.permute.xlu1 %1075 }
  0xf7   :  { %1107 = vperm.xlu1 %3706, %v4185_v9  }
  0xf9   :  { %1115 = vperm.xlu0 %3708, %v4208_v13   ;;  %v4462_v13 = vld [vmem:[#allocation2] sm:$0xff] }
  0xfd   :  { %1099 = vperm.xlu2 %3707, %v4195_v11  }
  0xff   :  { %1119 = vperm.xlu1 %3706, %v4203_v12  }
 0x101   :  { %1127 = vperm.xlu0 %3708, %v4226_v16  }
 0x105   :  { %1111 = vperm.xlu2 %3707, %v4213_v14  }
 0x107   :  { %1131 = vperm.xlu1 %3706, %v4221_v15  }
 0x109   :  { %3711 = vset.pattern.permute.xlu0 %v4099_v5 }
 0x10d   :  { %1123 = vperm.xlu2 %3707, %v4231_v17  }
 0x10f   :  { %3709 = vset.pattern.permute.xlu1 %v4099_v5 }
 0x115   :  { %1135 = vperm.xlu2 %3707, %v4239_v18   ;;  %v4474_v18 = vld [vmem:[#allocation2 + $0x18] sm:$0xff] }
 0x11d   :  { %3710 = vset.pattern.permute.xlu2 %v4099_v5  ;;  %v4464_v5 = vld [vmem:[#allocation2 + $0x50] sm:$0xff] }
 0x11e   :  { %6951 = vst [vmem:[#allocation23_spill] sm:$0xff] %v4464_v5 }
 0x120   :  { %v397_v9 = vpop.xlane.xlu0 %396  ;;  %v393_v10 = vpop.xlane.xlu1 %392 }
 0x121   :  { %v4455_v11 = vmax.f32 %v4448_v3, %v397_v9  ;;  %v4458_v12 = vmax.f32 %v4450_v6, %v393_v10  ;;  %v4506_v9 = vld [vmem:[#allocation2 + $0x40] sm:$0xff]  ;;  %v4508_v10 = vld [vmem:[#allocation2 + $0x70] sm:$0xff] }
 0x122   :  { %6960 = vst [vmem:[#allocation32_spill] sm:$0xff] %v4508_v10 }
 0x123   :  { %500 = vperm.xlu0 %3711, %v4455_v11   ;;  %490 = vperm.xlu1 %3709, %v4458_v12  }
 0x128   :  { %v395_v14 = vpop.xlane.xlu2 %394  ;;  %v401_v15 = vpop.xlane.xlu1 %400 }
 0x129   :  { %v4467_v16 = vmax.f32 %v4462_v13, %v395_v14  ;;  %v4470_v17 = vmax.f32 %v4464_v5, %v401_v15  ;;  %v3650_v5 = vld [vmem:[%s6798_s4 + $0x18] sm:$0xff]  ;;  %v7016_v32 = vld [vmem:[#allocation32_spill] sm:$0xff] }
 0x12b   :  { %6952 = vst [vmem:[#allocation24_spill] sm:$0xff] %v4470_v17  ;;  %495 = vperm.xlu2 %3710, %v4467_v16   ;;  %510 = vperm.xlu0 %3711, %v4470_v17  }
 0x130   :  { %v405_v23 = vpop.xlane.xlu0 %404  ;;  %v399_v45 = vpop.xlane.xlu2 %398 }
 0x131   :  { %v4479_v46 = vmax.f32 %v4474_v18, %v399_v45  ;;  %v407_v47 = vpop.xlane.xlu1 %406  ;;  %v4493_v1 = vmax.f32 %v4486_v48, %v405_v23 }
 0x132   :  { %v4482_v53 = vmax.f32 %v4476_v43, %v407_v47  ;;  %v4536_v43 = vld [vmem:[#allocation2 + $0x78] sm:$0xff] }
 0x133   :  { %505 = vperm.xlu1 %3709, %v4479_v46   ;;  %6957 = vst [vmem:[#allocation29_spill] sm:$0xff] %v4493_v1 }
 0x134   :  { %6954 = vst [vmem:[#allocation26_spill] sm:$0xff] %v4482_v53  ;;  %525 = vperm.xlu0 %3711, %v4482_v53  }
 0x135   :  { %6968 = vst [vmem:[#allocation40_spill] sm:$0xff] %v4536_v43 }
 0x138   :  { %v403_v0 = vpop.xlane.xlu2 %402  ;;  %v411_v28 = vpop.xlane.xlu0 %410 }
 0x139   :  { %v4496_v24 = vmax.f32 %v4488_v61, %v403_v0  ;;  %v413_v20 = vpop.xlane.xlu1 %412  ;;  %v4511_v15 = vmax.f32 %v4504_v33, %v411_v28 }
 0x13a   :  { %v4499_v25 = vmax.f32 %v4490_v63, %v413_v20  ;;  %v4522_v20 = vld [vmem:[#allocation2 + $0x60] sm:$0xff]  ;;  %v4524_v63 = vld [vmem:[#allocation2 + $0x38] sm:$0xff] }
 0x13b   :  { %515 = vperm.xlu2 %3710, %v4496_v24   ;;  %520 = vperm.xlu1 %3709, %v4493_v1   ;;  %6961 = vst [vmem:[#allocation33_spill] sm:$0xff] %v4511_v15 }
 0x13c   :  { %6958 = vst [vmem:[#allocation30_spill] sm:$0xff] %v4499_v25  ;;  %540 = vperm.xlu0 %3711, %v4499_v25  }
 0x13d   :  { %6963 = vst [vmem:[#allocation35_spill] sm:$0xff] %v4522_v20 }
 0x13e   :  { %6964 = vst [vmem:[#allocation36_spill] sm:$0xff] %v4524_v63 }
 0x140   :  { %v409_v14 = vpop.xlane.xlu2 %408  ;;  %v417_v0 = vpop.xlane.xlu0 %416 }
 0x141   :  { %v4514_v23 = vmax.f32 %v4506_v9, %v409_v14  ;;  %v419_v45 = vpop.xlane.xlu1 %418  ;;  %v4527_v25 = vmax.f32 %v4522_v20, %v417_v0  ;;  %v4550_v20 = vperm.slane %v4253_v22, 1  ;;  %v3652_v22 = vld [vmem:[%s6798_s4 + $0x28] sm:$0xff] }
 0x142   :  { %v4517_v47 = vmax.f32 %v4508_v10, %v419_v45  ;;  %v4534_v45 = vld [vmem:[#allocation2 + $0x28] sm:$0xff] }
 0x143   :  { %530 = vperm.xlu2 %3710, %v4514_v23   ;;  %535 = vperm.xlu1 %3709, %v4511_v15   ;;  %6965 = vst [vmem:[#allocation37_spill] sm:$0xff] %v4527_v25 }
 0x144   :  { %6962 = vst [vmem:[#allocation34_spill] sm:$0xff] %v4517_v47  ;;  %555 = vperm.xlu0 %3711, %v4517_v47  }
 0x145   :  { %6967 = vst [vmem:[#allocation39_spill] sm:$0xff] %v4534_v45 }
 0x148   :  { %v415_v28 = vpop.xlane.xlu2 %414  ;;  %v423_v10 = vpop.xlane.xlu0 %422 }
 0x149   :  { %v4530_v14 = vmax.f32 %v4524_v63, %v415_v28  ;;  %v4539_v53 = vmax.f32 %v4534_v45, %v423_v10  ;;  %v3654_v28 = vld [vmem:[%s6798_s4 + $0x38] sm:$0xff]  ;;  %v1139_v10 = vadd.f32 %v4550_v20, %v4445_v2 }
 0x14a   :  { %736 = vmatpush.bf16.msra.mxu0 %v3654_v28  ;;  %1515 = vmatpush.bf16.msra.mxu1 %v3654_v28 }
 0x14b   :  { %6966 = vst [vmem:[#allocation38_spill] sm:$0xff] %v4530_v14  ;;  %545 = vperm.xlu2 %3710, %v4530_v14   ;;  %550 = vperm.xlu1 %3709, %v4527_v25   ;;  %v1171_v25 = vmul.f32 0.2, %v1139_v10  ;;  %vm1155_vm14 = vcmp.gt.f32.partialorder %v1139_v10, 0.0 }
 0x14c   :  { %6969 = vst [vmem:[#allocation41_spill] sm:$0xff] %v4539_v53  ;;  %2294 = vmatpush.bf16.msra.mxu2 %v3654_v28  ;;  %3073 = vmatpush.bf16.msra.mxu3 %v3654_v28 }
 0x150   :  { %v421_v47 = vpop.xlane.xlu2 %420 }
 0x151   :  { %v4542_v33 = vmax.f32 %v4536_v43, %v421_v47 }
 0x153   :  { %6970 = vst [vmem:[#allocation42_spill] sm:$0xff] %v4542_v33  ;;  %560 = vperm.xlu2 %3710, %v4542_v33   ;;  %565 = vperm.xlu1 %3709, %v4539_v53   ;;  %v3653_v53 = vld [vmem:[%s6798_s4 + $0x30] sm:$0xff]  ;;  %v1187_v33 = vsel %vm1155_vm14, %v1139_v10, %v1171_v25  ;;  %v3651_v25 = vld [vmem:[%s6798_s4 + $0x20] sm:$0xff] }
 0x154   :  { %737 = vmatpush.bf16.msra.mxu0 %v3653_v53  ;;  %1516 = vmatpush.bf16.msra.mxu1 %v3653_v53  ;;  %v4563_v2 = vsel %vm6829_vm1, %v1187_v33, -1e+09  ;;  %v1140_v33 = vadd.f32 %v4550_v20, %v4452_v7 }
 0x155   :  { %2295 = vmatpush.bf16.msra.mxu2 %v3653_v53  ;;  %3074 = vmatpush.bf16.msra.mxu3 %v3653_v53  ;;  %6971 = vst [vmem:[#allocation43_spill] sm:$0xff] %v4563_v2 }
 0x156   :  { %vm1156_vm1 = vcmp.gt.f32.partialorder %v1140_v33, 0.0 }
 0x158   :  { %v1092_v0 = vpop.permute.xlu2 %1091  ;;  %738 = vmatpush.bf16.msra.mxu0 %v3652_v22  ;;  %1517 = vmatpush.bf16.msra.mxu1 %v3652_v22 }
 0x159   :  { %v1088_v45 = vpop.permute.xlu1 %1087  ;;  %2296 = vmatpush.bf16.msra.mxu2 %v3652_v22  ;;  %3075 = vmatpush.bf16.msra.mxu3 %v3652_v22  ;;  %v1172_v22 = vmul.f32 0.2, %v1140_v33 }
 0x15a   :  { %v1142_v43 = vadd.f32 %v4550_v20, %v1088_v45 }
 0x15b   :  { %v1084_v45 = vpop.permute.xlu0 %1083  ;;  %v1188_v63 = vsel %vm1156_vm1, %v1140_v33, %v1172_v22  ;;  %v3647_v33 = vld [vmem:[%s6798_s4] sm:$0xff] }
 0x15c   :  { %v1174_v15 = vmul.f32 0.2, %v1142_v43  ;;  %vm1158_vm8 = vcmp.gt.f32.partialorder %v1142_v43, 0.0  ;;  %v1141_v10 = vadd.f32 %v4550_v20, %v1084_v45  ;;  %739 = vmatpush.bf16.msra.mxu0 %v3651_v25  ;;  %1518 = vmatpush.bf16.msra.mxu1 %v3651_v25 }
 0x15d   :  { %2297 = vmatpush.bf16.msra.mxu2 %v3651_v25  ;;  %3076 = vmatpush.bf16.msra.mxu3 %v3651_v25  ;;  %v3649_v25 = vld [vmem:[%s6798_s4 + $0x10] sm:$0xff] }
 0x15e   :  { %v1173_v17 = vmul.f32 0.2, %v1141_v10  ;;  %vm1157_vm14 = vcmp.gt.f32.partialorder %v1141_v10, 0.0 }
 0x160   :  { %v1100_v47 = vpop.permute.xlu2 %1099  ;;  %740 = vmatpush.bf16.msra.mxu0 %v3650_v5  ;;  %1519 = vmatpush.bf16.msra.mxu1 %v3650_v5 }
 0x161   :  { %v1096_v53 = vpop.permute.xlu1 %1095  ;;  %v1145_v27 = vadd.f32 %v4550_v20, %v1100_v47  ;;  %2298 = vmatpush.bf16.msra.mxu2 %v3650_v5  ;;  %v1189_v47 = vsel %vm1157_vm14, %v1141_v10, %v1173_v17  ;;  %3077 = vmatpush.bf16.msra.mxu3 %v3650_v5  ;;  %v4594_v5 = vsel %vm134_vm6, %v1188_v63, -1e+09 }
 0x162   :  { %v4589_v1 = vsel %vm135_vm0, %v1189_v47, -1e+09 }
 0x163   :  { %v1177_v7 = vmul.f32 0.2, %v1145_v27  ;;  %v1104_v58 = vpop.permute.xlu0 %1103 }
 0x164   :  { %741 = vmatpush.bf16.msra.mxu0 %v3649_v25  ;;  %1520 = vmatpush.bf16.msra.mxu1 %v3649_v25 }
 0x165   :  { %2299 = vmatpush.bf16.msra.mxu2 %v3649_v25  ;;  %3078 = vmatpush.bf16.msra.mxu3 %v3649_v25 }
 0x168   :  { %v1112_v28 = vpop.permute.xlu2 %1111 }
 0x169   :  { %v1108_v14 = vpop.permute.xlu1 %1107 }
 0x16a   :  { %v1147_v63 = vadd.f32 %v4550_v20, %v1108_v14 }
 0x16b   :  { %v1116_v60 = vpop.permute.xlu0 %1115 }
 0x16e   :  { %1219 = vmax.xlane.f32.xlu0 %v4563_v2  ;;  %v1190_v2 = vsel %vm1158_vm8, %v1142_v43, %v1174_v15  ;;  %vm1161_vm8 = vcmp.gt.f32.partialorder %v1145_v27, 0.0  ;;  %v1144_v43 = vadd.f32 %v4550_v20, %v1096_v53 }
 0x16f   :  { %v4578_v45 = vsel %vm136_vm9, %v1190_v2, -1e+09  ;;  %v1143_v2 = vadd.f32 %v4550_v20, %v1092_v0  ;;  %v1193_v48 = vsel %vm1161_vm8, %v1145_v27, %v1177_v7  ;;  %v3648_v0 = vld [vmem:[%s6798_s4 + $0x8] sm:$0xff] }
 0x170   :  { %6972 = vst [vmem:[#allocation44_spill] sm:$0xff] %v4578_v45  ;;  %v1124_v15 = vpop.permute.xlu2 %1123  ;;  %v1176_v17 = vmul.f32 0.2, %v1144_v43  ;;  %v4602_v27 = vsel %vm139_vm10, %v1193_v48, -1e+09  ;;  %vm1160_vm1 = vcmp.gt.f32.partialorder %v1144_v43, 0.0  ;;  %742 = vmatpush.bf16.msra.mxu0 %v3648_v0  ;;  %1521 = vmatpush.bf16.msra.mxu1 %v3648_v0  ;;  %v1146_v48 = vadd.f32 %v4550_v20, %v1104_v58 }
 0x171   :  { %vm1159_vm14 = vcmp.gt.f32.partialorder %v1143_v2, 0.0  ;;  %2300 = vmatpush.bf16.msra.mxu2 %v3648_v0  ;;  %3079 = vmatpush.bf16.msra.mxu3 %v3648_v0  ;;  %v1151_v7 = vadd.f32 %v4550_v20, %v1124_v15  ;;  %v1120_v14 = vpop.permute.xlu1 %1119 }
 0x172   :  { %v1192_v53 = vsel %vm1160_vm1, %v1144_v43, %v1176_v17  ;;  %v1179_v43 = vmul.f32 0.2, %v1147_v63  ;;  %vm1163_vm1 = vcmp.gt.f32.partialorder %v1147_v63, 0.0  ;;  %v1178_v15 = vmul.f32 0.2, %v1146_v48 }
 0x173   :  { %v4615_v44 = vsel %vm138_vm15, %v1192_v53, -1e+09  ;;  %v1150_v17 = vadd.f32 %v4550_v20, %v1120_v14  ;;  %v1128_v40 = vpop.permute.xlu0 %1127 }
 0x174   :  { %743 = vmatpush.bf16.msra.mxu0 %v3647_v33  ;;  %1522 = vmatpush.bf16.msra.mxu1 %v3647_v33  ;;  %v1195_v0 = vsel %vm1163_vm1, %v1147_v63, %v1179_v43  ;;  %v1152_v43 = vadd.f32 %v4550_v20, %v1128_v40 }
 0x175   :  { %2301 = vmatpush.bf16.msra.mxu2 %v3647_v33  ;;  %3080 = vmatpush.bf16.msra.mxu3 %v3647_v33  ;;  %v1182_v34 = vmul.f32 0.2, %v1150_v17  ;;  %vm1166_vm1 = vcmp.gt.f32.partialorder %v1150_v17, 0.0 }
 0x176   :  { %1225 = vmax.xlane.f32.xlu0 %v4578_v45  ;;  %v1148_v45 = vadd.f32 %v4550_v20, %v1112_v28  ;;  %v1175_v28 = vmul.f32 0.2, %v1143_v2  ;;  %v1184_v40 = vmul.f32 0.2, %v1152_v43 }
 0x177   :  { %v1198_v14 = vsel %vm1166_vm1, %v1150_v17, %v1182_v34  ;;  %vm1168_vm1 = vcmp.gt.f32.partialorder %v1152_v43, 0.0 }
 0x178   :  { %v1180_v10 = vmul.f32 0.2, %v1148_v45  ;;  %vm1164_vm8 = vcmp.gt.f32.partialorder %v1148_v45, 0.0  ;;  %v1191_v22 = vsel %vm1159_vm14, %v1143_v2, %v1175_v28  ;;  %v4611_v47 = vpop.permute.xlu2 %1135  ;;  %vm1162_vm14 = vcmp.gt.f32.partialorder %v1146_v48, 0.0 }
 0x179   :  { %v4620_v58 = vsel %vm137_vm5, %v1191_v22, -1e+09  ;;  %v1183_v2 = vmul.f32 0.2, %v1151_v7  ;;  %v1149_v28 = vadd.f32 %v4550_v20, %v1116_v60  ;;  %v4634_v22 = vsel %vm141_vm12, %v1195_v0, -1e+09 }
 0x17a   :  { %v1196_v25 = vsel %vm1164_vm8, %v1148_v45, %v1180_v10  ;;  %vm1167_vm8 = vcmp.gt.f32.partialorder %v1151_v7, 0.0  ;;  %v1194_v10 = vsel %vm1162_vm14, %v1146_v48, %v1178_v15 }
 0x17b   :  { %v4625_v45 = vsel %vm142_vm2, %v1196_v25, -1e+09  ;;  %v1199_v33 = vsel %vm1167_vm8, %v1151_v7, %v1183_v2  ;;  %v4639_v25 = vsel %vm140_vm11, %v1194_v10, -1e+09  ;;  %v1181_v48 = vmul.f32 0.2, %v1149_v28  ;;  %v4648_v7 = vpop.permute.xlu1 %1131 }
 0x17c   :  { %1223 = vmax.xlane.f32.xlu2 %v4589_v1  ;;  %v4646_v60 = vsel %vm145_vm13, %v1199_v33, -1e+09  ;;  %vm1165_vm14 = vcmp.gt.f32.partialorder %v1149_v28, 0.0  ;;  %vm6976_vm8 = vcmp.gt.f32.partialorder %v4341_v39, 0.0  ;;  %v7015_v39 = vld [vmem:[#allocation34_spill] sm:$0xff] }
 0x17d   :  { %1221 = vmax.xlane.f32.xlu1 %v4594_v5  ;;  %6974 = vst [vmem:[#allocation46_spill] sm:$0xff] %v4646_v60  ;;  %v1197_v2 = vsel %vm1165_vm14, %v1149_v28, %v1181_v48  ;;  %v1200_v48 = vsel %vm1168_vm1, %v1152_v43, %v1184_v40  ;;  %vm6981_vm14 = vcmp.gt.f32.partialorder %v4372_v21, 0.0  ;;  %v453_v62 = vsub.f32 %v7016_v32, %v7015_v39 }
 0x17e   :  { %1231 = vmax.xlane.f32.xlu0 %v4602_v27  ;;  %v4659_v0 = vsel %vm6976_vm8, %v1197_v2, -1e+09  ;;  %v4674_v2 = vsel %vm6981_vm14, %v1200_v48, -1e+09 }
 0x17f   :  { %6977 = vst [vmem:[#allocation48_spill] sm:$0xff] %v4659_v0 }
 0x180   :  { %6982 = vst [vmem:[#allocation52_spill] sm:$0xff] %v4674_v2 }
 0x184   :  { %1229 = vmax.xlane.f32.xlu2 %v4615_v44 }
 0x185   :  { %1227 = vmax.xlane.f32.xlu1 %v4620_v58  ;;  %v4630_v53 = vpop.permute.xlu2 %495 }
 0x186   :  { %1237 = vmax.xlane.f32.xlu0 %v4625_v45  ;;  %6973 = vst [vmem:[#allocation45_spill] sm:$0xff] %v4630_v53  ;;  %v569_v63 = vsub.f32 %v4303_v59, %v4630_v53  ;;  %v4654_v59 = vsel %vm6907_vm4, %v1198_v14, -1e+09 }
 0x187   :  { %6975 = vst [vmem:[#allocation47_spill] sm:$0xff] %v4654_v59 }
 0x188   :  { %v586_v15 = vmul.f32 1.442695, %v569_v63 }
 0x18a   :  { %3727 = vpow2.f32 %v586_v15 }
 0x18c   :  { %1235 = vmax.xlane.f32.xlu2 %v4634_v22 }
 0x18d   :  { %1233 = vmax.xlane.f32.xlu1 %v4639_v25 }
 0x18e   :  { %1243 = vmax.xlane.f32.xlu0 %v4646_v60 }
 0x190   :  { %v3728_v15 = vpop.eup %3727 }
 0x194   :  { %1241 = vmax.xlane.f32.xlu2 %v4654_v59 }
 0x195   :  { %v4661_v10 = vpop.permute.xlu0 %500  ;;  %v4663_v33 = vpop.permute.xlu2 %515  ;;  %1239 = vmax.xlane.f32.xlu1 %v4659_v0  ;;  %v4887_v0 = vld [vmem:[#allocation3 + $0x30] sm:$0xff] }
 0x196   :  { %6978 = vst [vmem:[#allocation49_spill] sm:$0xff] %v4661_v10  ;;  %v570_v34 = vsub.f32 %v4273_v41, %v4661_v10  ;;  %v4668_v17 = vpop.permute.xlu1 %490  ;;  %v573_v41 = vsub.f32 %v4358_v55, %v4663_v33 }
 0x197   :  { %6979 = vst [vmem:[#allocation50_spill] sm:$0xff] %v4663_v33  ;;  %v568_v28 = vsub.f32 %v4277_v42, %v4668_v17 }
 0x198   :  { %6980 = vst [vmem:[#allocation51_spill] sm:$0xff] %v4668_v17  ;;  %v588_v14 = vmul.f32 1.442695, %v570_v34 }
 0x199   :  { %v584_v63 = vmul.f32 1.442695, %v568_v28  ;;  %v594_v28 = vmul.f32 1.442695, %v573_v41 }
 0x19b   :  { %3729 = vpow2.f32 %v584_v63 }
 0x19c   :  { %634 = vadd.xlane.f32.xlu2 %v3728_v15  ;;  %3731 = vpow2.f32 %v588_v14 }
 0x19d   :  { %1245 = vmax.xlane.f32.xlu1 %v4674_v2  ;;  %v4677_v53 = vpop.permute.xlu0 %510  ;;  %v4683_v43 = vpop.permute.xlu2 %530 }
 0x19e   :  { %6983 = vst [vmem:[#allocation53_spill] sm:$0xff] %v4677_v53  ;;  %v572_v42 = vsub.f32 %v4297_v57, %v4677_v53  ;;  %v576_v55 = vsub.f32 %v4390_v49, %v4683_v43 }
 0x19f   :  { %6984 = vst [vmem:[#allocation54_spill] sm:$0xff] %v4683_v43 }
 0x1a0   :  { %v592_v40 = vmul.f32 1.442695, %v572_v42 }
 0x1a1   :  { %v3730_v34 = vpop.eup %3729 }
 0x1a2   :  { %3733 = vpow2.f32 %v592_v40  ;;  %632 = vadd.xlane.f32.xlu0 %v3730_v34  ;;  %v680_v63 = vpack.c.bf16 %v3728_v15, %v3730_v34  ;;  %v3732_v48 = vpop.eup %3731 }
 0x1a3   :  { %3735 = vpow2.f32 %v594_v28 }
 0x1a4   :  { %744 = vmatmul.bf16.vlgmr.msra.gmra.mxu0 %v680_v63  ;;  %v600_v63 = vmul.f32 1.442695, %v576_v55 }
 0x1a5   :  { %636 = vadd.xlane.f32.xlu1 %v3732_v48  ;;  %v4685_v10 = vpop.permute.xlu1 %505  ;;  %v4695_v15 = vpop.permute.xlu2 %545 }
 0x1a6   :  { %6985 = vst [vmem:[#allocation55_spill] sm:$0xff] %v4685_v10  ;;  %v4689_v14 = vpop.permute.xlu0 %525  ;;  %v571_v57 = vsub.f32 %v4335_v37, %v4685_v10  ;;  %v579_v37 = vsub.f32 %v4417_v30, %v4695_v15 }
 0x1a7   :  { %6986 = vst [vmem:[#allocation56_spill] sm:$0xff] %v4689_v14  ;;  %v575_v41 = vsub.f32 %v4339_v38, %v4689_v14 }
 0x1a8   :  { %v590_v42 = vmul.f32 1.442695, %v571_v57  ;;  %v3734_v40 = vpop.eup %3733  ;;  %6987 = vst [vmem:[#allocation57_spill] sm:$0xff] %v4695_v15  ;;  %v606_v14 = vmul.f32 1.442695, %v579_v37 }
 0x1a9   :  { %v598_v34 = vmul.f32 1.442695, %v575_v41  ;;  %640 = vadd.xlane.f32.xlu2 %v3734_v40  ;;  %v3736_v28 = vpop.eup %3735 }
 0x1ab   :  { %3737 = vpow2.f32 %v598_v34 }
 0x1ac   :  { %3739 = vpow2.f32 %v590_v42 }
 0x1ad   :  { %642 = vadd.xlane.f32.xlu1 %v3736_v28  ;;  %v4697_v49 = vpop.permute.xlu1 %520  ;;  %3741 = vpow2.f32 %v600_v63  ;;  %v4710_v63 = vpop.permute.xlu2 %560 }
 0x1ae   :  { %6988 = vst [vmem:[#allocation58_spill] sm:$0xff] %v4697_v49  ;;  %v4701_v53 = vpop.permute.xlu0 %540  ;;  %v574_v38 = vsub.f32 %v4331_v36, %v4697_v49 }
 0x1af   :  { %6989 = vst [vmem:[#allocation59_spill] sm:$0xff] %v4701_v53  ;;  %v578_v57 = vsub.f32 %v4368_v8, %v4701_v53  ;;  %v582_v8 = vsub.f32 %v4426_v35, %v4710_v63 }
 0x1b0   :  { %v596_v55 = vmul.f32 1.442695, %v574_v38  ;;  %6990 = vst [vmem:[#allocation60_spill] sm:$0xff] %v4710_v63 }
 0x1b1   :  { %v4707_v41 = vpop.eup %3737  ;;  %v604_v34 = vmul.f32 1.442695, %v578_v57 }
 0x1b2   :  { %v3740_v42 = vpop.eup %3739  ;;  %646 = vadd.xlane.f32.xlu2 %v4707_v41 }
 0x1b3   :  { %3743 = vpow2.f32 %v604_v34  ;;  %638 = vadd.xlane.f32.xlu0 %v3740_v42  ;;  %v681_v30 = vpack.c.bf16 %v3740_v42, %v3732_v48  ;;  %v4712_v15 = vpop.eup %3741 }
 0x1b4   :  { %3745 = vpow2.f32 %v596_v55 }
 0x1b5   :  { %749 = vmatmul.bf16.gmra.mxu0 %v681_v30  ;;  %648 = vadd.xlane.f32.xlu1 %v4712_v15  ;;  %v4715_v36 = vpop.permute.xlu1 %535  ;;  %3747 = vpow2.f32 %v606_v14  ;;  %v612_v30 = vmul.f32 1.442695, %v582_v8 }
 0x1b6   :  { %6991 = vst [vmem:[#allocation61_spill] sm:$0xff] %v4715_v36  ;;  %v4719_v37 = vpop.permute.xlu0 %555  ;;  %v577_v38 = vsub.f32 %v4364_v4, %v4715_v36  ;;  %v1153_v4 = vadd.f32 %v4550_v20, %v4648_v7 }
 0x1b7   :  { %6992 = vst [vmem:[#allocation62_spill] sm:$0xff] %v4719_v37  ;;  %v581_v48 = vsub.f32 %v4398_v51, %v4719_v37 }
 0x1b8   :  { %v602_v57 = vmul.f32 1.442695, %v577_v38  ;;  %vm1169_vm8 = vcmp.gt.f32.partialorder %v1153_v4, 0.0 }
 0x1b9   :  { %v4725_v34 = vpop.eup %3743  ;;  %v610_v55 = vmul.f32 1.442695, %v581_v48 }
 0x1ba   :  { %v3746_v42 = vpop.eup %3745  ;;  %3749 = vpow2.f32 %v602_v57  ;;  %652 = vadd.xlane.f32.xlu2 %v4725_v34  ;;  %v1185_v57 = vmul.f32 0.2, %v1153_v4 }
 0x1bb   :  { %3751 = vpow2.f32 %v610_v55  ;;  %644 = vadd.xlane.f32.xlu0 %v3746_v42  ;;  %v4728_v35 = vpop.eup %3747  ;;  %v682_v55 = vpack.c.bf16 %v3736_v28, %v3734_v40  ;;  %v441_v40 = vsub.f32 %v4462_v13, %v4467_v16  ;;  %v1154_v28 = vadd.f32 %v4550_v20, %v4611_v47 }
 0x1bc   :  { %3753 = vpow2.f32 %v612_v30  ;;  %v1201_v30 = vsel %vm1169_vm8, %v1153_v4, %v1185_v57  ;;  %v440_v57 = vsub.f32 %v4450_v6, %v4458_v12  ;;  %v445_v20 = vsub.f32 %v4488_v61, %v4496_v24  ;;  %v7001_v4 = vld [vmem:[#allocation24_spill] sm:$0xff] }
 0x1bd   :  { %654 = vadd.xlane.f32.xlu1 %v4728_v35  ;;  %v4731_v14 = vpop.permute.xlu1 %550  ;;  %vm1170_vm1 = vcmp.gt.f32.partialorder %v1154_v28, 0.0  ;;  %v443_v12 = vsub.f32 %v4474_v18, %v4479_v46  ;;  %v448_v24 = vsub.f32 %v4506_v9, %v4514_v23  ;;  %v6997_v46 = vld [vmem:[#allocation29_spill] sm:$0xff]  ;;  %v7000_v23 = vld [vmem:[#allocation36_spill] sm:$0xff]  ;;  %v685_v43 = vpack.c.bf16 %v4728_v35, %v4725_v34  ;;  %v7014_v35 = vld [vmem:[#allocation39_spill] sm:$0xff] }
 0x1be   :  { %6993 = vst [vmem:[#allocation63_spill] sm:$0xff] %v4731_v14  ;;  %v580_v51 = vsub.f32 %v4394_v50, %v4731_v14  ;;  %v4751_v14 = vsel %vm147_vm3, %v1201_v30, -1e+09  ;;  %v1186_v30 = vmul.f32 0.2, %v1154_v28 }
 0x1bf   :  { %6995 = vst [vmem:[#allocation65_spill] sm:$0xff] %v4751_v14  ;;  %v456_v16 = vmul.f32 1.442695, %v440_v57 }
 0x1c0   :  { %v3750_v38 = vpop.eup %3749  ;;  %v608_v8 = vmul.f32 1.442695, %v580_v51  ;;  %v1202_v47 = vsel %vm1170_vm1, %v1154_v28, %v1186_v30  ;;  %v442_v28 = vsub.f32 %v4448_v3, %v4455_v11  ;;  %v472_v30 = vmul.f32 1.442695, %v448_v24  ;;  %v6999_v11 = vld [vmem:[#allocation38_spill] sm:$0xff]  ;;  %7017 = vst [vmem:[#allocation29_spill] sm:$0xff] %v4865_v31 }
 0x1c1   :  { %v4737_v48 = vpop.eup %3751 }
 0x1c2   :  { %3755 = vpow2.f32 %v608_v8  ;;  %658 = vadd.xlane.f32.xlu2 %v4737_v48  ;;  %v4740_v37 = vpop.eup %3753 }
 0x1c3   :  { %650 = vadd.xlane.f32.xlu0 %v3750_v38 }
 0x1c5   :  { %754 = vmatmul.bf16.gmra.mxu0 %v682_v55  ;;  %660 = vadd.xlane.f32.xlu1 %v4740_v37  ;;  %v4743_v7 = vpop.permute.xlu1 %565  ;;  %v458_v55 = vmul.f32 1.442695, %v441_v40  ;;  %v466_v40 = vmul.f32 1.442695, %v445_v20  ;;  %v460_v20 = vmul.f32 1.442695, %v442_v28 }
 0x1c6   :  { %6994 = vst [vmem:[#allocation64_spill] sm:$0xff] %v4743_v7  ;;  %v583_v50 = vsub.f32 %v4413_v29, %v4743_v7 }
 0x1c8   :  { %v4747_v51 = vpop.eup %3755  ;;  %v614_v8 = vmul.f32 1.442695, %v583_v50  ;;  %v683_v50 = vpack.c.bf16 %v4707_v41, %v3746_v42  ;;  %v462_v42 = vmul.f32 1.442695, %v443_v12 }
 0x1ca   :  { %3757 = vpow2.f32 %v614_v8  ;;  %1247 = vmax.xlane.f32.xlu2 %v4751_v14  ;;  %v4771_v8 = vsel %vm148_vm7, %v1202_v47, -1e+09 }
 0x1cb   :  { %656 = vadd.xlane.f32.xlu0 %v4747_v51  ;;  %3759 = vpow2.f32 %v458_v55  ;;  %6996 = vst [vmem:[#allocation66_spill] sm:$0xff] %v4771_v8  ;;  %v6998_v55 = vld [vmem:[#allocation27_spill] sm:$0xff] }
 0x1cc   :  { %3761 = vpow2.f32 %v456_v16  ;;  %v684_v16 = vpack.c.bf16 %v3750_v38, %v4712_v15  ;;  %v7003_v15 = vld [vmem:[#allocation33_spill] sm:$0xff]  ;;  %v7004_v38 = vld [vmem:[#allocation31_spill] sm:$0xff]  ;;  %7019 = vst [vmem:[#allocation27_spill] sm:$0xff] %v4887_v0 }
 0x1cd   :  { %3763 = vpow2.f32 %v466_v40  ;;  %v451_v40 = vsub.f32 %v7000_v23, %v6999_v11  ;;  %v449_v28 = vsub.f32 %v7004_v38, %v7003_v15  ;;  %v7008_v15 = vld [vmem:[#allocation25_spill] sm:$0xff] }
 0x1ce   :  { %3765 = vpow2.f32 %v462_v42 }
 0x1cf   :  { %3767 = vpow2.f32 %v472_v30  ;;  %v474_v30 = vmul.f32 1.442695, %v449_v28  ;;  %v7009_v28 = vld [vmem:[#allocation37_spill] sm:$0xff] }
 0x1d0   :  { %v4759_v29 = vpop.eup %3757  ;;  %3769 = vpow2.f32 %v460_v20  ;;  %v7005_v20 = vld [vmem:[#allocation42_spill] sm:$0xff] }
 0x1d1   :  { %v4776_v41 = vpop.eup %3759  ;;  %v7018_v14 = vpack.c.bf16 %v4759_v29, %v4740_v37 }
 0x1d2   :  { %v4783_v57 = vpop.eup %3761 }
 0x1d3   :  { %662 = vadd.xlane.f32.xlu0 %v4759_v29  ;;  %v4789_v47 = vpop.eup %3763 }
 0x1d4   :  { %v4798_v24 = vpop.eup %3765  ;;  %v621_v29 = vmul.f32 %v4789_v47, %v4887_v0  ;;  %v4907_v0 = vld [vmem:[#allocation3 + $0x58] sm:$0xff] }
 0x1d5   :  { %759 = vmatmul.bf16.gmra.mxu0 %v683_v50  ;;  %v446_v50 = vsub.f32 %v6998_v55, %v6997_v46  ;;  %v7002_v46 = vld [vmem:[#allocation23_spill] sm:$0xff]  ;;  %v4803_v36 = vpop.eup %3767 }
 0x1d6   :  { %v444_v42 = vsub.f32 %v7002_v46, %v7001_v4  ;;  %v7006_v4 = vld [vmem:[#allocation40_spill] sm:$0xff] }
 0x1d7   :  { %v468_v3 = vmul.f32 1.442695, %v446_v50  ;;  %v4805_v50 = vpop.eup %3769  ;;  %v454_v11 = vsub.f32 %v7006_v4, %v7005_v20 }
 0x1d8   :  { %v464_v7 = vmul.f32 1.442695, %v444_v42 }
 0x1d9   :  { %3771 = vpow2.f32 %v468_v3  ;;  %v7007_v3 = vld [vmem:[#allocation26_spill] sm:$0xff]  ;;  %v484_v4 = vmul.f32 1.442695, %v454_v11 }
 0x1db   :  { %1249 = vmax.xlane.f32.xlu0 %v4771_v8  ;;  %v4875_v8 = vld [vmem:[#allocation3 + $0x10] sm:$0xff] }
 0x1de   :  { %825 = vperm.xlu1 %3709, %v4776_v41  }
 0x1df   :  { %v4819_v63 = vpop.eup %3771 }
 0x1e1   :  { %v4791_v12 = vpop.xlane.xlu0 %1219 }
 0x1e2   :  { %820 = vperm.xlu2 %3710, %v4783_v57  }
 0x1e5   :  { %764 = vmatmul.bf16.gmra.mxu0 %v684_v16  ;;  %v478_v16 = vmul.f32 1.442695, %v451_v40  ;;  %v447_v40 = vsub.f32 %v7008_v15, %v7007_v3 }
 0x1e6   :  { %845 = vperm.xlu1 %3709, %v4789_v47  }
 0x1e7   :  { %3773 = vpow2.f32 %v478_v16  ;;  %v7010_v16 = vld [vmem:[#allocation35_spill] sm:$0xff] }
 0x1e8   :  { %3775 = vpow2.f32 %v464_v7  ;;  %v452_v20 = vsub.f32 %v7010_v16, %v7009_v28  ;;  %v470_v7 = vmul.f32 1.442695, %v447_v40 }
 0x1e9   :  { %v4815_v42 = vpop.xlane.xlu0 %1225  ;;  %3777 = vpow2.f32 %v474_v30  ;;  %v7011_v30 = vld [vmem:[#allocation30_spill] sm:$0xff] }
 0x1ea   :  { %835 = vperm.xlu2 %3710, %v4798_v24   ;;  %v480_v17 = vmul.f32 1.442695, %v452_v20  ;;  %3779 = vpow2.f32 %v484_v4  ;;  %v450_v28 = vsub.f32 %v7012_v54, %v7011_v30 }
 0x1eb   :  { %3781 = vpow2.f32 %v470_v7 }
 0x1ec   :  { %3783 = vpow2.f32 %v480_v17  ;;  %v476_v20 = vmul.f32 1.442695, %v450_v28  ;;  %v686_v28 = vpack.c.bf16 %v4737_v48, %v4747_v51 }
 0x1ed   :  { %v4826_v33 = vpop.eup %3773 }
 0x1ee   :  { %860 = vperm.xlu1 %3709, %v4803_v36   ;;  %v3776_v3 = vpop.eup %3775  ;;  %3785 = vpow2.f32 %v476_v20 }
 0x1ef   :  { %830 = vperm.xlu0 %3711, %v4805_v50   ;;  %v4811_v53 = vpop.xlane.xlu2 %1223  ;;  %v4835_v21 = vpop.eup %3777 }
 0x1f0   :  { %v4817_v49 = vpop.xlane.xlu1 %1221  ;;  %v4842_v4 = vpop.eup %3779 }
 0x1f1   :  { %v4837_v34 = vpop.xlane.xlu0 %1231  ;;  %v3782_v19 = vpop.eup %3781 }
 0x1f2   :  { %850 = vperm.xlu2 %3710, %v4819_v63   ;;  %v4851_v17 = vpop.eup %3783 }
 0x1f5   :  { %769 = vmatmul.bf16.gmra.mxu0 %v685_v43  ;;  %v7013_v43 = vld [vmem:[#allocation41_spill] sm:$0xff] }
 0x1f6   :  { %875 = vperm.xlu1 %3709, %v4826_v33   ;;  %v455_v40 = vsub.f32 %v7014_v35, %v7013_v43  ;;  %v482_v43 = vmul.f32 1.442695, %v453_v62  ;;  %v617_v62 = vmul.f32 %v4776_v41, %v4865_v31  ;;  %v618_v41 = vmul.f32 %v4805_v50, %v4875_v8  ;;  %v4893_v50 = vld [vmem:[#allocation3 + $0x40] sm:$0xff] }
 0x1f7   :  { %840 = vperm.xlu0 %3711, %v3776_v3   ;;  %v4829_v10 = vpop.xlane.xlu2 %1229 }
 0x1f8   :  { %v4833_v11 = vpop.xlane.xlu1 %1227  ;;  %v486_v7 = vmul.f32 1.442695, %v455_v40  ;;  %v3786_v40 = vpop.eup %3785 }
 0x1f9   :  { %v4856_v35 = vpop.xlane.xlu0 %1237 }
 0x1fa   :  { %865 = vperm.xlu2 %3710, %v4835_v21   ;;  %3787 = vpow2.f32 %v486_v7 }
 0x1fb   :  { %3789 = vpow2.f32 %v482_v43  ;;  %v4873_v43 = vld [vmem:[#allocation3 + $0x28] sm:$0xff] }
 0x1fc   :  { %v616_v2 = vmul.f32 %v4783_v57, %v4873_v43  ;;  %v4891_v57 = vld [vmem:[#allocation3 + $0x38] sm:$0xff] }
 0x1fe   :  { %890 = vperm.xlu1 %3709, %v4842_v4  }
 0x1ff   :  { %855 = vperm.xlu0 %3711, %v3782_v19   ;;  %v4845_v30 = vpop.xlane.xlu2 %1235 }
 0x200   :  { %v4849_v52 = vpop.xlane.xlu1 %1233  ;;  %v4862_v56 = vpop.eup %3787 }
 0x201   :  { %v3790_v7 = vpop.eup %3789  ;;  %v4867_v26 = vpop.xlane.xlu0 %1243 }
 0x202   :  { %880 = vperm.xlu2 %3710, %v4851_v17  }
 0x205   :  { %774 = vmatmul.bf16.gmra.mxu0 %v686_v28 }
 0x207   :  { %870 = vperm.xlu0 %3711, %v3786_v40   ;;  %v4858_v20 = vpop.xlane.xlu2 %1241 }
 0x208   :  { %v4860_v39 = vpop.xlane.xlu1 %1239 }
 0x20a   :  { %895 = vperm.xlu2 %3710, %v4862_v56  }
 0x20f   :  { %885 = vperm.xlu0 %3711, %v3790_v7   ;;  %v635_v48 = vpop.xlane.xlu2 %634 }
 0x210   :  { %v665_v51 = vadd.f32 %v635_v48, %v617_v62  ;;  %v4871_v28 = vpop.xlane.xlu1 %1245 }
 0x212   :  { %969 = vperm.xlu1 %3709, %v665_v51   ;;  %v4884_v51 = vld [vmem:[#allocation3 + $0x48] sm:$0xff] }
 0x213   :  { %v620_v31 = vmul.f32 %v3776_v3, %v4884_v51 }
 0x215   :  { %779 = vmatmul.bf16.gmra.mxu0 %v7018_v14  ;;  %v633_v59 = vpop.xlane.xlu0 %632 }
 0x216   :  { %v664_v60 = vadd.f32 %v633_v59, %v616_v2 }
 0x218   :  { %v637_v62 = vpop.xlane.xlu1 %636  ;;  %964 = vperm.xlu0 %3711, %v664_v60   ;;  %v623_v60 = vmul.f32 %v3782_v19, %v4891_v57 }
 0x219   :  { %v666_v48 = vadd.f32 %v637_v62, %v618_v41  ;;  %v4896_v41 = vld [vmem:[#allocation3 + $0x20] sm:$0xff]  ;;  %v619_v62 = vmul.f32 %v4798_v24, %v4893_v50 }
 0x21a   :  { %v624_v47 = vmul.f32 %v4803_v36, %v4896_v41 }
 0x21b   :  { %974 = vperm.xlu2 %3710, %v666_v48  }
 0x21c   :  { %v641_v37 = vpop.xlane.xlu2 %640 }
 0x21d   :  { %v668_v14 = vadd.f32 %v641_v37, %v620_v31 }
 0x21f   :  { %984 = vperm.xlu1 %3709, %v668_v14  }
 0x220   :  { %v643_v59 = vpop.xlane.xlu1 %642 }
 0x221   :  { %v669_v2 = vadd.f32 %v643_v59, %v621_v29  ;;  %v4902_v59 = vld [vmem:[#allocation3 + $0x18] sm:$0xff] }
 0x222   :  { %v626_v19 = vmul.f32 %v3786_v40, %v4902_v59 }
 0x223   :  { %989 = vperm.xlu2 %3710, %v669_v2   ;;  %v4904_v2 = vld [vmem:[#allocation3 + $0x70] sm:$0xff] }
 0x225   :  { %v647_v3 = vpop.xlane.xlu2 %646 }
 0x226   :  { %v671_v31 = vadd.f32 %v647_v3, %v623_v60  ;;  %v639_v48 = vpop.xlane.xlu0 %638  ;;  %v622_v60 = vmul.f32 %v4819_v63, %v4904_v2 }
 0x227   :  { %v667_v37 = vadd.f32 %v639_v48, %v619_v62 }
 0x228   :  { %999 = vperm.xlu1 %3709, %v671_v31   ;;  %v649_v14 = vpop.xlane.xlu1 %648  ;;  %v627_v31 = vmul.f32 %v4826_v33, %v4907_v0 }
 0x229   :  { %979 = vperm.xlu0 %3711, %v667_v37   ;;  %v672_v29 = vadd.f32 %v649_v14, %v624_v47  ;;  %v4913_v47 = vld [vmem:[#allocation3 + $0x8] sm:$0xff]  ;;  %v4915_v14 = vld [vmem:[#allocation3 + $0x78] sm:$0xff] }
 0x22a   :  { %v629_v40 = vmul.f32 %v3790_v7, %v4913_v47 }
 0x22b   :  { %1004 = vperm.xlu2 %3710, %v672_v29   ;;  %v4918_v29 = vld [vmem:[#allocation3 + $0x60] sm:$0xff] }
 0x22d   :  { %v653_v24 = vpop.xlane.xlu2 %652 }
 0x22e   :  { %v674_v3 = vadd.f32 %v653_v24, %v626_v19  ;;  %v645_v62 = vpop.xlane.xlu0 %644  ;;  %v625_v19 = vmul.f32 %v4835_v21, %v4915_v14  ;;  %v4932_v21 = vmax.f32 %v4450_v6, %v4791_v12 }
 0x22f   :  { %v670_v36 = vadd.f32 %v645_v62, %v622_v60 }
 0x230   :  { %1014 = vperm.xlu1 %3709, %v674_v3   ;;  %v655_v48 = vpop.xlane.xlu1 %654  ;;  %v630_v3 = vmul.f32 %v4842_v4, %v4918_v29  ;;  %v4937_v4 = vmax.f32 %v4462_v13, %v4817_v49  ;;  %v4953_v13 = vmax.f32 %v7002_v46, %v4833_v11  ;;  %v4971_v46 = vmax.f32 %v6998_v55, %v4837_v34 }
 0x231   :  { %994 = vperm.xlu0 %3711, %v670_v36   ;;  %v675_v37 = vadd.f32 %v655_v48, %v627_v31  ;;  %v4924_v31 = vld [vmem:[#allocation3] sm:$0xff] }
 0x232   :  { %v628_v48 = vmul.f32 %v4851_v17, %v4924_v31 }
 0x233   :  { %1019 = vperm.xlu2 %3710, %v675_v37  }
 0x235   :  { %v659_v63 = vpop.xlane.xlu2 %658 }
 0x236   :  { %v677_v24 = vadd.f32 %v659_v63, %v629_v40  ;;  %v651_v60 = vpop.xlane.xlu0 %650  ;;  %v4101_v63 = vmov 32  }
 0x237   :  { %v673_v33 = vadd.f32 %v651_v60, %v625_v19  ;;  %v4939_v19 = vld [vmem:[#allocation3 + $0x50] sm:$0xff] }
 0x238   :  { %1029 = vperm.xlu1 %3709, %v677_v24   ;;  %v661_v62 = vpop.xlane.xlu1 %660  ;;  %v631_v6 = vmul.f32 %v4862_v56, %v4939_v19  ;;  %v4948_v24 = vmax.f32 %v4474_v18, %v4815_v42  ;;  %v4960_v56 = vmax.f32 %v4488_v61, %v4829_v10  ;;  %v4979_v61 = vmax.f32 %v7008_v15, %v4849_v52 }
 0x239   :  { %1009 = vperm.xlu0 %3711, %v673_v33   ;;  %v678_v36 = vadd.f32 %v661_v62, %v630_v3  ;;  %v4962_v33 = vld [vmem:[#allocation2 + $0x58] sm:$0xff]  ;;  %v4988_v10 = vmax.f32 %v4506_v9, %v4845_v30  ;;  %v5004_v15 = vmax.f32 %v7010_v16, %v4867_v26  ;;  %v5009_v9 = vmax.f32 %v7000_v23, %v4858_v20 }
 0x23a   :  { %v4966_v18 = vmax.f32 %v4962_v33, %v4811_v53  ;;  %v4983_v53 = vmax.f32 %v7004_v38, %v4856_v35  ;;  %v5000_v38 = vmax.f32 %v7012_v54, %v4860_v39  ;;  %v5021_v26 = vmax.f32 %v7016_v32, %v4871_v28 }
 0x23b   :  { %1034 = vperm.xlu2 %3710, %v678_v36  }
 0x23d   :  { %v4926_v7 = vpop.xlane.xlu2 %1247 }
 0x23e   :  { %v657_v37 = vpop.xlane.xlu0 %656 }
 0x23f   :  { %v676_v40 = vadd.f32 %v657_v37, %v628_v48 }
 0x240   :  { %3712 = vset.pattern.permute.xlu1 %v4101_v63 }
 0x241   :  { %1024 = vperm.xlu0 %3711, %v676_v40   ;;  %1317 = vperm.xlu1 %3712, %v4932_v21  }
 0x243   :  { %3713 = vset.pattern.permute.xlu2 %v4101_v63 }
 0x244   :  { %1322 = vperm.xlu2 %3713, %v4937_v4  }
 0x245   :  { %v4942_v17 = vpop.permute.xlu2 %820 }
 0x246   :  { %7020 = vst [vmem:[#allocation38_spill] sm:$0xff] %v4942_v17  ;;  %v663_v12 = vpop.xlane.xlu0 %662 }
 0x247   :  { %v679_v60 = vadd.f32 %v663_v12, %v631_v6 }
 0x249   :  { %1039 = vperm.xlu0 %3711, %v679_v60   ;;  %1332 = vperm.xlu1 %3712, %v4948_v24  }
 0x24c   :  { %1337 = vperm.xlu2 %3713, %v4953_v13  }
 0x24d   :  { %v4956_v49 = vpop.permute.xlu2 %835 }
 0x24e   :  { %7021 = vst [vmem:[#allocation36_spill] sm:$0xff] %v4956_v49  ;;  %v4993_v11 = vpop.xlane.xlu0 %1249 }
 0x250   :  { %v4990_v55 = vpop.permute.xlu1 %825 }
 0x251   :  { %3714 = vset.pattern.permute.xlu0 %v4101_v63  ;;  %1342 = vperm.xlu1 %3712, %v4960_v56   ;;  %7023 = vst [vmem:[#allocation23_spill] sm:$0xff] %v4990_v55 }
 0x252   :  { %1327 = vperm.xlu0 %3714, %v4966_v18  }
 0x254   :  { %1347 = vperm.xlu2 %3713, %v4971_v46  }
 0x255   :  { %v4975_v42 = vpop.permute.xlu2 %850 }
 0x256   :  { %7022 = vst [vmem:[#allocation24_spill] sm:$0xff] %v4975_v42 }
 0x258   :  { %v5014_v30 = vpop.permute.xlu1 %845 }
 0x259   :  { %1352 = vperm.xlu1 %3712, %v4979_v61   ;;  %7026 = vst [vmem:[#allocation42_spill] sm:$0xff] %v5014_v30 }
 0x25a   :  { %1362 = vperm.xlu0 %3714, %v4983_v53  }
 0x25c   :  { %1357 = vperm.xlu2 %3713, %v4988_v10  }
 0x25d   :  { %v4996_v52 = vpop.permute.xlu2 %865 }
 0x25e   :  { %7024 = vst [vmem:[#allocation33_spill] sm:$0xff] %v4996_v52  ;;  %v7067_v52 = vld [vmem:[#allocation46_spill] sm:$0xff] }
 0x260   :  { %v5028_v35 = vpop.permute.xlu1 %860 }
 0x261   :  { %1367 = vperm.xlu1 %3712, %v5000_v38   ;;  %v5012_v34 = vpop.permute.xlu0 %830  ;;  %7030 = vst [vmem:[#allocation37_spill] sm:$0xff] %v5028_v35 }
 0x262   :  { %1377 = vperm.xlu0 %3714, %v5004_v15   ;;  %7025 = vst [vmem:[#allocation31_spill] sm:$0xff] %v5012_v34 }
 0x264   :  { %1372 = vperm.xlu2 %3713, %v5009_v9  }
 0x265   :  { %v5017_v54 = vpop.permute.xlu2 %880 }
 0x266   :  { %7027 = vst [vmem:[#allocation40_spill] sm:$0xff] %v5017_v54 }
 0x268   :  { %v5034_v3 = vpop.permute.xlu1 %875 }
 0x269   :  { %1382 = vperm.xlu1 %3712, %v5021_v26   ;;  %v5024_v16 = vpop.permute.xlu0 %840  ;;  %7033 = vst [vmem:[#allocation28_spill] sm:$0xff] %v5034_v3 }
 0x26a   :  { %7028 = vst [vmem:[#allocation26_spill] sm:$0xff] %v5024_v16 }
 0x26d   :  { %v5026_v23 = vpop.permute.xlu2 %895 }
 0x26e   :  { %7029 = vst [vmem:[#allocation25_spill] sm:$0xff] %v5026_v23 }
 0x270   :  { %v5040_v32 = vpop.permute.xlu1 %890 }
 0x271   :  { %v5032_v39 = vpop.permute.xlu0 %855  ;;  %7036 = vst [vmem:[#allocation34_spill] sm:$0xff] %v5040_v32 }
 0x272   :  { %7032 = vst [vmem:[#allocation30_spill] sm:$0xff] %v5032_v39 }
 0x275   :  { %v5030_v20 = vpop.permute.xlu2 %974 }
 0x276   :  { %7031 = vst [vmem:[#allocation35_spill] sm:$0xff] %v5030_v20 }
 0x279   :  { %v5038_v36 = vpop.permute.xlu0 %870 }
 0x27a   :  { %7035 = vst [vmem:[#allocation39_spill] sm:$0xff] %v5038_v36 }
 0x27d   :  { %v5036_v62 = vpop.permute.xlu2 %989 }
 0x27e   :  { %7034 = vst [vmem:[#allocation41_spill] sm:$0xff] %v5036_v62 }
 0x281   :  { %v5046_v37 = vpop.permute.xlu0 %885 }
 0x282   :  { %7039 = vst [vmem:[#allocation68_spill] sm:$0xff] %v5046_v37 }
 0x284   :  { %v5044_v48 = vpop.permute.xlu1 %969 }
 0x285   :  { %v5042_v28 = vpop.permute.xlu2 %1004  ;;  %7038 = vst [vmem:[#allocation67_spill] sm:$0xff] %v5044_v48 }
 0x286   :  { %7037 = vst [vmem:[#allocation32_spill] sm:$0xff] %v5042_v28 }
 0x28a   :  { %v5052_v6 = vpop.permute.xlu0 %964 }
 0x28b   :  { %7042 = vst [vmem:[#allocation71_spill] sm:$0xff] %v5052_v6 }
 0x28d   :  { %v5048_v40 = vpop.permute.xlu2 %1019 }
 0x28e   :  { %7040 = vst [vmem:[#allocation69_spill] sm:$0xff] %v5048_v40 }
 0x291   :  { %v5050_v63 = vpop.permute.xlu1 %984 }
 0x292   :  { %7041 = vst [vmem:[#allocation70_spill] sm:$0xff] %v5050_v63 }
 0x295   :  { %v5054_v12 = vpop.permute.xlu2 %1034 }
 0x296   :  { %7043 = vst [vmem:[#allocation72_spill] sm:$0xff] %v5054_v12 }
 0x29a   :  { %v5056_v60 = vpop.permute.xlu1 %999 }
 0x29b   :  { %7044 = vst [vmem:[#allocation73_spill] sm:$0xff] %v5056_v60  ;;  %v5058_v23 = vpop.permute.xlu0 %979 }
 0x29c   :  { %7045 = vst [vmem:[#allocation74_spill] sm:$0xff] %v5058_v23 }
 0x29e   :  { %v5060_v62 = vpop.permute.xlu2 %1322 }
 0x29f   :  { %7046 = vst [vmem:[#allocation75_spill] sm:$0xff] %v5060_v62  ;;  %v1396_v28 = vsub.f32 %v4594_v5, %v5060_v62 }
 0x2a1   :  { %v1413_v32 = vmul.f32 1.442695, %v1396_v28 }
 0x2a2   :  { %v5064_v48 = vpop.permute.xlu1 %1014 }
 0x2a3   :  { %7047 = vst [vmem:[#allocation76_spill] sm:$0xff] %v5064_v48  ;;  %3791 = vpow2.f32 %v1413_v32  ;;  %v5066_v40 = vpop.permute.xlu0 %994  ;;  %v7054_v48 = vld [vmem:[#allocation43_spill] sm:$0xff] }
 0x2a4   :  { %7048 = vst [vmem:[#allocation77_spill] sm:$0xff] %v5066_v40 }
 0x2a6   :  { %v5068_v63 = vpop.permute.xlu2 %1337 }
 0x2a7   :  { %7049 = vst [vmem:[#allocation78_spill] sm:$0xff] %v5068_v63  ;;  %v1399_v12 = vsub.f32 %v4620_v58, %v5068_v63 }
 0x2a9   :  { %v3792_v37 = vpop.eup %3791  ;;  %v1419_v60 = vmul.f32 1.442695, %v1399_v12 }
 0x2aa   :  { %v5072_v6 = vpop.permute.xlu1 %1029  ;;  %1461 = vadd.xlane.f32.xlu2 %v3792_v37 }
 0x2ab   :  { %7050 = vst [vmem:[#allocation79_spill] sm:$0xff] %v5072_v6  ;;  %3793 = vpow2.f32 %v1419_v60  ;;  %v5074_v23 = vpop.permute.xlu0 %1009  ;;  %v7057_v60 = vld [vmem:[#allocation44_spill] sm:$0xff] }
 0x2ac   :  { %7051 = vst [vmem:[#allocation80_spill] sm:$0xff] %v5074_v23 }
 0x2ae   :  { %v5091_v20 = vpop.permute.xlu2 %1347 }
 0x2af   :  { %7058 = vst [vmem:[#allocation44_spill] sm:$0xff] %v5091_v20  ;;  %v1401_v36 = vsub.f32 %v4602_v27, %v5091_v20 }
 0x2b1   :  { %v5076_v5 = vpop.eup %3793 }
 0x2b2   :  { %1467 = vadd.xlane.f32.xlu2 %v5076_v5 }
 0x2b3   :  { %v5079_v32 = vpop.permute.xlu0 %1024  ;;  %v5081_v28 = vpop.permute.xlu1 %1317 }
 0x2b4   :  { %7052 = vst [vmem:[#allocation81_spill] sm:$0xff] %v5079_v32  ;;  %v1395_v40 = vsub.f32 %v7054_v48, %v5081_v28 }
 0x2b5   :  { %7053 = vst [vmem:[#allocation82_spill] sm:$0xff] %v5081_v28  ;;  %v7128_v28 = vld [vmem:[#allocation16_spill] sm:$0xff] }
 0x2b6   :  { %v1411_v58 = vmul.f32 1.442695, %v1395_v40  ;;  %v1423_v40 = vmul.f32 1.442695, %v1401_v36 }
 0x2b8   :  { %3795 = vpow2.f32 %v1411_v58 }
 0x2bb   :  { %v5085_v12 = vpop.permute.xlu0 %1039  ;;  %v5087_v6 = vpop.permute.xlu1 %1332 }
 0x2bc   :  { %7055 = vst [vmem:[#allocation43_spill] sm:$0xff] %v5085_v12  ;;  %v1398_v23 = vsub.f32 %v7057_v60, %v5087_v6 }
 0x2bd   :  { %7056 = vst [vmem:[#allocation83_spill] sm:$0xff] %v5087_v6 }
 0x2be   :  { %v3796_v54 = vpop.eup %3795  ;;  %v1417_v3 = vmul.f32 1.442695, %v1398_v23 }
 0x2bf   :  { %1459 = vadd.xlane.f32.xlu1 %v3796_v54  ;;  %v1507_v32 = vpack.c.bf16 %v3792_v37, %v3796_v54 }
 0x2c0   :  { %3797 = vpow2.f32 %v1417_v3  ;;  %v5105_v3 = vpop.permute.xlu2 %1357 }
 0x2c1   :  { %1523 = vmatmul.bf16.vlgmr.msra.gmra.mxu1 %v1507_v32  ;;  %3799 = vpow2.f32 %v1423_v40  ;;  %7062 = vst [vmem:[#allocation87_spill] sm:$0xff] %v5105_v3 }
 0x2c3   :  { %v5095_v48 = vpop.permute.xlu1 %1342 }
 0x2c4   :  { %7059 = vst [vmem:[#allocation84_spill] sm:$0xff] %v5095_v48  ;;  %v5097_v58 = vpop.permute.xlu0 %1327  ;;  %v1400_v23 = vsub.f32 %v4615_v44, %v5095_v48  ;;  %v1403_v44 = vsub.f32 %v4634_v22, %v5105_v3 }
 0x2c5   :  { %7060 = vst [vmem:[#allocation85_spill] sm:$0xff] %v5097_v58  ;;  %v1397_v12 = vsub.f32 %v4589_v1, %v5097_v58 }
 0x2c6   :  { %v3798_v60 = vpop.eup %3797  ;;  %v1421_v54 = vmul.f32 1.442695, %v1400_v23  ;;  %v1427_v23 = vmul.f32 1.442695, %v1403_v44 }
 0x2c7   :  { %v1415_v39 = vmul.f32 1.442695, %v1397_v12  ;;  %1465 = vadd.xlane.f32.xlu1 %v3798_v60  ;;  %v3800_v32 = vpop.eup %3799 }
 0x2c9   :  { %3801 = vpow2.f32 %v1415_v39 }
 0x2ca   :  { %3803 = vpow2.f32 %v1421_v54 }
 0x2cb   :  { %v5103_v27 = vpop.permute.xlu1 %1352 }
 0x2cc   :  { %7061 = vst [vmem:[#allocation86_spill] sm:$0xff] %v5103_v27  ;;  %v5107_v37 = vpop.permute.xlu0 %1362  ;;  %v1402_v36 = vsub.f32 %v4639_v25, %v5103_v27 }
 0x2cd   :  { %7063 = vst [vmem:[#allocation88_spill] sm:$0xff] %v5107_v37  ;;  %v1404_v1 = vsub.f32 %v4625_v45, %v5107_v37  ;;  %v7066_v45 = vld [vmem:[#allocation48_spill] sm:$0xff] }
 0x2ce   :  { %v1425_v12 = vmul.f32 1.442695, %v1402_v36 }
 0x2cf   :  { %v3802_v16 = vpop.eup %3801  ;;  %v1429_v39 = vmul.f32 1.442695, %v1404_v1  ;;  %1471 = vadd.xlane.f32.xlu1 %v3800_v32  ;;  %v5123_v1 = vpop.permute.xlu2 %1372 }
 0x2d0   :  { %3805 = vpow2.f32 %v1425_v12  ;;  %1463 = vadd.xlane.f32.xlu0 %v3802_v16  ;;  %v1508_v40 = vpack.c.bf16 %v3798_v60, %v3802_v16  ;;  %v3804_v35 = vpop.eup %3803  ;;  %7068 = vst [vmem:[#allocation48_spill] sm:$0xff] %v5123_v1  ;;  %v7069_v60 = vld [vmem:[#allocation47_spill] sm:$0xff] }
 0x2d1   :  { %3807 = vpow2.f32 %v1429_v39  ;;  %v1406_v44 = vsub.f32 %v7069_v60, %v5123_v1  ;;  %v5132_v60 = vld [vmem:[#allocation2 + $0x30] sm:$0xff] }
 0x2d2   :  { %1528 = vmatmul.bf16.gmra.mxu1 %v1508_v40  ;;  %3809 = vpow2.f32 %v1427_v23  ;;  %v7071_v40 = vld [vmem:[#allocation52_spill] sm:$0xff]  ;;  %v1509_v23 = vpack.c.bf16 %v3804_v35, %v5076_v5 }
 0x2d3   :  { %v5115_v34 = vpop.permute.xlu1 %1367  ;;  %v1433_v42 = vmul.f32 1.442695, %v1406_v44  ;;  %v1267_v44 = vsub.f32 %v5132_v60, %v4932_v21  ;;  %v5147_v21 = vld [vmem:[#allocation2 + $0x48] sm:$0xff] }
 0x2d4   :  { %7064 = vst [vmem:[#allocation89_spill] sm:$0xff] %v5115_v34  ;;  %v5117_v25 = vpop.permute.xlu0 %1377  ;;  %v1405_v36 = vsub.f32 %v7066_v45, %v5115_v34 }
 0x2d5   :  { %7065 = vst [vmem:[#allocation90_spill] sm:$0xff] %v5117_v25  ;;  %v1407_v22 = vsub.f32 %v7067_v52, %v5117_v25 }
 0x2d6   :  { %v3806_v54 = vpop.eup %3805  ;;  %v1431_v12 = vmul.f32 1.442695, %v1405_v36 }
 0x2d7   :  { %v3808_v30 = vpop.eup %3807  ;;  %v1435_v16 = vmul.f32 1.442695, %v1407_v22  ;;  %1473 = vadd.xlane.f32.xlu2 %v3806_v54 }
 0x2d8   :  { %3811 = vpow2.f32 %v1431_v12  ;;  %1477 = vadd.xlane.f32.xlu1 %v3808_v30  ;;  %1469 = vadd.xlane.f32.xlu0 %v3804_v35  ;;  %v3810_v45 = vpop.eup %3809 }
 0x2d9   :  { %3813 = vpow2.f32 %v1435_v16  ;;  %v1510_v16 = vpack.c.bf16 %v3806_v54, %v3800_v32  ;;  %v1511_v5 = vpack.c.bf16 %v3808_v30, %v3810_v45 }
 0x2db   :  { %v5127_v39 = vpop.permute.xlu1 %1382 }
 0x2dc   :  { %7070 = vst [vmem:[#allocation46_spill] sm:$0xff] %v5127_v39  ;;  %v1408_v52 = vsub.f32 %v7071_v40, %v5127_v39  ;;  %v1283_v40 = vmul.f32 1.442695, %v1267_v44  ;;  %v5154_v44 = vld [vmem:[#allocation2 + $0x10] sm:$0xff] }
 0x2de   :  { %v3812_v55 = vpop.eup %3811  ;;  %v1437_v36 = vmul.f32 1.442695, %v1408_v52  ;;  %v5136_v52 = vld [vmem:[#allocation2 + $0x78] sm:$0xff] }
 0x2df   :  { %v3814_v49 = vpop.eup %3813  ;;  %1479 = vadd.xlane.f32.xlu2 %v3812_v55 }
 0x2e0   :  { %3815 = vpow2.f32 %v1437_v36  ;;  %1483 = vadd.xlane.f32.xlu1 %v3814_v49  ;;  %1475 = vadd.xlane.f32.xlu0 %v3810_v45  ;;  %v5140_v36 = vmax.f32 %v5136_v52, %v4926_v7  ;;  %v1274_v7 = vsub.f32 %v5147_v21, %v4979_v61  ;;  %v5161_v61 = vld [vmem:[#allocation2 + $0x70] sm:$0xff] }
 0x2e1   :  { %3817 = vpow2.f32 %v1433_v42  ;;  %v5143_v42 = vld [vmem:[#allocation2 + $0x50] sm:$0xff] }
 0x2e2   :  { %1533 = vmatmul.bf16.gmra.mxu1 %v1509_v23  ;;  %3819 = vpow2.f32 %v1283_v40  ;;  %v1271_v35 = vsub.f32 %v5143_v42, %v4953_v13  ;;  %v1297_v23 = vmul.f32 1.442695, %v1274_v7  ;;  %v1277_v13 = vsub.f32 %v5154_v44, %v5000_v38 }
 0x2e4   :  { %v1291_v32 = vmul.f32 1.442695, %v1271_v35  ;;  %v1303_v45 = vmul.f32 1.442695, %v1277_v13  ;;  %v1280_v35 = vsub.f32 %v5161_v61, %v5021_v26  ;;  %v5175_v26 = vld [vmem:[#allocation2 + $0x8] sm:$0xff] }
 0x2e5   :  { %v1273_v13 = vsub.f32 %v5175_v26, %v4971_v46 }
 0x2e6   :  { %v3816_v22 = vpop.eup %3815  ;;  %3821 = vpow2.f32 %v1291_v32 }
 0x2e7   :  { %v3818_v12 = vpop.eup %3817  ;;  %1485 = vadd.xlane.f32.xlu2 %v3816_v22  ;;  %3823 = vpow2.f32 %v1297_v23  ;;  %v1513_v38 = vpack.c.bf16 %v3816_v22, %v3814_v49 }
 0x2e8   :  { %1481 = vadd.xlane.f32.xlu0 %v3818_v12  ;;  %v3820_v54 = vpop.eup %3819  ;;  %v1512_v30 = vpack.c.bf16 %v3818_v12, %v3812_v55  ;;  %3825 = vpow2.f32 %v1303_v45  ;;  %v5171_v12 = vld [vmem:[#allocation2 + $0x18] sm:$0xff]  ;;  %v1295_v45 = vmul.f32 1.442695, %v1273_v13 }
 0x2e9   :  { %v1270_v7 = vsub.f32 %v5171_v12, %v4948_v24 }
 0x2eb   :  { %v1289_v23 = vmul.f32 1.442695, %v1270_v7 }
 0x2f2   :  { %1538 = vmatmul.bf16.gmra.mxu1 %v1510_v16  ;;  %v5151_v16 = vpop.eup %3821 }
 0x2f3   :  { %v5158_v40 = vpop.eup %3823 }
 0x2f4   :  { %v5165_v32 = vpop.eup %3825 }
 0x2ff   :  { %1387 = vperm.xlu2 %3713, %v5140_v36  }
 0x302   :  { %1543 = vmatmul.bf16.gmra.mxu1 %v1511_v5  ;;  %v1309_v5 = vmul.f32 1.442695, %v1280_v35 }
 0x304   :  { %3827 = vpow2.f32 %v1309_v5 }
 0x305   :  { %3829 = vpow2.f32 %v1289_v23 }
 0x306   :  { %3831 = vpow2.f32 %v1295_v45 }
 0x307   :  { %1599 = vperm.xlu2 %3713, %v3820_v54  }
 0x30a   :  { %v5168_v55 = vpop.eup %3827 }
 0x30b   :  { %v3830_v35 = vpop.eup %3829 }
 0x30c   :  { %v1446_v7 = vmul.f32 %v3830_v35, %v4893_v50 }
 0x30f   :  { %1619 = vperm.xlu2 %3713, %v5151_v16  }
 0x312   :  { %1548 = vmatmul.bf16.gmra.mxu1 %v1512_v30  ;;  %v1443_v30 = vmul.f32 %v3820_v54, %v4873_v43  ;;  %v5187_v43 = vpop.eup %3831  ;;  %v5189_v54 = vld [vmem:[#allocation2 + $0x60] sm:$0xff] }
 0x313   :  { %v1279_v13 = vsub.f32 %v5189_v54, %v5004_v15 }
 0x315   :  { %v1307_v45 = vmul.f32 1.442695, %v1279_v13 }
 0x317   :  { %1634 = vperm.xlu2 %3713, %v5158_v40  }
 0x31d   :  { %v5180_v5 = vpop.xlane.xlu2 %1461 }
 0x31f   :  { %1649 = vperm.xlu2 %3713, %v5165_v32  }
 0x322   :  { %1553 = vmatmul.bf16.gmra.mxu1 %v1513_v38  ;;  %v5182_v38 = vld [vmem:[#allocation2 + $0x20] sm:$0xff] }
 0x323   :  { %v1276_v24 = vsub.f32 %v5182_v38, %v4983_v53 }
 0x325   :  { %v1301_v46 = vmul.f32 1.442695, %v1276_v24 }
 0x327   :  { %1664 = vperm.xlu2 %3713, %v5168_v55   ;;  %3833 = vpow2.f32 %v1301_v46 }
 0x328   :  { %3835 = vpow2.f32 %v1307_v45 }
 0x32d   :  { %v5195_v50 = vpop.eup %3833 }
 0x32e   :  { %v1452_v24 = vmul.f32 %v5195_v50, %v4915_v14  ;;  %v5199_v46 = vpop.eup %3835 }
 0x332   :  { %v1460_v49 = vpop.xlane.xlu1 %1459 }
 0x333   :  { %v1491_v22 = vadd.f32 %v1460_v49, %v1443_v30  ;;  %v1449_v30 = vmul.f32 %v5187_v43, %v4904_v2  ;;  %v1468_v49 = vpop.xlane.xlu2 %1467  ;;  %v1455_v2 = vmul.f32 %v5199_v46, %v4924_v31  ;;  %v5211_v31 = vld [vmem:[#allocation2 + $0x28] sm:$0xff] }
 0x335   :  { %1743 = vperm.xlu2 %3713, %v1491_v22  }
 0x33a   :  { %v1466_v23 = vpop.xlane.xlu1 %1465 }
 0x33b   :  { %v1494_v17 = vadd.f32 %v1466_v23, %v1446_v7 }
 0x33d   :  { %1758 = vperm.xlu2 %3713, %v1494_v17  }
 0x342   :  { %v1472_v22 = vpop.xlane.xlu1 %1471 }
 0x343   :  { %v1497_v53 = vadd.f32 %v1472_v22, %v1449_v30 }
 0x345   :  { %1773 = vperm.xlu2 %3713, %v1497_v53   ;;  %v7073_v53 = vld [vmem:[#allocation65_spill] sm:$0xff] }
 0x34a   :  { %v1474_v17 = vpop.xlane.xlu2 %1473 }
 0x34b   :  { %v1478_v7 = vpop.xlane.xlu1 %1477 }
 0x34c   :  { %v1500_v23 = vadd.f32 %v1478_v7, %v1452_v24  ;;  %v5207_v24 = vld [vmem:[#allocation2] sm:$0xff] }
 0x34d   :  { %v1268_v7 = vsub.f32 %v5207_v24, %v4937_v4  ;;  %v5222_v4 = vld [vmem:[#allocation2 + $0x40] sm:$0xff] }
 0x34e   :  { %1788 = vperm.xlu2 %3713, %v1500_v23  }
 0x34f   :  { %v1285_v23 = vmul.f32 1.442695, %v1268_v7 }
 0x352   :  { %v1480_v15 = vpop.xlane.xlu2 %1479 }
 0x353   :  { %v1484_v39 = vpop.xlane.xlu1 %1483 }
 0x354   :  { %v1503_v30 = vadd.f32 %v1484_v39, %v1455_v2  ;;  %v5215_v39 = vmax.f32 %v5211_v31, %v4993_v11 }
 0x356   :  { %1803 = vperm.xlu2 %3713, %v1503_v30  }
 0x35a   :  { %v1486_v13 = vpop.xlane.xlu2 %1485 }
 0x362   :  { %v5203_v22 = vpop.permute.xlu2 %1387 }
 0x363   :  { %7072 = vst [vmem:[#allocation47_spill] sm:$0xff] %v5203_v22  ;;  %v1409_v45 = vsub.f32 %v7073_v53, %v5203_v22 }
 0x365   :  { %v1439_v25 = vmul.f32 1.442695, %v1409_v45  ;;  %v1275_v45 = vsub.f32 %v5222_v4, %v4988_v10  ;;  %v1281_v10 = vsub.f32 %v5136_v52, %v5140_v36  ;;  %v1464_v36 = vpop.xlane.xlu0 %1463 }
 0x367   :  { %3837 = vpow2.f32 %v1439_v25  ;;  %v5218_v25 = vld [vmem:[#allocation2 + $0x68] sm:$0xff]  ;;  %v1299_v11 = vmul.f32 1.442695, %v1275_v45 }
 0x368   :  { %3839 = vpow2.f32 %v1285_v23  ;;  %v1272_v30 = vsub.f32 %v5218_v25, %v4960_v56  ;;  %v5229_v23 = vld [vmem:[#allocation2 + $0x38] sm:$0xff] }
 0x369   :  { %v1278_v34 = vsub.f32 %v5229_v23, %v5009_v9  ;;  %v7074_v9 = vld [vmem:[#allocation29_spill] sm:$0xff] }
 0x36a   :  { %v1293_v53 = vmul.f32 1.442695, %v1272_v30 }
 0x36b   :  { %v1305_v56 = vmul.f32 1.442695, %v1278_v34 }
 0x36c   :  { %3841 = vpow2.f32 %v1293_v53 }
 0x36d   :  { %v3838_v14 = vpop.eup %3837  ;;  %3843 = vpow2.f32 %v1299_v11  ;;  %v1470_v27 = vpop.xlane.xlu0 %1469 }
 0x36e   :  { %1487 = vadd.xlane.f32.xlu0 %v3838_v14  ;;  %v3840_v2 = vpop.eup %3839  ;;  %3845 = vpow2.f32 %v1305_v56  ;;  %v1447_v56 = vmul.f32 %v5151_v16, %v4884_v51 }
 0x36f   :  { %v1444_v34 = vmul.f32 %v3840_v2, %v7074_v9 }
 0x370   :  { %v1495_v37 = vadd.f32 %v1468_v49, %v1447_v56 }
 0x371   :  { %v1492_v11 = vadd.f32 %v5180_v5, %v1444_v34  ;;  %v1456_v5 = vmul.f32 %v5168_v55, %v4913_v47  ;;  %v7077_v34 = vld [vmem:[#allocation27_spill] sm:$0xff] }
 0x372   :  { %v5226_v7 = vpop.eup %3841 }
 0x373   :  { %v5233_v30 = vpop.eup %3843 }
 0x374   :  { %v5238_v53 = vpop.eup %3845 }
 0x375   :  { %v1476_v9 = vpop.xlane.xlu0 %1475 }
 0x37d   :  { %v1482_v51 = vpop.xlane.xlu0 %1481 }
 0x382   :  { %1392 = vperm.xlu0 %3714, %v5215_v39  }
 0x38a   :  { %1604 = vperm.xlu0 %3714, %v3840_v2   ;;  %v1504_v2 = vadd.f32 %v1486_v13, %v1456_v5  ;;  %v1454_v5 = vmul.f32 %v5238_v53, %v4907_v0 }
 0x392   :  { %1614 = vperm.xlu0 %3714, %v3830_v35   ;;  %v1311_v35 = vmul.f32 1.442695, %v1281_v10  ;;  %v1450_v10 = vmul.f32 %v5158_v40, %v4891_v57  ;;  %v7076_v57 = vld [vmem:[#allocation66_spill] sm:$0xff] }
 0x394   :  { %3847 = vpow2.f32 %v1311_v35  ;;  %v1498_v20 = vadd.f32 %v1474_v17, %v1450_v10  ;;  %v1453_v35 = vmul.f32 %v5165_v32, %v4902_v59  ;;  %v1269_v32 = vsub.f32 %v4962_v33, %v4966_v18  ;;  %v5295_v10 = vld [vmem:[%s6796_s2 + $0x70] sm:$0xff] }
 0x395   :  { %v4102_v17 = vmov 2   ;;  %v1282_v18 = vsub.f32 %v5211_v31, %v5215_v39  ;;  %v5287_v39 = vld [vmem:[%s6796_s2 + $0x58] sm:$0xff] }
 0x396   :  { %v1501_v22 = vadd.f32 %v1480_v15, %v1453_v35  ;;  %v1287_v47 = vmul.f32 1.442695, %v1269_v32  ;;  %v5265_v15 = vld [vmem:[%s6796_s2] sm:$0xff]  ;;  %v5350_v32 = vld [vmem:[%s6796_s2 + $0x48] sm:$0xff] }
 0x397   :  { %v1313_v13 = vmul.f32 1.442695, %v1282_v18 }
 0x39a   :  { %1624 = vperm.xlu0 %3714, %v5226_v7   ;;  %v5241_v45 = vpop.eup %3847 }
 0x3a2   :  { %1639 = vperm.xlu0 %3714, %v5233_v30  }
 0x3aa   :  { %1654 = vperm.xlu0 %3714, %v5238_v53  }
 0x3b2   :  { %1669 = vperm.xlu0 %3714, %v5241_v45  }
 0x3ba   :  { %1748 = vperm.xlu0 %3714, %v1492_v11   ;;  %v1448_v11 = vmul.f32 %v5226_v7, %v7077_v34  ;;  %v1502_v7 = vadd.f32 %v1482_v51, %v1454_v5  ;;  %v5402_v5 = vld [vmem:[%s6796_s2 + $0x68] sm:$0xff] }
 0x3bb   :  { %7098 = vst [vmem:[#allocation107_spill] sm:$0xff] %v5402_v5 }
 0x3bc   :  { %v1496_v56 = vadd.f32 %v1470_v27, %v1448_v11 }
 0x3c2   :  { %1763 = vperm.xlu0 %3714, %v1495_v37  }
 0x3ca   :  { %1778 = vperm.xlu0 %3714, %v1498_v20  }
 0x3d2   :  { %1793 = vperm.xlu0 %3714, %v1501_v22   ;;  %v5280_v22 = vld [vmem:[%s6796_s2 + $0x40] sm:$0xff] }
 0x3da   :  { %1808 = vperm.xlu0 %3714, %v1504_v2   ;;  %v1457_v2 = vmul.f32 %v5241_v45, %v4918_v29  ;;  %v5323_v29 = vld [vmem:[%s6796_s2 + $0x18] sm:$0xff] }
 0x3e1   :  { %v1488_v37 = vpop.xlane.xlu0 %1487 }
 0x3e2   :  { %3715 = vset.pattern.permute.xlu0 %v4102_v17 }
 0x3e3   :  { %1854 = vperm.xlu0 %3715, %v5265_v15  }
 0x3f4   :  { %v5254_v16 = vpop.permute.xlu0 %1392 }
 0x3f5   :  { %7075 = vst [vmem:[#allocation52_spill] sm:$0xff] %v5254_v16  ;;  %v1410_v40 = vsub.f32 %v7076_v57, %v5254_v16  ;;  %v1505_v57 = vadd.f32 %v1488_v37, %v1457_v2 }
 0x3f7   :  { %v1441_v20 = vmul.f32 1.442695, %v1410_v40 }
 0x3f9   :  { %3849 = vpow2.f32 %v1441_v20  ;;  %v5334_v20 = vld [vmem:[%s6796_s2 + $0x30] sm:$0xff] }
 0x3fa   :  { %3851 = vpow2.f32 %v1287_v47  ;;  %v5356_v47 = vld [vmem:[%s6796_s2 + $0x20] sm:$0xff] }
 0x3fb   :  { %3853 = vpow2.f32 %v1313_v13 }
 0x3ff   :  { %v3850_v49 = vpop.eup %3849 }
 0x400   :  { %1489 = vadd.xlane.f32.xlu1 %v3850_v49  ;;  %v1514_v59 = vpack.c.bf16 %v3850_v49, %v3838_v14  ;;  %v3852_v55 = vpop.eup %3851 }
 0x401   :  { %v1445_v14 = vmul.f32 %v3852_v55, %v4875_v8  ;;  %v1451_v8 = vmul.f32 %v5233_v30, %v4896_v41  ;;  %v5313_v41 = vld [vmem:[%s6796_s2 + $0x8] sm:$0xff]  ;;  %v5318_v30 = vpop.permute.xlu2 %1599 }
 0x402   :  { %1558 = vmatmul.bf16.gmra.mxu1 %v1514_v59  ;;  %7082 = vst [vmem:[#allocation91_spill] sm:$0xff] %v5318_v30 }
 0x403   :  { %v1499_v35 = vadd.f32 %v1476_v9, %v1451_v8 }
 0x409   :  { %v5329_v37 = vpop.permute.xlu2 %1619 }
 0x40a   :  { %7084 = vst [vmem:[#allocation93_spill] sm:$0xff] %v5329_v37 }
 0x411   :  { %v5345_v59 = vpop.permute.xlu2 %1634 }
 0x412   :  { %7086 = vst [vmem:[#allocation95_spill] sm:$0xff] %v5345_v59 }
 0x419   :  { %1609 = vperm.xlu1 %3712, %v3852_v55   ;;  %v5369_v13 = vpop.permute.xlu2 %1649 }
 0x41a   :  { %7089 = vst [vmem:[#allocation98_spill] sm:$0xff] %v5369_v13 }
 0x421   :  { %1629 = vperm.xlu1 %3712, %v5187_v43   ;;  %v5274_v43 = vld [vmem:[%s6796_s2 + $0x28] sm:$0xff]  ;;  %v5387_v11 = vpop.permute.xlu2 %1664 }
 0x422   :  { %1874 = vperm.xlu0 %3715, %v5274_v43   ;;  %7094 = vst [vmem:[#allocation103_spill] sm:$0xff] %v5387_v11 }
 0x429   :  { %1644 = vperm.xlu1 %3712, %v5195_v50   ;;  %v3854_v50 = vpop.eup %3853 }
 0x42a   :  { %1886 = vperm.xlu0 %3715, %v5280_v22   ;;  %v1458_v53 = vmul.f32 %v3854_v50, %v4939_v19  ;;  %v5342_v19 = vld [vmem:[%s6796_s2 + $0x10] sm:$0xff] }
 0x431   :  { %1659 = vperm.xlu1 %3712, %v5199_v46   ;;  %v1493_v46 = vadd.f32 %v1464_v36, %v1445_v14  ;;  %v5300_v36 = vpop.permute.xlu0 %1604  ;;  %v5380_v14 = vld [vmem:[%s6796_s2 + $0x78] sm:$0xff] }
 0x432   :  { %1898 = vperm.xlu0 %3715, %v5287_v39   ;;  %7078 = vst [vmem:[#allocation65_spill] sm:$0xff] %v5300_v36 }
 0x433   :  { %7091 = vst [vmem:[#allocation100_spill] sm:$0xff] %v5380_v14 }
 0x439   :  { %1674 = vperm.xlu1 %3712, %v3854_v50   ;;  %v5304_v27 = vpop.permute.xlu0 %1614  ;;  %v5374_v50 = vld [vmem:[%s6796_s2 + $0x38] sm:$0xff] }
 0x43a   :  { %1910 = vperm.xlu0 %3715, %v5295_v10   ;;  %7079 = vst [vmem:[#allocation29_spill] sm:$0xff] %v5304_v27 }
 0x43b   :  { %7090 = vst [vmem:[#allocation99_spill] sm:$0xff] %v5374_v50 }
 0x441   :  { %1753 = vperm.xlu1 %3712, %v1493_v46   ;;  %v5308_v40 = vpop.permute.xlu0 %1624 }
 0x442   :  { %7080 = vst [vmem:[#allocation66_spill] sm:$0xff] %v5308_v40 }
 0x449   :  { %1768 = vperm.xlu1 %3712, %v1496_v56   ;;  %v5316_v0 = vpop.permute.xlu0 %1639  ;;  %v5392_v56 = vld [vmem:[%s6796_s2 + $0x50] sm:$0xff] }
 0x44a   :  { %7081 = vst [vmem:[#allocation27_spill] sm:$0xff] %v5316_v0 }
 0x44b   :  { %7095 = vst [vmem:[#allocation104_spill] sm:$0xff] %v5392_v56 }
 0x451   :  { %1783 = vperm.xlu1 %3712, %v1499_v35   ;;  %v5327_v51 = vpop.permute.xlu0 %1654 }
 0x452   :  { %7083 = vst [vmem:[#allocation92_spill] sm:$0xff] %v5327_v51 }
 0x459   :  { %1798 = vperm.xlu1 %3712, %v1502_v7   ;;  %v5337_v49 = vpop.permute.xlu0 %1669  ;;  %v5405_v7 = vpop.permute.xlu2 %1743 }
 0x45a   :  { %7085 = vst [vmem:[#allocation94_spill] sm:$0xff] %v5337_v49  ;;  %v5424_v49 = vld [vmem:[%s6797_s3] sm:$0xf] }
 0x45b   :  { %7099 = vst [vmem:[#allocation108_spill] sm:$0xff] %v5405_v7  ;;  %v5427_v11 = vperm.slane %v5424_v49, 2 }
 0x45c   :  { %7107 = vst [vmem:[#allocation116_spill] sm:$0xff] %v5424_v49 }
 0x461   :  { %1813 = vperm.xlu1 %3712, %v1505_v57   ;;  %v5359_v55 = vpop.permute.xlu0 %1748 }
 0x462   :  { %7087 = vst [vmem:[#allocation96_spill] sm:$0xff] %v5359_v55 }
 0x469   :  { %3716 = vset.pattern.permute.xlu1 %v4102_v17  ;;  %v5383_v46 = vpop.permute.xlu0 %1763 }
 0x46a   :  { %1858 = vperm.xlu1 %3716, %v5313_v41   ;;  %7092 = vst [vmem:[#allocation101_spill] sm:$0xff] %v5383_v46 }
 0x471   :  { %v5397_v35 = vpop.permute.xlu0 %1778 }
 0x472   :  { %1866 = vperm.xlu1 %3716, %v5323_v29   ;;  %7097 = vst [vmem:[#allocation106_spill] sm:$0xff] %v5397_v35 }
 0x473   :  { %v1490_v45 = vpop.xlane.xlu1 %1489 }
 0x474   :  { %v1506_v9 = vadd.f32 %v1490_v45, %v1458_v53  ;;  %v5411_v53 = vpop.permute.xlu2 %1758 }
 0x475   :  { %7102 = vst [vmem:[#allocation111_spill] sm:$0xff] %v5411_v53 }
 0x476   :  { %1818 = vperm.xlu2 %3713, %v1506_v9  }
 0x479   :  { %v5409_v57 = vpop.permute.xlu0 %1793 }
 0x47a   :  { %1878 = vperm.xlu1 %3716, %v5334_v20   ;;  %7101 = vst [vmem:[#allocation110_spill] sm:$0xff] %v5409_v57 }
 0x47c   :  { %v5419_v46 = vpop.permute.xlu2 %1773 }
 0x47d   :  { %7106 = vst [vmem:[#allocation115_spill] sm:$0xff] %v5419_v46  ;;  %v7111_v46 = vld [vmem:[#allocation8_spill] sm:$0xff] }
 0x47e   :  { %3717 = vset.pattern.permute.xlu2 %v4102_v17  ;;  %v5364_v17 = vld [vmem:[%s6796_s2 + $0x60] sm:$0xff]  ;;  %vm7112_vm8 = vcmp.gt.f32.partialorder %v7111_v46, 0.0 }
 0x47f   :  { %1862 = vperm.xlu2 %3717, %v5342_v19  }
 0x481   :  { %v5415_v9 = vpop.permute.xlu0 %1808 }
 0x482   :  { %1890 = vperm.xlu1 %3716, %v5350_v32   ;;  %7104 = vst [vmem:[#allocation113_spill] sm:$0xff] %v5415_v9 }
 0x487   :  { %1870 = vperm.xlu2 %3717, %v5356_v47  }
 0x489   :  { %v1855_v7 = vpop.permute.xlu0 %1854 }
 0x48a   :  { %1902 = vperm.xlu1 %3716, %v5364_v17   ;;  %v1918_v57 = vadd.f32 %v5427_v11, %v1855_v7 }
 0x48b   :  { %v5367_v18 = vpop.permute.xlu1 %1609 }
 0x48c   :  { %7088 = vst [vmem:[#allocation97_spill] sm:$0xff] %v5367_v18  ;;  %v1950_v9 = vmul.f32 0.2, %v1918_v57  ;;  %vm1934_vm14 = vcmp.gt.f32.partialorder %v1918_v57, 0.0 }
 0x48e   :  { %v1966_v55 = vsel %vm1934_vm14, %v1918_v57, %v1950_v9 }
 0x48f   :  { %1882 = vperm.xlu2 %3717, %v5374_v50  }
 0x492   :  { %1914 = vperm.xlu1 %3716, %v5380_v14  }
 0x493   :  { %v5385_v34 = vpop.permute.xlu1 %1629 }
 0x494   :  { %7093 = vst [vmem:[#allocation102_spill] sm:$0xff] %v5385_v34 }
 0x497   :  { %1894 = vperm.xlu2 %3717, %v5392_v56  }
 0x49b   :  { %v5395_v8 = vpop.permute.xlu1 %1644 }
 0x49c   :  { %7096 = vst [vmem:[#allocation105_spill] sm:$0xff] %v5395_v8 }
 0x49f   :  { %1906 = vperm.xlu2 %3717, %v5402_v5  }
 0x4a3   :  { %v5407_v2 = vpop.permute.xlu1 %1659 }
 0x4a4   :  { %7100 = vst [vmem:[#allocation109_spill] sm:$0xff] %v5407_v2  ;;  %v5438_v2 = vsel %vm7112_vm8, %v1966_v55, -1e+09 }
 0x4ab   :  { %v5413_v45 = vpop.permute.xlu1 %1674 }
 0x4ac   :  { %7103 = vst [vmem:[#allocation112_spill] sm:$0xff] %v5413_v45  ;;  %v5432_v45 = vpop.permute.xlu2 %1788 }
 0x4ad   :  { %7109 = vst [vmem:[#allocation118_spill] sm:$0xff] %v5432_v45  ;;  %v1875_v45 = vpop.permute.xlu0 %1874 }
 0x4b3   :  { %v5417_v35 = vpop.permute.xlu1 %1753 }
 0x4b4   :  { %7105 = vst [vmem:[#allocation114_spill] sm:$0xff] %v5417_v35  ;;  %v5440_v51 = vpop.permute.xlu2 %1803 }
 0x4b5   :  { %7113 = vst [vmem:[#allocation120_spill] sm:$0xff] %v5440_v51  ;;  %v1887_v8 = vpop.permute.xlu0 %1886  ;;  %v1923_v51 = vadd.f32 %v5427_v11, %v1875_v45 }
 0x4b7   :  { %v1955_v34 = vmul.f32 0.2, %v1923_v51  ;;  %vm1939_vm8 = vcmp.gt.f32.partialorder %v1923_v51, 0.0 }
 0x4b9   :  { %v1971_v36 = vsel %vm1939_vm8, %v1923_v51, %v1955_v34 }
 0x4ba   :  { %v5467_v16 = vsel %vm138_vm15, %v1971_v36, -1e+09 }
 0x4bb   :  { %v5430_v53 = vpop.permute.xlu1 %1768 }
 0x4bc   :  { %7108 = vst [vmem:[#allocation117_spill] sm:$0xff] %v5430_v53 }
 0x4bd   :  { %v1899_v27 = vpop.permute.xlu0 %1898 }
 0x4be   :  { %v1929_v34 = vadd.f32 %v5427_v11, %v1899_v27 }
 0x4c3   :  { %v5434_v35 = vpop.permute.xlu1 %1783 }
 0x4c4   :  { %7110 = vst [vmem:[#allocation119_spill] sm:$0xff] %v5434_v35 }
 0x4c5   :  { %v1911_v3 = vpop.permute.xlu0 %1910 }
 0x4c8   :  { %1998 = vmax.xlane.f32.xlu2 %v5438_v2 }
 0x4cb   :  { %v5443_v13 = vpop.permute.xlu1 %1798 }
 0x4cc   :  { %7114 = vst [vmem:[#allocation121_spill] sm:$0xff] %v5443_v13 }
 0x4d0   :  { %v5445_v7 = vpop.permute.xlu2 %1818 }
 0x4d1   :  { %7115 = vst [vmem:[#allocation122_spill] sm:$0xff] %v5445_v7 }
 0x4d3   :  { %v5447_v53 = vpop.permute.xlu1 %1813 }
 0x4d4   :  { %7116 = vst [vmem:[#allocation123_spill] sm:$0xff] %v5447_v53 }
 0x4d9   :  { %v1863_v0 = vpop.permute.xlu2 %1862 }
 0x4da   :  { %v1920_v57 = vadd.f32 %v5427_v11, %v1863_v0 }
 0x4dc   :  { %v1952_v9 = vmul.f32 0.2, %v1920_v57  ;;  %v1859_v35 = vpop.permute.xlu1 %1858  ;;  %vm1936_vm1 = vcmp.gt.f32.partialorder %v1920_v57, 0.0 }
 0x4dd   :  { %v1919_v55 = vadd.f32 %v5427_v11, %v1859_v35 }
 0x4de   :  { %v1968_v59 = vsel %vm1936_vm1, %v1920_v57, %v1952_v9  ;;  %v1926_v57 = vadd.f32 %v5427_v11, %v1887_v8 }
 0x4df   :  { %v1951_v40 = vmul.f32 0.2, %v1919_v55  ;;  %v5454_v13 = vsel %vm135_vm0, %v1968_v59, -1e+09  ;;  %vm1935_vm14 = vcmp.gt.f32.partialorder %v1919_v55, 0.0 }
 0x4e0   :  { %2002 = vmax.xlane.f32.xlu1 %v5454_v13  ;;  %v1958_v30 = vmul.f32 0.2, %v1926_v57 }
 0x4e1   :  { %v1871_v7 = vpop.permute.xlu2 %1870  ;;  %v1967_v53 = vsel %vm1935_vm14, %v1919_v55, %v1951_v40  ;;  %vm1942_vm14 = vcmp.gt.f32.partialorder %v1926_v57, 0.0 }
 0x4e2   :  { %v5459_v18 = vsel %vm134_vm6, %v1967_v53, -1e+09  ;;  %v1922_v59 = vadd.f32 %v5427_v11, %v1871_v7  ;;  %v1974_v7 = vsel %vm1942_vm14, %v1926_v57, %v1958_v30  ;;  %vm1945_vm14 = vcmp.gt.f32.partialorder %v1929_v34, 0.0 }
 0x4e3   :  { %2000 = vmax.xlane.f32.xlu0 %v5459_v18  ;;  %v5480_v6 = vsel %vm141_vm12, %v1974_v7, -1e+09 }
 0x4e4   :  { %v1867_v35 = vpop.permute.xlu1 %1866  ;;  %vm1938_vm8 = vcmp.gt.f32.partialorder %v1922_v59, 0.0 }
 0x4e5   :  { %v1921_v45 = vadd.f32 %v5427_v11, %v1867_v35  ;;  %v1954_v35 = vmul.f32 0.2, %v1922_v59 }
 0x4e7   :  { %v1953_v9 = vmul.f32 0.2, %v1921_v45  ;;  %vm1937_vm1 = vcmp.gt.f32.partialorder %v1921_v45, 0.0 }
 0x4e9   :  { %v1883_v40 = vpop.permute.xlu2 %1882  ;;  %v1969_v55 = vsel %vm1937_vm1, %v1921_v45, %v1953_v9  ;;  %v1970_v9 = vsel %vm1938_vm8, %v1922_v59, %v1954_v35 }
 0x4ea   :  { %v5471_v1 = vsel %vm136_vm9, %v1969_v55, -1e+09  ;;  %v1925_v36 = vadd.f32 %v5427_v11, %v1883_v40  ;;  %v1961_v55 = vmul.f32 0.2, %v1929_v34  ;;  %v5484_v53 = vsel %vm137_vm5, %v1970_v9, -1e+09 }
 0x4eb   :  { %2008 = vmax.xlane.f32.xlu0 %v5467_v16  ;;  %2004 = vmax.xlane.f32.xlu2 %v5471_v1  ;;  %v1932_v40 = vadd.f32 %v5427_v11, %v1911_v3 }
 0x4ec   :  { %v1879_v51 = vpop.permute.xlu1 %1878  ;;  %v1957_v57 = vmul.f32 0.2, %v1925_v36  ;;  %vm1941_vm8 = vcmp.gt.f32.partialorder %v1925_v36, 0.0 }
 0x4ed   :  { %v1924_v8 = vadd.f32 %v5427_v11, %v1879_v51  ;;  %v1977_v51 = vsel %vm1945_vm14, %v1929_v34, %v1961_v55  ;;  %vm1948_vm14 = vcmp.gt.f32.partialorder %v1932_v40, 0.0 }
 0x4ee   :  { %v5498_v62 = vsel %vm6907_vm4, %v1977_v51, -1e+09  ;;  %vm7129_vm4 = vcmp.gt.f32.partialorder %v7128_v28, 0.0 }
 0x4ef   :  { %v1956_v45 = vmul.f32 0.2, %v1924_v8  ;;  %vm1940_vm1 = vcmp.gt.f32.partialorder %v1924_v8, 0.0 }
 0x4f1   :  { %v1972_v58 = vsel %vm1940_vm1, %v1924_v8, %v1956_v45  ;;  %v1895_v48 = vpop.permute.xlu2 %1894  ;;  %v1964_v45 = vmul.f32 0.2, %v1932_v40 }
 0x4f2   :  { %v5488_v30 = vsel %vm139_vm10, %v1972_v58, -1e+09  ;;  %v1928_v8 = vadd.f32 %v5427_v11, %v1895_v48  ;;  %v1973_v58 = vsel %vm1941_vm8, %v1925_v36, %v1957_v57 }
 0x4f3   :  { %2014 = vmax.xlane.f32.xlu0 %v5480_v6  ;;  %2006 = vmax.xlane.f32.xlu2 %v5484_v53  ;;  %v5502_v27 = vsel %vm140_vm11, %v1973_v58, -1e+09  ;;  %v1980_v57 = vsel %vm1948_vm14, %v1932_v40, %v1964_v45 }
 0x4f4   :  { %2010 = vmax.xlane.f32.xlu1 %v5488_v30  ;;  %v1891_v59 = vpop.permute.xlu1 %1890  ;;  %v1960_v34 = vmul.f32 0.2, %v1928_v8  ;;  %vm1944_vm8 = vcmp.gt.f32.partialorder %v1928_v8, 0.0 }
 0x4f5   :  { %v1927_v35 = vadd.f32 %v5427_v11, %v1891_v59 }
 0x4f6   :  { %v1976_v51 = vsel %vm1944_vm8, %v1928_v8, %v1960_v34 }
 0x4f7   :  { %v1959_v7 = vmul.f32 0.2, %v1927_v35  ;;  %vm1943_vm1 = vcmp.gt.f32.partialorder %v1927_v35, 0.0  ;;  %v5519_v37 = vsel %vm7129_vm4, %v1976_v51, -1e+09 }
 0x4f9   :  { %v1975_v9 = vsel %vm1943_vm1, %v1927_v35, %v1959_v7  ;;  %v1907_v48 = vpop.permute.xlu2 %1906 }
 0x4fa   :  { %v5506_v3 = vsel %vm142_vm2, %v1975_v9, -1e+09  ;;  %v1931_v59 = vadd.f32 %v5427_v11, %v1907_v48  ;;  %v5515_v9 = vsel %vm147_vm3, %v1980_v57, -1e+09 }
 0x4fb   :  { %2020 = vmax.xlane.f32.xlu0 %v5498_v62  ;;  %2012 = vmax.xlane.f32.xlu2 %v5502_v27 }
 0x4fc   :  { %2016 = vmax.xlane.f32.xlu1 %v5506_v3  ;;  %v1903_v36 = vpop.permute.xlu1 %1902  ;;  %vm1947_vm14 = vcmp.gt.f32.partialorder %v1931_v59, 0.0 }
 0x4fd   :  { %v1930_v55 = vadd.f32 %v5427_v11, %v1903_v36  ;;  %v1963_v36 = vmul.f32 0.2, %v1931_v59 }
 0x4ff   :  { %v1962_v35 = vmul.f32 0.2, %v1930_v55  ;;  %vm1946_vm1 = vcmp.gt.f32.partialorder %v1930_v55, 0.0  ;;  %v1979_v34 = vsel %vm1947_vm14, %v1931_v59, %v1963_v36 }
 0x501   :  { %v1978_v7 = vsel %vm1946_vm1, %v1930_v55, %v1962_v35  ;;  %v7131_v55 = vld [vmem:[#allocation19_spill] sm:$0xff] }
 0x502   :  { %v5523_v0 = vsel %vm145_vm13, %v1978_v7, -1e+09  ;;  %vm7132_vm4 = vcmp.gt.f32.partialorder %v7131_v55, 0.0  ;;  %v4103_v7 = vmov 64  }
 0x503   :  { %2026 = vmax.xlane.f32.xlu0 %v5515_v9  ;;  %2018 = vmax.xlane.f32.xlu2 %v5519_v37  ;;  %v5531_v57 = vsel %vm7132_vm4, %v1979_v34, -1e+09 }
 0x504   :  { %2022 = vmax.xlane.f32.xlu1 %v5523_v0  ;;  %v1915_v40 = vpop.permute.xlu1 %1914  ;;  %3718 = vset.pattern.permute.xlu2 %v4103_v7 }
 0x505   :  { %v1933_v8 = vadd.f32 %v5427_v11, %v1915_v40  ;;  %3720 = vset.pattern.permute.xlu1 %v4103_v7  ;;  %3719 = vset.pattern.permute.xlu0 %v4103_v7 }
 0x507   :  { %v1965_v45 = vmul.f32 0.2, %v1933_v8  ;;  %vm1949_vm8 = vcmp.gt.f32.partialorder %v1933_v8, 0.0 }
 0x509   :  { %v1981_v48 = vsel %vm1949_vm8, %v1933_v8, %v1965_v45 }
 0x50a   :  { %v5535_v51 = vsel %vm148_vm7, %v1981_v48, -1e+09 }
 0x50b   :  { %2024 = vmax.xlane.f32.xlu2 %v5531_v57 }
 0x50c   :  { %2028 = vmax.xlane.f32.xlu1 %v5535_v51 }
 0x53b   :  { %v1999_v11 = vpop.xlane.xlu2 %1998 }
 0x53c   :  { %v5540_v59 = vmax.f32 %v5132_v60, %v1999_v11 }
 0x53e   :  { %2096 = vperm.xlu2 %3718, %v5540_v59  }
 0x553   :  { %v2003_v36 = vpop.xlane.xlu1 %2002 }
 0x554   :  { %v5544_v40 = vmax.f32 %v4962_v33, %v2003_v36 }
 0x556   :  { %v2001_v8 = vpop.xlane.xlu0 %2000  ;;  %2106 = vperm.xlu1 %3720, %v5544_v40  }
 0x557   :  { %v5548_v45 = vmax.f32 %v5207_v24, %v2001_v8 }
 0x559   :  { %2101 = vperm.xlu0 %3719, %v5548_v45  }
 0x55e   :  { %v2009_v34 = vpop.xlane.xlu0 %2008  ;;  %v2005_v48 = vpop.xlane.xlu2 %2004 }
 0x55f   :  { %v5552_v7 = vmax.f32 %v5171_v12, %v2005_v48  ;;  %v5556_v33 = vmax.f32 %v5218_v25, %v2009_v34 }
 0x561   :  { %2111 = vperm.xlu2 %3718, %v5552_v7  }
 0x566   :  { %v2015_v11 = vpop.xlane.xlu0 %2014  ;;  %v2007_v55 = vpop.xlane.xlu2 %2006 }
 0x567   :  { %v5559_v36 = vmax.f32 %v5222_v4, %v2015_v11  ;;  %v5562_v8 = vmax.f32 %v5143_v42, %v2007_v55  ;;  %v2011_v58 = vpop.xlane.xlu1 %2010 }
 0x568   :  { %v5574_v11 = vmax.f32 %v5175_v26, %v2011_v58 }
 0x569   :  { %2136 = vperm.xlu0 %3719, %v5559_v36   ;;  %2121 = vperm.xlu2 %3718, %v5556_v33  }
 0x56a   :  { %2116 = vperm.xlu1 %3720, %v5562_v8  }
 0x56e   :  { %v2021_v48 = vpop.xlane.xlu0 %2020  ;;  %v2013_v28 = vpop.xlane.xlu2 %2012 }
 0x56f   :  { %v5568_v35 = vmax.f32 %v5229_v23, %v2021_v48  ;;  %v5571_v34 = vmax.f32 %v5147_v21, %v2013_v28  ;;  %v2017_v42 = vpop.xlane.xlu1 %2016 }
 0x570   :  { %v5583_v48 = vmax.f32 %v5182_v38, %v2017_v42 }
 0x571   :  { %2151 = vperm.xlu0 %3719, %v5568_v35   ;;  %2131 = vperm.xlu2 %3718, %v5571_v34  }
 0x572   :  { %2126 = vperm.xlu1 %3720, %v5574_v11  }
 0x576   :  { %v2019_v55 = vpop.xlane.xlu2 %2018 }
 0x577   :  { %v5580_v63 = vmax.f32 %v5154_v44, %v2019_v55  ;;  %v2023_v28 = vpop.xlane.xlu1 %2022 }
 0x578   :  { %v5591_v58 = vmax.f32 %v5189_v54, %v2023_v28 }
 0x579   :  { %2146 = vperm.xlu2 %3718, %v5580_v63  }
 0x57a   :  { %2141 = vperm.xlu1 %3720, %v5583_v48  }
 0x57e   :  { %v2025_v21 = vpop.xlane.xlu2 %2024 }
 0x57f   :  { %v5588_v26 = vmax.f32 %v5161_v61, %v2025_v21  ;;  %v5603_v28 = vpop.xlane.xlu1 %2028  ;;  %v5605_v21 = vpop.xlane.xlu0 %2026 }
 0x581   :  { %2161 = vperm.xlu2 %3718, %v5588_v26  }
 0x582   :  { %2156 = vperm.xlu1 %3720, %v5591_v58  }
 0x598   :  { %v5595_v44 = vpop.permute.xlu2 %2096 }
 0x599   :  { %7134 = vst [vmem:[#allocation124_spill] sm:$0xff] %v5595_v44  ;;  %v2174_v38 = vsub.f32 %v5438_v2, %v5595_v44 }
 0x59b   :  { %v2190_v42 = vmul.f32 1.442695, %v2174_v38 }
 0x59d   :  { %3855 = vpow2.f32 %v2190_v42 }
 0x5a3   :  { %v3856_v55 = vpop.eup %3855 }
 0x5aa   :  { %2238 = vadd.xlane.f32.xlu2 %v3856_v55 }
 0x5bb   :  { %v5599_v46 = vpop.permute.xlu2 %2111 }
 0x5bc   :  { %7135 = vst [vmem:[#allocation125_spill] sm:$0xff] %v5599_v46  ;;  %v2177_v61 = vsub.f32 %v5471_v1, %v5599_v46 }
 0x5be   :  { %v2196_v54 = vmul.f32 1.442695, %v2177_v61 }
 0x5c0   :  { %3857 = vpow2.f32 %v2196_v54 }
 0x5c3   :  { %v5611_v38 = vpop.permute.xlu2 %2121 }
 0x5c4   :  { %v2179_v61 = vsub.f32 %v5467_v16, %v5611_v38 }
 0x5c6   :  { %v3858_v49 = vpop.eup %3857  ;;  %v2200_v46 = vmul.f32 1.442695, %v2179_v61 }
 0x5c7   :  { %2244 = vadd.xlane.f32.xlu2 %v3858_v49 }
 0x5c8   :  { %v5607_v5 = vpop.permute.xlu1 %2106 }
 0x5c9   :  { %7136 = vst [vmem:[#allocation126_spill] sm:$0xff] %v5607_v5  ;;  %v2176_v2 = vsub.f32 %v5454_v13, %v5607_v5 }
 0x5cb   :  { %v2194_v42 = vmul.f32 1.442695, %v2176_v2  ;;  %v5613_v44 = vpop.permute.xlu0 %2101  ;;  %v5619_v5 = vpop.permute.xlu2 %2131 }
 0x5cc   :  { %v2175_v1 = vsub.f32 %v5459_v18, %v5613_v44 }
 0x5cd   :  { %3859 = vpow2.f32 %v2194_v42 }
 0x5ce   :  { %v2192_v54 = vmul.f32 1.442695, %v2175_v1 }
 0x5d0   :  { %3861 = vpow2.f32 %v2192_v54 }
 0x5d1   :  { %3863 = vpow2.f32 %v2200_v46 }
 0x5d3   :  { %v3860_v56 = vpop.eup %3859 }
 0x5d4   :  { %2242 = vadd.xlane.f32.xlu1 %v3860_v56 }
 0x5d6   :  { %v3862_v14 = vpop.eup %3861 }
 0x5d7   :  { %2240 = vadd.xlane.f32.xlu0 %v3862_v14  ;;  %v2286_v13 = vpack.c.bf16 %v3862_v14, %v3856_v55  ;;  %v3864_v2 = vpop.eup %3863  ;;  %v2181_v14 = vsub.f32 %v5502_v27, %v5619_v5 }
 0x5d9   :  { %2302 = vmatmul.bf16.vlgmr.msra.gmra.mxu2 %v2286_v13 }
 0x5db   :  { %v5621_v50 = vpop.permute.xlu0 %2136 }
 0x5dc   :  { %v2182_v18 = vsub.f32 %v5480_v6, %v5621_v50  ;;  %v5625_v16 = vpop.permute.xlu1 %2116  ;;  %2248 = vadd.xlane.f32.xlu1 %v3864_v2  ;;  %v5637_v6 = vpop.permute.xlu2 %2146 }
 0x5dd   :  { %7137 = vst [vmem:[#allocation127_spill] sm:$0xff] %v5625_v16  ;;  %v2178_v42 = vsub.f32 %v5484_v53, %v5625_v16  ;;  %v2287_v16 = vpack.c.bf16 %v3858_v49, %v3860_v56 }
 0x5de   :  { %v2206_v1 = vmul.f32 1.442695, %v2182_v18  ;;  %v2204_v18 = vmul.f32 1.442695, %v2181_v14 }
 0x5df   :  { %v2198_v46 = vmul.f32 1.442695, %v2178_v42 }
 0x5e0   :  { %3865 = vpow2.f32 %v2206_v1 }
 0x5e1   :  { %3867 = vpow2.f32 %v2198_v46 }
 0x5e3   :  { %v5631_v55 = vpop.permute.xlu0 %2151 }
 0x5e4   :  { %v2185_v61 = vsub.f32 %v5498_v62, %v5631_v55  ;;  %v5635_v54 = vpop.permute.xlu1 %2126  ;;  %v2184_v62 = vsub.f32 %v5519_v37, %v5637_v6 }
 0x5e5   :  { %7138 = vst [vmem:[#allocation128_spill] sm:$0xff] %v5635_v54  ;;  %v2180_v13 = vsub.f32 %v5488_v30, %v5635_v54 }
 0x5e6   :  { %v3866_v53 = vpop.eup %3865  ;;  %v2212_v42 = vmul.f32 1.442695, %v2185_v61  ;;  %v2210_v14 = vmul.f32 1.442695, %v2184_v62 }
 0x5e7   :  { %v2202_v1 = vmul.f32 1.442695, %v2180_v13  ;;  %2254 = vadd.xlane.f32.xlu1 %v3866_v53  ;;  %v3868_v27 = vpop.eup %3867  ;;  %v5647_v13 = vpop.permute.xlu2 %2161 }
 0x5e8   :  { %3869 = vpow2.f32 %v2212_v42  ;;  %2246 = vadd.xlane.f32.xlu0 %v3868_v27  ;;  %v2187_v37 = vsub.f32 %v5531_v57, %v5647_v13  ;;  %v2288_v62 = vpack.c.bf16 %v3864_v2, %v3868_v27  ;;  %v2049_v2 = vsub.f32 %v5171_v12, %v5552_v7 }
 0x5e9   :  { %3871 = vpow2.f32 %v2202_v1  ;;  %2307 = vmatmul.bf16.gmra.mxu2 %v2287_v16  ;;  %v2054_v12 = vsub.f32 %v5222_v4, %v5559_v36 }
 0x5ea   :  { %3873 = vpow2.f32 %v2204_v18  ;;  %v2216_v18 = vmul.f32 1.442695, %v2187_v37  ;;  %v2044_v37 = vmax.f32 %v5136_v52, %v5605_v21 }
 0x5eb   :  { %v2078_v21 = vmul.f32 1.442695, %v2054_v12 }
 0x5ec   :  { %v5643_v46 = vpop.permute.xlu1 %2141  ;;  %v2060_v4 = vsub.f32 %v5136_v52, %v2044_v37 }
 0x5ed   :  { %7139 = vst [vmem:[#allocation129_spill] sm:$0xff] %v5643_v46  ;;  %v2183_v30 = vsub.f32 %v5506_v3, %v5643_v46 }
 0x5ee   :  { %v3870_v54 = vpop.eup %3869 }
 0x5ef   :  { %v3872_v61 = vpop.eup %3871  ;;  %v2208_v49 = vmul.f32 1.442695, %v2183_v30  ;;  %2260 = vadd.xlane.f32.xlu1 %v3870_v54 }
 0x5f0   :  { %v3874_v56 = vpop.eup %3873  ;;  %2250 = vadd.xlane.f32.xlu2 %v3872_v61 }
 0x5f1   :  { %3875 = vpow2.f32 %v2208_v49  ;;  %2252 = vadd.xlane.f32.xlu0 %v3874_v56  ;;  %v2289_v57 = vpack.c.bf16 %v3874_v56, %v3872_v61  ;;  %v2046_v49 = vsub.f32 %v5132_v60, %v5540_v59  ;;  %v2051_v61 = vsub.f32 %v5218_v25, %v5556_v33 }
 0x5f2   :  { %3877 = vpow2.f32 %v2210_v14  ;;  %v2057_v25 = vsub.f32 %v5229_v23, %v5568_v35  ;;  %v2090_v23 = vmul.f32 1.442695, %v2060_v4 }
 0x5f3   :  { %v2072_v60 = vmul.f32 1.442695, %v2051_v61 }
 0x5f4   :  { %v5651_v16 = vpop.permute.xlu1 %2156  ;;  %v2084_v33 = vmul.f32 1.442695, %v2057_v25  ;;  %v5705_v25 = vld [vmem:[#allocation2 + $0x10] sm:$0xff] }
 0x5f5   :  { %v2186_v3 = vsub.f32 %v5523_v0, %v5651_v16  ;;  %v2062_v0 = vmul.f32 1.442695, %v2046_v49  ;;  %v4018_v49 = vld [vmem:[#allocation3 + $0x68] sm:$0xff]  ;;  %7141 = vst [vmem:[#allocation131_spill] sm:$0xff] %v5705_v25 }
 0x5f7   :  { %v3876_v42 = vpop.eup %3875  ;;  %v2214_v1 = vmul.f32 1.442695, %v2186_v3  ;;  %v2068_v3 = vmul.f32 1.442695, %v2049_v2 }
 0x5f8   :  { %v3878_v46 = vpop.eup %3877  ;;  %2256 = vadd.xlane.f32.xlu2 %v3876_v42  ;;  %v2290_v27 = vpack.c.bf16 %v3876_v42, %v3866_v53  ;;  %v5678_v42 = vld [vmem:[#allocation2 + $0x58] sm:$0xff] }
 0x5f9   :  { %3879 = vpow2.f32 %v2214_v1  ;;  %2258 = vadd.xlane.f32.xlu0 %v3878_v46  ;;  %2312 = vmatmul.bf16.gmra.mxu2 %v2288_v62  ;;  %v2291_v7 = vpack.c.bf16 %v3870_v54, %v3878_v46  ;;  %v2048_v1 = vsub.f32 %v5678_v42, %v5544_v40  ;;  %v2047_v54 = vsub.f32 %v5207_v24, %v5548_v45 }
 0x5fa   :  { %3881 = vpow2.f32 %v2216_v18 }
 0x5fb   :  { %3883 = vpow2.f32 %v2062_v0  ;;  %v2066_v46 = vmul.f32 1.442695, %v2048_v1  ;;  %v2064_v62 = vmul.f32 1.442695, %v2047_v54  ;;  %v4022_v1 = vld [vmem:[#allocation3 + $0x48] sm:$0xff] }
 0x5fc   :  { %3885 = vpow2.f32 %v2068_v3 }
 0x5fd   :  { %3887 = vpow2.f32 %v2072_v60  ;;  %v5701_v60 = vld [vmem:[#allocation2 + $0x48] sm:$0xff] }
 0x5fe   :  { %3889 = vpow2.f32 %v2078_v21  ;;  %7140 = vst [vmem:[#allocation130_spill] sm:$0xff] %v5701_v60  ;;  %v2053_v12 = vsub.f32 %v5701_v60, %v5571_v34 }
 0x5ff   :  { %v3880_v30 = vpop.eup %3879  ;;  %3891 = vpow2.f32 %v2084_v33  ;;  %v2056_v33 = vsub.f32 %v5705_v25, %v5580_v63 }
 0x600   :  { %v3882_v14 = vpop.eup %3881  ;;  %2262 = vadd.xlane.f32.xlu2 %v3880_v30  ;;  %3893 = vpow2.f32 %v2066_v46 }
 0x601   :  { %2264 = vadd.xlane.f32.xlu0 %v3882_v14  ;;  %v5661_v18 = vpop.eup %3883  ;;  %v2292_v36 = vpack.c.bf16 %v3882_v14, %v3880_v30  ;;  %3895 = vpow2.f32 %v2090_v23  ;;  %v4017_v30 = vld [vmem:[#allocation3 + $0x10] sm:$0xff]  ;;  %v2082_v54 = vmul.f32 1.442695, %v2056_v33 }
 0x602   :  { %v5666_v59 = vpop.eup %3885  ;;  %3897 = vpow2.f32 %v2064_v62  ;;  %v5709_v23 = vld [vmem:[#allocation2 + $0x70] sm:$0xff]  ;;  %v4024_v62 = vld [vmem:[#allocation3 + $0x38] sm:$0xff] }
 0x603   :  { %v5671_v53 = vpop.eup %3887  ;;  %7142 = vst [vmem:[#allocation132_spill] sm:$0xff] %v5709_v23  ;;  %v2059_v34 = vsub.f32 %v5709_v23, %v5588_v26 }
 0x604   :  { %v5676_v56 = vpop.eup %3889 }
 0x605   :  { %v5686_v35 = vpop.eup %3891 }
 0x606   :  { %v5689_v40 = vpop.eup %3893 }
 0x607   :  { %v2224_v24 = vmul.f32 %v4017_v30, %v5689_v40 }
 0x609   :  { %2317 = vmatmul.bf16.gmra.mxu2 %v2289_v57  ;;  %v5691_v57 = vpop.eup %3895 }
 0x60a   :  { %v3898_v52 = vpop.eup %3897 }
 0x60b   :  { %v2223_v0 = vmul.f32 %v4018_v49, %v3898_v52  ;;  %v2088_v49 = vmul.f32 1.442695, %v2059_v34 }
 0x615   :  { %2166 = vperm.xlu0 %3719, %v2044_v37   ;;  %v5697_v37 = vld [vmem:[#allocation2 + $0x50] sm:$0xff] }
 0x616   :  { %v2050_v2 = vsub.f32 %v5697_v37, %v5562_v8 }
 0x618   :  { %v2070_v61 = vmul.f32 1.442695, %v2050_v2 }
 0x619   :  { %2322 = vmatmul.bf16.gmra.mxu2 %v2290_v27 }
 0x61a   :  { %3899 = vpow2.f32 %v2070_v61 }
 0x61d   :  { %2378 = vperm.xlu0 %3719, %v5661_v18   ;;  %v2239_v34 = vpop.xlane.xlu2 %2238 }
 0x620   :  { %v3900_v21 = vpop.eup %3899 }
 0x621   :  { %v2226_v8 = vmul.f32 %v4022_v1, %v3900_v21 }
 0x625   :  { %2393 = vperm.xlu0 %3719, %v5666_v59  }
 0x629   :  { %2327 = vmatmul.bf16.gmra.mxu2 %v2291_v7  ;;  %v2076_v7 = vmul.f32 1.442695, %v2053_v12  ;;  %v4026_v12 = vld [vmem:[#allocation3 + $0x8] sm:$0xff] }
 0x62b   :  { %3901 = vpow2.f32 %v2076_v7 }
 0x62c   :  { %3903 = vpow2.f32 %v2082_v54  ;;  %v5719_v54 = vmax.f32 %v5211_v31, %v5603_v28  ;;  %v5727_v28 = vld [vmem:[#allocation2 + $0x20] sm:$0xff] }
 0x62d   :  { %2403 = vperm.xlu0 %3719, %v5671_v53   ;;  %3905 = vpow2.f32 %v2088_v49  ;;  %7143 = vst [vmem:[#allocation133_spill] sm:$0xff] %v5727_v28 }
 0x631   :  { %v3902_v46 = vpop.eup %3901 }
 0x632   :  { %v2229_v30 = vmul.f32 %v4024_v62, %v3902_v46  ;;  %v3904_v63 = vpop.eup %3903  ;;  %v5722_v62 = vld [vmem:[#allocation2 + $0x8] sm:$0xff] }
 0x633   :  { %v3906_v61 = vpop.eup %3905 }
 0x634   :  { %v2235_v7 = vmul.f32 %v4026_v12, %v3906_v61 }
 0x635   :  { %2418 = vperm.xlu0 %3719, %v5676_v56  }
 0x639   :  { %2332 = vmatmul.bf16.gmra.mxu2 %v2292_v36 }
 0x63a   :  { %v2245_v31 = vpop.xlane.xlu2 %2244 }
 0x63d   :  { %2433 = vperm.xlu0 %3719, %v5686_v35  }
 0x645   :  { %2448 = vperm.xlu0 %3719, %v5691_v57  }
 0x647   :  { %v2243_v45 = vpop.xlane.xlu1 %2242 }
 0x648   :  { %v5695_v14 = vadd.f32 %v2243_v45, %v2224_v24 }
 0x64a   :  { %v2241_v27 = vpop.xlane.xlu0 %2240 }
 0x64b   :  { %v2271_v3 = vadd.f32 %v2241_v27, %v2223_v0  ;;  %v4025_v0 = vld [vmem:[#allocation3 + $0x18] sm:$0xff] }
 0x64c   :  { %v2232_v2 = vmul.f32 %v4025_v0, %v3904_v63 }
 0x64d   :  { %2527 = vperm.xlu0 %3719, %v2271_v3  }
 0x65b   :  { %v2247_v4 = vpop.xlane.xlu0 %2246 }
 0x65c   :  { %v2274_v36 = vadd.f32 %v2247_v4, %v2226_v8 }
 0x65e   :  { %2542 = vperm.xlu0 %3719, %v2274_v36  }
 0x664   :  { %v2253_v24 = vpop.xlane.xlu0 %2252 }
 0x665   :  { %v2277_v45 = vadd.f32 %v2253_v24, %v2229_v30  ;;  %v4028_v30 = vld [vmem:[#allocation3 + $0x28] sm:$0xff] }
 0x666   :  { %v2222_v24 = vmul.f32 %v4028_v30, %v5661_v18  ;;  %v5732_v18 = vld [vmem:[#allocation2 + $0x60] sm:$0xff] }
 0x667   :  { %2557 = vperm.xlu0 %3719, %v2277_v45   ;;  %7144 = vst [vmem:[#allocation134_spill] sm:$0xff] %v5732_v18 }
 0x668   :  { %v2270_v45 = vadd.f32 %v2239_v34, %v2222_v24 }
 0x66c   :  { %v2259_v27 = vpop.xlane.xlu0 %2258 }
 0x66d   :  { %v2280_v3 = vadd.f32 %v2259_v27, %v2232_v2  ;;  %v2251_v2 = vpop.xlane.xlu2 %2250  ;;  %v2058_v27 = vsub.f32 %v5732_v18, %v5591_v58 }
 0x66f   :  { %2572 = vperm.xlu0 %3719, %v2280_v3   ;;  %v4032_v3 = vld [vmem:[#allocation3 + $0x70] sm:$0xff] }
 0x674   :  { %v2265_v33 = vpop.xlane.xlu0 %2264 }
 0x675   :  { %v2283_v1 = vadd.f32 %v2265_v33, %v2235_v7  ;;  %v2086_v7 = vmul.f32 1.442695, %v2058_v27  ;;  %v2257_v33 = vpop.xlane.xlu2 %2256 }
 0x677   :  { %2587 = vperm.xlu0 %3719, %v2283_v1  }
 0x67d   :  { %v2263_v34 = vpop.xlane.xlu2 %2262 }
 0x687   :  { %v5713_v26 = vpop.permute.xlu0 %2166 }
 0x688   :  { %v2188_v8 = vsub.f32 %v5515_v9, %v5713_v26  ;;  %v2052_v9 = vsub.f32 %v5722_v62, %v5574_v11 }
 0x68a   :  { %v2218_v4 = vmul.f32 1.442695, %v2188_v8  ;;  %v2074_v49 = vmul.f32 1.442695, %v2052_v9  ;;  %v4034_v9 = vld [vmem:[#allocation3] sm:$0xff] }
 0x68c   :  { %3907 = vpow2.f32 %v2218_v4 }
 0x68d   :  { %3909 = vpow2.f32 %v2074_v49 }
 0x692   :  { %v3908_v36 = vpop.eup %3907 }
 0x693   :  { %2266 = vadd.xlane.f32.xlu1 %v3908_v36  ;;  %v3910_v11 = vpop.eup %3909 }
 0x6ac   :  { %2171 = vperm.xlu1 %3720, %v5719_v54  }
 0x6b4   :  { %2383 = vperm.xlu1 %3720, %v3898_v52   ;;  %v2055_v52 = vsub.f32 %v5727_v28, %v5583_v48 }
 0x6b6   :  { %v2080_v0 = vmul.f32 1.442695, %v2055_v52 }
 0x6b8   :  { %3911 = vpow2.f32 %v2080_v0 }
 0x6b9   :  { %3913 = vpow2.f32 %v2086_v7  ;;  %v4038_v7 = vld [vmem:[#allocation3 + $0x58] sm:$0xff] }
 0x6bc   :  { %2398 = vperm.xlu1 %3720, %v3900_v21   ;;  %v4030_v21 = vld [vmem:[#allocation3 + $0x40] sm:$0xff] }
 0x6be   :  { %v3912_v48 = vpop.eup %3911 }
 0x6bf   :  { %v3914_v4 = vpop.eup %3913 }
 0x6c0   :  { %v2234_v30 = vmul.f32 %v4034_v9, %v3914_v4 }
 0x6c2   :  { %v2282_v24 = vadd.f32 %v2263_v34, %v2234_v30  ;;  %v7157_v30 = vld [vmem:[#allocation99_spill] sm:$0xff] }
 0x6c4   :  { %2413 = vperm.xlu1 %3720, %v3902_v46   ;;  %v2225_v46 = vmul.f32 %v4030_v21, %v5666_v59  ;;  %v4033_v59 = vld [vmem:[#allocation3 + $0x78] sm:$0xff] }
 0x6c5   :  { %v2231_v1 = vmul.f32 %v4033_v59, %v3912_v48  ;;  %v4040_v59 = vld [vmem:[#allocation3 + $0x50] sm:$0xff] }
 0x6c7   :  { %v2279_v8 = vadd.f32 %v2257_v33, %v2231_v1 }
 0x6cc   :  { %2428 = vperm.xlu1 %3720, %v3904_v63   ;;  %v2273_v63 = vadd.f32 %v2245_v31, %v2225_v46 }
 0x6d4   :  { %2443 = vperm.xlu1 %3720, %v3906_v61   ;;  %v2228_v61 = vmul.f32 %v4032_v3, %v3910_v11  ;;  %v4104_v3 = vmov 3  }
 0x6d5   :  { %3721 = vset.pattern.permute.xlu0 %v4104_v3 }
 0x6d6   :  { %v2276_v12 = vadd.f32 %v2251_v2, %v2228_v61  ;;  %v5741_v2 = vld [vmem:[#allocation2 + $0x28] sm:$0xff]  ;;  %2633 = vperm.xlu0 %3721, %v5265_v15   ;;  %v4037_v15 = vld [vmem:[#allocation3 + $0x20] sm:$0xff] }
 0x6d7   :  { %7145 = vst [vmem:[#allocation135_spill] sm:$0xff] %v5741_v2  ;;  %v2061_v27 = vsub.f32 %v5741_v2, %v5719_v54  ;;  %v2230_v61 = vmul.f32 %v4037_v15, %v5676_v56 }
 0x6dc   :  { %2522 = vperm.xlu1 %3720, %v2270_v45   ;;  %v2249_v45 = vpop.xlane.xlu1 %2248 }
 0x6de   :  { %2653 = vperm.xlu0 %3721, %v5274_v43   ;;  %v5753_v43 = vpop.permute.xlu0 %2378 }
 0x6df   :  { %7146 = vst [vmem:[#allocation136_spill] sm:$0xff] %v5753_v43 }
 0x6e4   :  { %2537 = vperm.xlu1 %3720, %v2273_v63   ;;  %v2255_v58 = vpop.xlane.xlu1 %2254 }
 0x6e6   :  { %2665 = vperm.xlu0 %3721, %v5280_v22   ;;  %v2233_v22 = vmul.f32 %v4038_v7, %v5686_v35 }
 0x6ec   :  { %2552 = vperm.xlu1 %3720, %v2276_v12   ;;  %v2261_v49 = vpop.xlane.xlu1 %2260  ;;  %v2278_v12 = vadd.f32 %v2255_v58, %v2230_v61  ;;  %v7162_v58 = vld [vmem:[#allocation104_spill] sm:$0xff] }
 0x6ee   :  { %2677 = vperm.xlu0 %3721, %v5287_v39   ;;  %v5756_v39 = vpop.permute.xlu0 %2393 }
 0x6ef   :  { %7147 = vst [vmem:[#allocation137_spill] sm:$0xff] %v5756_v39  ;;  %v7213_v39 = vld [vmem:[#allocation75_spill] sm:$0xff] }
 0x6f4   :  { %2567 = vperm.xlu1 %3720, %v2279_v8  }
 0x6f6   :  { %2689 = vperm.xlu0 %3721, %v5295_v10   ;;  %v5759_v10 = vpop.permute.xlu0 %2403 }
 0x6f7   :  { %7148 = vst [vmem:[#allocation138_spill] sm:$0xff] %v5759_v10 }
 0x6fc   :  { %2582 = vperm.xlu1 %3720, %v2282_v24  }
 0x6fe   :  { %v5762_v56 = vpop.permute.xlu0 %2418 }
 0x6ff   :  { %7149 = vst [vmem:[#allocation139_spill] sm:$0xff] %v5762_v56  ;;  %v5975_v56 = vld [vmem:[#allocation2 + $0x38] sm:$0xff] }
 0x700   :  { %7204 = vst [vmem:[#allocation18_spill] sm:$0xff] %v5975_v56 }
 0x706   :  { %v2267_v31 = vpop.xlane.xlu1 %2266 }
 0x71e   :  { %v5736_v52 = vpop.permute.xlu1 %2171 }
 0x71f   :  { %v2189_v21 = vsub.f32 %v5535_v51, %v5736_v52  ;;  %v2092_v51 = vmul.f32 1.442695, %v2061_v27 }
 0x721   :  { %v2220_v46 = vmul.f32 1.442695, %v2189_v21 }
 0x723   :  { %3915 = vpow2.f32 %v2220_v46 }
 0x724   :  { %3917 = vpow2.f32 %v2092_v51 }
 0x729   :  { %v3916_v63 = vpop.eup %3915 }
 0x72a   :  { %2268 = vadd.xlane.f32.xlu2 %v3916_v63  ;;  %v2293_v0 = vpack.c.bf16 %v3916_v63, %v3908_v36  ;;  %v3918_v36 = vpop.eup %3917 }
 0x72b   :  { %v2237_v35 = vmul.f32 %v4040_v59, %v3918_v36 }
 0x72c   :  { %2337 = vmatmul.bf16.gmra.mxu2 %v2293_v0 }
 0x742   :  { %2388 = vperm.xlu2 %3718, %v5689_v40   ;;  %v4036_v40 = vld [vmem:[#allocation3 + $0x30] sm:$0xff] }
 0x743   :  { %v2227_v54 = vmul.f32 %v4036_v40, %v5671_v53 }
 0x74a   :  { %2408 = vperm.xlu2 %3718, %v3910_v11   ;;  %v2275_v11 = vadd.f32 %v2249_v45, %v2227_v54 }
 0x752   :  { %2423 = vperm.xlu2 %3718, %v3912_v48   ;;  %v4039_v48 = vld [vmem:[#allocation3 + $0x60] sm:$0xff] }
 0x753   :  { %v2236_v53 = vmul.f32 %v4039_v48, %v5691_v57  ;;  %v7179_v48 = vld [vmem:[#allocation8_spill] sm:$0xff] }
 0x754   :  { %vm7180_vm14 = vcmp.gt.f32.partialorder %v7179_v48, 0.0 }
 0x755   :  { %v2284_v33 = vadd.f32 %v2267_v31, %v2236_v53  ;;  %v7166_v31 = vld [vmem:[#allocation107_spill] sm:$0xff] }
 0x75a   :  { %2438 = vperm.xlu2 %3718, %v3914_v4   ;;  %v5765_v4 = vpop.permute.xlu0 %2433 }
 0x75b   :  { %7150 = vst [vmem:[#allocation140_spill] sm:$0xff] %v5765_v4 }
 0x762   :  { %2453 = vperm.xlu2 %3718, %v3918_v36   ;;  %v7174_v36 = vld [vmem:[#allocation116_spill] sm:$0xff] }
 0x763   :  { %v5815_v40 = vperm.slane %v7174_v36, 3 }
 0x76a   :  { %2532 = vperm.xlu2 %3718, %v5695_v14   ;;  %v2281_v14 = vadd.f32 %v2261_v49, %v2233_v22 }
 0x772   :  { %2547 = vperm.xlu2 %3718, %v2275_v11  }
 0x77a   :  { %2562 = vperm.xlu2 %3718, %v2278_v12  }
 0x782   :  { %2577 = vperm.xlu2 %3718, %v2281_v14  }
 0x78a   :  { %2592 = vperm.xlu2 %3718, %v2284_v33  }
 0x792   :  { %3722 = vset.pattern.permute.xlu2 %v4104_v3 }
 0x793   :  { %2637 = vperm.xlu2 %3722, %v5313_v41   ;;  %v5772_v41 = vpop.permute.xlu0 %2448 }
 0x794   :  { %7152 = vst [vmem:[#allocation142_spill] sm:$0xff] %v5772_v41 }
 0x79b   :  { %2645 = vperm.xlu2 %3722, %v5323_v29   ;;  %v5776_v29 = vpop.permute.xlu1 %2383  ;;  %v5780_v9 = vpop.permute.xlu0 %2527 }
 0x79c   :  { %7154 = vst [vmem:[#allocation144_spill] sm:$0xff] %v5776_v29 }
 0x79d   :  { %v2269_v1 = vpop.xlane.xlu2 %2268  ;;  %7155 = vst [vmem:[#allocation145_spill] sm:$0xff] %v5780_v9 }
 0x79e   :  { %v2285_v8 = vadd.f32 %v2269_v1, %v2237_v35 }
 0x7a0   :  { %2597 = vperm.xlu1 %3720, %v2285_v8  }
 0x7a3   :  { %2657 = vperm.xlu2 %3722, %v5334_v20   ;;  %v5785_v24 = vpop.permute.xlu1 %2398 }
 0x7a4   :  { %7158 = vst [vmem:[#allocation99_spill] sm:$0xff] %v5785_v24 }
 0x7a5   :  { %v5768_v57 = vpop.permute.xlu2 %2388 }
 0x7a6   :  { %7151 = vst [vmem:[#allocation141_spill] sm:$0xff] %v5768_v57  ;;  %v5989_v57 = vld [vmem:[#allocation2 + $0x78] sm:$0xff] }
 0x7a7   :  { %7208 = vst [vmem:[#allocation9_spill] sm:$0xff] %v5989_v57 }
 0x7a8   :  { %3723 = vset.pattern.permute.xlu1 %v4104_v3 }
 0x7a9   :  { %2641 = vperm.xlu1 %3723, %v5342_v19   ;;  %v7159_v19 = vld [vmem:[#allocation100_spill] sm:$0xff] }
 0x7ab   :  { %2669 = vperm.xlu2 %3722, %v5350_v32   ;;  %v5788_v32 = vpop.permute.xlu0 %2542  ;;  %v5793_v49 = vpop.permute.xlu1 %2413 }
 0x7ac   :  { %7160 = vst [vmem:[#allocation100_spill] sm:$0xff] %v5788_v32 }
 0x7ad   :  { %v5774_v34 = vpop.permute.xlu2 %2408  ;;  %7163 = vst [vmem:[#allocation104_spill] sm:$0xff] %v5793_v49 }
 0x7ae   :  { %7153 = vst [vmem:[#allocation143_spill] sm:$0xff] %v5774_v34 }
 0x7b1   :  { %2649 = vperm.xlu1 %3723, %v5356_v47  }
 0x7b3   :  { %2681 = vperm.xlu2 %3722, %v5364_v17   ;;  %v5797_v17 = vpop.permute.xlu0 %2557  ;;  %v5802_v46 = vpop.permute.xlu1 %2428 }
 0x7b4   :  { %7165 = vst [vmem:[#allocation149_spill] sm:$0xff] %v5797_v17 }
 0x7b5   :  { %v5782_v20 = vpop.permute.xlu2 %2423  ;;  %7168 = vst [vmem:[#allocation150_spill] sm:$0xff] %v5802_v46 }
 0x7b6   :  { %7156 = vst [vmem:[#allocation146_spill] sm:$0xff] %v5782_v20 }
 0x7b9   :  { %2661 = vperm.xlu1 %3723, %v7157_v30  }
 0x7bb   :  { %2693 = vperm.xlu2 %3722, %v7159_v19   ;;  %v5804_v63 = vpop.permute.xlu0 %2572  ;;  %v5808_v27 = vpop.permute.xlu1 %2443 }
 0x7bc   :  { %7169 = vst [vmem:[#allocation151_spill] sm:$0xff] %v5804_v63 }
 0x7bd   :  { %v5790_v45 = vpop.permute.xlu2 %2438  ;;  %7171 = vst [vmem:[#allocation153_spill] sm:$0xff] %v5808_v27 }
 0x7be   :  { %7161 = vst [vmem:[#allocation147_spill] sm:$0xff] %v5790_v45  ;;  %v5961_v45 = vld [vmem:[#allocation2 + $0x40] sm:$0xff] }
 0x7c1   :  { %2673 = vperm.xlu1 %3723, %v7162_v58  }
 0x7c3   :  { %v5810_v3 = vpop.permute.xlu0 %2587  ;;  %v5817_v54 = vpop.permute.xlu1 %2522 }
 0x7c4   :  { %7172 = vst [vmem:[#allocation154_spill] sm:$0xff] %v5810_v3 }
 0x7c5   :  { %v5795_v47 = vpop.permute.xlu2 %2453  ;;  %7175 = vst [vmem:[#allocation116_spill] sm:$0xff] %v5817_v54 }
 0x7c6   :  { %7164 = vst [vmem:[#allocation148_spill] sm:$0xff] %v5795_v47 }
 0x7c9   :  { %2685 = vperm.xlu1 %3723, %v7166_v31  }
 0x7cb   :  { %v2634_v11 = vpop.permute.xlu0 %2633  ;;  %v5822_v7 = vpop.permute.xlu1 %2537 }
 0x7cc   :  { %v2697_v61 = vadd.f32 %v5815_v40, %v2634_v11  ;;  %7177 = vst [vmem:[#allocation157_spill] sm:$0xff] %v5822_v7 }
 0x7cd   :  { %v5800_v21 = vpop.permute.xlu2 %2532 }
 0x7ce   :  { %7167 = vst [vmem:[#allocation107_spill] sm:$0xff] %v5800_v21  ;;  %v2729_v12 = vmul.f32 0.2, %v2697_v61  ;;  %vm2713_vm1 = vcmp.gt.f32.partialorder %v2697_v61, 0.0 }
 0x7d0   :  { %v2745_v14 = vsel %vm2713_vm1, %v2697_v61, %v2729_v12 }
 0x7d1   :  { %v5828_v53 = vsel %vm7180_vm14, %v2745_v14, -1e+09 }
 0x7d3   :  { %v5831_v59 = vpop.permute.xlu1 %2552 }
 0x7d4   :  { %7181 = vst [vmem:[#allocation8_spill] sm:$0xff] %v5831_v59 }
 0x7d5   :  { %v5806_v0 = vpop.permute.xlu2 %2547 }
 0x7d6   :  { %7170 = vst [vmem:[#allocation152_spill] sm:$0xff] %v5806_v0  ;;  %v5951_v0 = vld [vmem:[#allocation2 + $0x68] sm:$0xff] }
 0x7db   :  { %v5840_v36 = vpop.permute.xlu1 %2567 }
 0x7dc   :  { %7183 = vst [vmem:[#allocation10_spill] sm:$0xff] %v5840_v36 }
 0x7dd   :  { %v5812_v51 = vpop.permute.xlu2 %2562 }
 0x7de   :  { %7173 = vst [vmem:[#allocation155_spill] sm:$0xff] %v5812_v51 }
 0x7e5   :  { %v5819_v15 = vpop.permute.xlu2 %2577 }
 0x7e6   :  { %7176 = vst [vmem:[#allocation156_spill] sm:$0xff] %v5819_v15 }
 0x7ed   :  { %v5824_v22 = vpop.permute.xlu2 %2592 }
 0x7ee   :  { %7178 = vst [vmem:[#allocation158_spill] sm:$0xff] %v5824_v22 }
 0x7f3   :  { %2777 = vmax.xlane.f32.xlu1 %v5828_v53 }
 0x7f5   :  { %v2638_v33 = vpop.permute.xlu2 %2637 }
 0x7f6   :  { %v2698_v35 = vadd.f32 %v5815_v40, %v2638_v33 }
 0x7f8   :  { %v2730_v1 = vmul.f32 0.2, %v2698_v35  ;;  %vm2714_vm8 = vcmp.gt.f32.partialorder %v2698_v35, 0.0 }
 0x7fa   :  { %v2746_v8 = vsel %vm2714_vm8, %v2698_v35, %v2730_v1  ;;  %v5848_v1 = vpop.permute.xlu1 %2582 }
 0x7fb   :  { %v5836_v19 = vsel %vm134_vm6, %v2746_v8, -1e+09  ;;  %7185 = vst [vmem:[#allocation11_spill] sm:$0xff] %v5848_v1 }
 0x7fc   :  { %2779 = vmax.xlane.f32.xlu0 %v5836_v19 }
 0x7fd   :  { %v2646_v58 = vpop.permute.xlu2 %2645 }
 0x7fe   :  { %v2700_v31 = vadd.f32 %v5815_v40, %v2646_v58 }
 0x800   :  { %v2732_v11 = vmul.f32 0.2, %v2700_v31  ;;  %vm2716_vm4 = vcmp.gt.f32.partialorder %v2700_v31, 0.0 }
 0x802   :  { %v2748_v61 = vsel %vm2716_vm4, %v2700_v31, %v2732_v11 }
 0x803   :  { %v5844_v14 = vsel %vm136_vm9, %v2748_v61, -1e+09 }
 0x804   :  { %2783 = vmax.xlane.f32.xlu1 %v5844_v14 }
 0x805   :  { %v2658_v48 = vpop.permute.xlu2 %2657 }
 0x806   :  { %v2703_v33 = vadd.f32 %v5815_v40, %v2658_v48 }
 0x808   :  { %v2735_v35 = vmul.f32 0.2, %v2703_v33  ;;  %vm2719_vm6 = vcmp.gt.f32.partialorder %v2703_v33, 0.0 }
 0x80a   :  { %v2751_v8 = vsel %vm2719_vm6, %v2703_v33, %v2735_v35  ;;  %v2654_v33 = vpop.permute.xlu0 %2653 }
 0x80b   :  { %v5852_v58 = vsel %vm139_vm10, %v2751_v8, -1e+09 }
 0x80c   :  { %2789 = vmax.xlane.f32.xlu1 %v5852_v58 }
 0x80d   :  { %v2670_v31 = vpop.permute.xlu2 %2669 }
 0x80e   :  { %v2706_v11 = vadd.f32 %v5815_v40, %v2670_v31 }
 0x810   :  { %v2738_v61 = vmul.f32 0.2, %v2706_v11  ;;  %vm2722_vm9 = vcmp.gt.f32.partialorder %v2706_v11, 0.0 }
 0x812   :  { %v5856_v12 = vpop.permute.xlu1 %2597  ;;  %v2754_v3 = vsel %vm2722_vm9, %v2706_v11, %v2738_v61  ;;  %v2702_v61 = vadd.f32 %v5815_v40, %v2654_v33 }
 0x813   :  { %7187 = vst [vmem:[#allocation12_spill] sm:$0xff] %v5856_v12  ;;  %v5860_v36 = vsel %vm142_vm2, %v2754_v3, -1e+09 }
 0x814   :  { %2795 = vmax.xlane.f32.xlu1 %v5860_v36 }
 0x815   :  { %v2682_v35 = vpop.permute.xlu2 %2681 }
 0x816   :  { %v2709_v8 = vadd.f32 %v5815_v40, %v2682_v35  ;;  %v2666_v35 = vpop.permute.xlu0 %2665 }
 0x818   :  { %v2741_v30 = vmul.f32 0.2, %v2709_v8  ;;  %vm2725_vm10 = vcmp.gt.f32.partialorder %v2709_v8, 0.0 }
 0x81a   :  { %v2757_v1 = vsel %vm2725_vm10, %v2709_v8, %v2741_v30 }
 0x81b   :  { %v2642_v63 = vpop.permute.xlu1 %2641  ;;  %v5866_v59 = vsel %vm145_vm13, %v2757_v1, -1e+09  ;;  %v2734_v1 = vmul.f32 0.2, %v2702_v61  ;;  %vm2718_vm13 = vcmp.gt.f32.partialorder %v2702_v61, 0.0 }
 0x81c   :  { %v2699_v11 = vadd.f32 %v5815_v40, %v2642_v63  ;;  %2801 = vmax.xlane.f32.xlu1 %v5866_v59 }
 0x81d   :  { %v2694_v3 = vpop.permute.xlu2 %2693  ;;  %v2750_v8 = vsel %vm2718_vm13, %v2702_v61, %v2734_v1 }
 0x81e   :  { %v2731_v48 = vmul.f32 0.2, %v2699_v11  ;;  %v2712_v12 = vadd.f32 %v5815_v40, %v2694_v3  ;;  %vm2715_vm2 = vcmp.gt.f32.partialorder %v2699_v11, 0.0  ;;  %v2678_v47 = vpop.permute.xlu0 %2677 }
 0x820   :  { %v2744_v17 = vmul.f32 0.2, %v2712_v12  ;;  %v2747_v22 = vsel %vm2715_vm2, %v2699_v11, %v2731_v48  ;;  %vm2728_vm1 = vcmp.gt.f32.partialorder %v2712_v12, 0.0  ;;  %v2705_v11 = vadd.f32 %v5815_v40, %v2666_v35 }
 0x821   :  { %v5874_v30 = vsel %vm135_vm0, %v2747_v22, -1e+09  ;;  %v2708_v35 = vadd.f32 %v5815_v40, %v2678_v47 }
 0x822   :  { %2781 = vmax.xlane.f32.xlu2 %v5874_v30  ;;  %v2760_v63 = vsel %vm2728_vm1, %v2712_v12, %v2744_v17  ;;  %v5886_v17 = vsel %vm138_vm15, %v2750_v8, -1e+09 }
 0x823   :  { %v2650_v31 = vpop.permute.xlu1 %2649  ;;  %v5879_v33 = vsel %vm148_vm7, %v2760_v63, -1e+09  ;;  %v2737_v63 = vmul.f32 0.2, %v2705_v11  ;;  %vm2721_vm7 = vcmp.gt.f32.partialorder %v2705_v11, 0.0 }
 0x824   :  { %v2701_v3 = vadd.f32 %v5815_v40, %v2650_v31  ;;  %2807 = vmax.xlane.f32.xlu1 %v5879_v33  ;;  %v2740_v41 = vmul.f32 0.2, %v2708_v35 }
 0x826   :  { %v2733_v48 = vmul.f32 0.2, %v2701_v3  ;;  %vm2717_vm0 = vcmp.gt.f32.partialorder %v2701_v3, 0.0 }
 0x828   :  { %v2749_v22 = vsel %vm2717_vm0, %v2701_v3, %v2733_v48  ;;  %v2753_v3 = vsel %vm2721_vm7, %v2705_v11, %v2737_v63  ;;  %v7198_v48 = vld [vmem:[#allocation16_spill] sm:$0xff] }
 0x829   :  { %v5890_v32 = vsel %vm137_vm5, %v2749_v22, -1e+09  ;;  %v5898_v8 = vsel %vm141_vm12, %v2753_v3, -1e+09  ;;  %vm2724_vm5 = vcmp.gt.f32.partialorder %v2708_v35, 0.0  ;;  %v7196_v3 = vld [vmem:[#allocation20_spill] sm:$0xff] }
 0x82a   :  { %2787 = vmax.xlane.f32.xlu2 %v5886_v17  ;;  %2785 = vmax.xlane.f32.xlu0 %v5890_v32  ;;  %vm7197_vm12 = vcmp.gt.f32.partialorder %v7196_v3, 0.0  ;;  %v7201_v3 = vld [vmem:[#allocation19_spill] sm:$0xff] }
 0x82b   :  { %v2662_v31 = vpop.permute.xlu1 %2661  ;;  %vm7202_vm6 = vcmp.gt.f32.partialorder %v7201_v3, 0.0 }
 0x82c   :  { %v2704_v61 = vadd.f32 %v5815_v40, %v2662_v31  ;;  %v2690_v31 = vpop.permute.xlu0 %2689 }
 0x82d   :  { %v2711_v11 = vadd.f32 %v5815_v40, %v2690_v31 }
 0x82e   :  { %v2736_v1 = vmul.f32 0.2, %v2704_v61  ;;  %vm2720_vm14 = vcmp.gt.f32.partialorder %v2704_v61, 0.0 }
 0x82f   :  { %v2743_v7 = vmul.f32 0.2, %v2711_v11  ;;  %vm2727_vm8 = vcmp.gt.f32.partialorder %v2711_v11, 0.0 }
 0x830   :  { %v2752_v15 = vsel %vm2720_vm14, %v2704_v61, %v2736_v1  ;;  %v2756_v61 = vsel %vm2724_vm5, %v2708_v35, %v2740_v41 }
 0x831   :  { %v5902_v12 = vsel %vm140_vm11, %v2752_v15, -1e+09  ;;  %v5910_v15 = vsel %vm7197_vm12, %v2756_v61, -1e+09  ;;  %vm7199_vm11 = vcmp.gt.f32.partialorder %v7198_v48, 0.0  ;;  %v2759_v35 = vsel %vm2727_vm8, %v2711_v11, %v2743_v7  ;;  %v5929_v7 = vld [vmem:[#allocation2 + $0x30] sm:$0xff] }
 0x832   :  { %2793 = vmax.xlane.f32.xlu2 %v5898_v8  ;;  %2791 = vmax.xlane.f32.xlu0 %v5902_v12  ;;  %v5921_v61 = vsel %vm147_vm3, %v2759_v35, -1e+09  ;;  %v4105_v48 = vmov 96  }
 0x833   :  { %v2674_v51 = vpop.permute.xlu1 %2673  ;;  %3724 = vset.pattern.permute.xlu0 %v4105_v48  ;;  %3725 = vset.pattern.permute.xlu2 %v4105_v48 }
 0x834   :  { %v2707_v47 = vadd.f32 %v5815_v40, %v2674_v51  ;;  %3726 = vset.pattern.permute.xlu1 %v4105_v48 }
 0x836   :  { %v2739_v63 = vmul.f32 0.2, %v2707_v47  ;;  %vm2723_vm15 = vcmp.gt.f32.partialorder %v2707_v47, 0.0 }
 0x838   :  { %v2755_v1 = vsel %vm2723_vm15, %v2707_v47, %v2739_v63 }
 0x839   :  { %v5914_v22 = vsel %vm7199_vm11, %v2755_v1, -1e+09 }
 0x83a   :  { %2799 = vmax.xlane.f32.xlu2 %v5910_v15  ;;  %2797 = vmax.xlane.f32.xlu0 %v5914_v22 }
 0x83b   :  { %v2686_v51 = vpop.permute.xlu1 %2685 }
 0x83c   :  { %v2710_v31 = vadd.f32 %v5815_v40, %v2686_v51 }
 0x83e   :  { %v2742_v41 = vmul.f32 0.2, %v2710_v31  ;;  %vm2726_vm4 = vcmp.gt.f32.partialorder %v2710_v31, 0.0 }
 0x840   :  { %v2758_v47 = vsel %vm2726_vm4, %v2710_v31, %v2742_v41  ;;  %v5935_v31 = vld [vmem:[#allocation2] sm:$0xff] }
 0x841   :  { %v5925_v1 = vsel %vm7202_vm6, %v2758_v47, -1e+09  ;;  %v5941_v47 = vld [vmem:[#allocation2 + $0x18] sm:$0xff] }
 0x842   :  { %2805 = vmax.xlane.f32.xlu2 %v5921_v61  ;;  %2803 = vmax.xlane.f32.xlu0 %v5925_v1 }
 0x866   :  { %v2778_v40 = vpop.xlane.xlu1 %2777 }
 0x867   :  { %v5932_v11 = vmax.f32 %v5929_v7, %v2778_v40 }
 0x869   :  { %2875 = vperm.xlu0 %3724, %v5932_v11  }
 0x86f   :  { %v2780_v51 = vpop.xlane.xlu0 %2779 }
 0x870   :  { %v5938_v41 = vmax.f32 %v5935_v31, %v2780_v51 }
 0x872   :  { %2880 = vperm.xlu2 %3725, %v5938_v41  }
 0x877   :  { %v2784_v35 = vpop.xlane.xlu1 %2783 }
 0x878   :  { %v5944_v63 = vmax.f32 %v5941_v47, %v2784_v35 }
 0x87a   :  { %2890 = vperm.xlu2 %3725, %v5944_v63  }
 0x87f   :  { %v2790_v51 = vpop.xlane.xlu1 %2789 }
 0x887   :  { %v2796_v46 = vpop.xlane.xlu1 %2795 }
 0x88f   :  { %v2802_v20 = vpop.xlane.xlu1 %2801 }
 0x895   :  { %v2782_v3 = vpop.xlane.xlu2 %2781 }
 0x896   :  { %v5948_v48 = vmax.f32 %v5678_v42, %v2782_v3 }
 0x897   :  { %v2808_v34 = vpop.xlane.xlu1 %2807 }
 0x898   :  { %2885 = vperm.xlu1 %3726, %v5948_v48   ;;  %v6004_v29 = vmax.f32 %v5741_v2, %v2808_v34 }
 0x89a   :  { %7212 = vst [vmem:[#allocation16_spill] sm:$0xff] %v6004_v29 }
 0x89d   :  { %v2788_v40 = vpop.xlane.xlu2 %2787  ;;  %v2786_v27 = vpop.xlane.xlu0 %2785 }
 0x89e   :  { %v5954_v54 = vmax.f32 %v5951_v0, %v2788_v40  ;;  %v5957_v9 = vmax.f32 %v5697_v37, %v2786_v27  ;;  %v5970_v40 = vmax.f32 %v5722_v62, %v2790_v51  ;;  %v5984_v51 = vmax.f32 %v5727_v28, %v2796_v46  ;;  %v7217_v28 = vld [vmem:[#allocation125_spill] sm:$0xff] }
 0x89f   :  { %v5998_v46 = vmax.f32 %v5732_v18, %v2802_v20 }
 0x8a0   :  { %2895 = vperm.xlu1 %3726, %v5957_v9   ;;  %2900 = vperm.xlu2 %3725, %v5954_v54   ;;  %7207 = vst [vmem:[#allocation14_spill] sm:$0xff] %v5984_v51 }
 0x8a1   :  { %7211 = vst [vmem:[#allocation20_spill] sm:$0xff] %v5998_v46 }
 0x8a5   :  { %v2794_v35 = vpop.xlane.xlu2 %2793  ;;  %v2792_v3 = vpop.xlane.xlu0 %2791 }
 0x8a6   :  { %v5964_v21 = vmax.f32 %v5961_v45, %v2794_v35  ;;  %v5967_v4 = vmax.f32 %v5701_v60, %v2792_v3 }
 0x8a8   :  { %7203 = vst [vmem:[#allocation15_spill] sm:$0xff] %v5967_v4  ;;  %2910 = vperm.xlu0 %3724, %v5967_v4   ;;  %2915 = vperm.xlu2 %3725, %v5964_v21  }
 0x8a9   :  { %2905 = vperm.xlu1 %3726, %v5970_v40  }
 0x8ad   :  { %v2800_v27 = vpop.xlane.xlu2 %2799  ;;  %v2798_v49 = vpop.xlane.xlu0 %2797 }
 0x8ae   :  { %v5978_v35 = vmax.f32 %v5975_v56, %v2800_v27  ;;  %v5981_v3 = vmax.f32 %v5705_v25, %v2798_v49  ;;  %v7215_v25 = vld [vmem:[#allocation83_spill] sm:$0xff] }
 0x8b0   :  { %7205 = vst [vmem:[#allocation7_spill] sm:$0xff] %v5978_v35  ;;  %2925 = vperm.xlu0 %3724, %v5981_v3   ;;  %2930 = vperm.xlu2 %3725, %v5978_v35  }
 0x8b1   :  { %7206 = vst [vmem:[#allocation21_spill] sm:$0xff] %v5981_v3  ;;  %2920 = vperm.xlu1 %3726, %v5984_v51  }
 0x8b5   :  { %v2806_v24 = vpop.xlane.xlu2 %2805  ;;  %v2804_v10 = vpop.xlane.xlu0 %2803 }
 0x8b6   :  { %v5992_v27 = vmax.f32 %v5989_v57, %v2806_v24  ;;  %v5995_v49 = vmax.f32 %v5709_v23, %v2804_v10  ;;  %v182_v10 = vld [vmem:[%s6800_s6] sm:$0xf] }
 0x8b7   :  { %v6010_v24 = vperm.slane %v182_v10, 1  ;;  %v6012_v20 = vperm.slane %v182_v10, 0  ;;  %v6016_v23 = vperm.slane %v182_v10, 2  ;;  %v6022_v2 = vperm.slane %v182_v10, 3 }
 0x8b8   :  { %7209 = vst [vmem:[#allocation17_spill] sm:$0xff] %v5992_v27  ;;  %2940 = vperm.xlu0 %3724, %v5995_v49   ;;  %2945 = vperm.xlu2 %3725, %v5992_v27  }
 0x8b9   :  { %7210 = vst [vmem:[#allocation13_spill] sm:$0xff] %v5995_v49  ;;  %2935 = vperm.xlu1 %3726, %v5998_v46   ;;  %v1710_v43 = vmul.f32 %v6010_v24, %v7213_v39  ;;  %v7214_v49 = vld [vmem:[#allocation45_spill] sm:$0xff]  ;;  %v2489_v34 = vmul.f32 %v6016_v23, %v5613_v44  ;;  %v1712_v3 = vmul.f32 %v6010_v24, %v7215_v25  ;;  %v7216_v39 = vld [vmem:[#allocation55_spill] sm:$0xff] }
 0x8ba   :  { %v931_v57 = vmul.f32 %v6012_v20, %v7214_v49  ;;  %v933_v35 = vmul.f32 %v6012_v20, %v7216_v39  ;;  %v2491_v49 = vmul.f32 %v6016_v23, %v7217_v28  ;;  %v7220_v39 = vld [vmem:[#allocation124_spill] sm:$0xff] }
 0x8bb   :  { %v2488_v4 = vmul.f32 %v6016_v23, %v7220_v39 }
 0x8bc   :  { %v1728_v10 = vadd.f32 %v1712_v3, %v933_v35 }
 0x8c1   :  { %2950 = vperm.xlu1 %3726, %v6004_v29   ;;  %v1726_v29 = vadd.f32 %v1710_v43, %v931_v57  ;;  %v2507_v43 = vadd.f32 %v2491_v49, %v1728_v10 }
 0x8c3   :  { %v2505_v18 = vadd.f32 %v2489_v34, %v1726_v29  ;;  %v7218_v29 = vld [vmem:[#allocation82_spill] sm:$0xff] }
 0x8c4   :  { %v1709_v34 = vmul.f32 %v6010_v24, %v7218_v29 }
 0x8cc   :  { %v2881_v27 = vpop.permute.xlu2 %2880 }
 0x8cd   :  { %v3268_v46 = vmul.f32 %v6022_v2, %v2881_v27  ;;  %v2954_v44 = vsub.f32 %v5836_v19, %v2881_v27 }
 0x8cf   :  { %v3284_v56 = vadd.f32 %v3268_v46, %v2505_v18  ;;  %v2971_v60 = vmul.f32 1.442695, %v2954_v44  ;;  %v7219_v18 = vld [vmem:[#allocation51_spill] sm:$0xff] }
 0x8d0   :  { %v930_v46 = vmul.f32 %v6012_v20, %v7219_v18 }
 0x8d1   :  { %3412 = vst [vmem:[#allocation2] sm:$0xff] %v3284_v56  ;;  %3919 = vpow2.f32 %v2971_v60 }
 0x8d2   :  { %v1725_v28 = vadd.f32 %v1709_v34, %v930_v46  ;;  %v7222_v34 = vld [vmem:[#allocation50_spill] sm:$0xff] }
 0x8d4   :  { %v2891_v51 = vpop.permute.xlu2 %2890  ;;  %v2504_v19 = vadd.f32 %v2488_v4, %v1725_v28  ;;  %v7221_v4 = vld [vmem:[#allocation84_spill] sm:$0xff]  ;;  %v7223_v28 = vld [vmem:[#allocation87_spill] sm:$0xff] }
 0x8d5   :  { %v3270_v57 = vmul.f32 %v6022_v2, %v2891_v51  ;;  %v2956_v44 = vsub.f32 %v5844_v14, %v2891_v51  ;;  %v2493_v14 = vmul.f32 %v6016_v23, %v5611_v38 }
 0x8d7   :  { %v3286_v25 = vadd.f32 %v3270_v57, %v2507_v43  ;;  %v3920_v10 = vpop.eup %3919  ;;  %v2975_v43 = vmul.f32 1.442695, %v2956_v44 }
 0x8d9   :  { %3414 = vst [vmem:[#allocation2 + $0x18] sm:$0xff] %v3286_v25  ;;  %v935_v25 = vmul.f32 %v6012_v20, %v7222_v34  ;;  %v7227_v34 = vld [vmem:[#allocation49_spill] sm:$0xff] }
 0x8db   :  { %v2876_v56 = vpop.permute.xlu0 %2875 }
 0x8dc   :  { %v2953_v35 = vsub.f32 %v5828_v53, %v2876_v56  ;;  %v3267_v3 = vmul.f32 %v6022_v2, %v2876_v56  ;;  %v1714_v53 = vmul.f32 %v6010_v24, %v7221_v4  ;;  %v1717_v56 = vmul.f32 %v6010_v24, %v7223_v28 }
 0x8de   :  { %v2969_v27 = vmul.f32 1.442695, %v2953_v35  ;;  %v3283_v49 = vadd.f32 %v3267_v3, %v2504_v19  ;;  %v1730_v51 = vadd.f32 %v1714_v53, %v935_v25  ;;  %v7224_v35 = vld [vmem:[#allocation54_spill] sm:$0xff]  ;;  %v932_v25 = vmul.f32 %v6012_v20, %v7227_v34  ;;  %v7231_v34 = vld [vmem:[#allocation47_spill] sm:$0xff] }
 0x8df   :  { %v938_v3 = vmul.f32 %v6012_v20, %v7224_v35 }
 0x8e0   :  { %3921 = vpow2.f32 %v2969_v27  ;;  %3411 = vst [vmem:[#allocation2 + $0x30] sm:$0xff] %v3283_v49  ;;  %v2509_v46 = vadd.f32 %v2493_v14, %v1730_v51  ;;  %v2496_v27 = vmul.f32 %v6016_v23, %v5621_v50  ;;  %v7228_v14 = vld [vmem:[#allocation126_spill] sm:$0xff]  ;;  %v7229_v51 = vld [vmem:[#allocation57_spill] sm:$0xff] }
 0x8e1   :  { %3019 = vadd.xlane.f32.xlu2 %v3920_v10  ;;  %3923 = vpow2.f32 %v2975_v43  ;;  %v1733_v49 = vadd.f32 %v1717_v56, %v938_v3  ;;  %v7225_v43 = vld [vmem:[#allocation85_spill] sm:$0xff]  ;;  %v2490_v50 = vmul.f32 %v6016_v23, %v7228_v14 }
 0x8e3   :  { %v2512_v38 = vadd.f32 %v2496_v27, %v1733_v49 }
 0x8e6   :  { %v3922_v57 = vpop.eup %3921 }
 0x8e7   :  { %3017 = vadd.xlane.f32.xlu0 %v3922_v57  ;;  %v3065_v29 = vpack.c.bf16 %v3920_v10, %v3922_v57  ;;  %v6042_v60 = vpop.eup %3923  ;;  %v1711_v57 = vmul.f32 %v6010_v24, %v7225_v43  ;;  %v7230_v43 = vld [vmem:[#allocation78_spill] sm:$0xff] }
 0x8e9   :  { %3081 = vmatmul.bf16.vlgmr.msra.gmra.mxu3 %v3065_v29  ;;  %v7226_v29 = vld [vmem:[#allocation48_spill] sm:$0xff]  ;;  %v1727_v28 = vadd.f32 %v1711_v57, %v932_v25  ;;  %v7232_v25 = vld [vmem:[#allocation53_spill] sm:$0xff] }
 0x8ea   :  { %v1720_v4 = vmul.f32 %v6010_v24, %v7226_v29  ;;  %v1713_v29 = vmul.f32 %v6010_v24, %v7230_v43  ;;  %v934_v14 = vmul.f32 %v6012_v20, %v7232_v25  ;;  %v7235_v25 = vld [vmem:[#allocation86_spill] sm:$0xff] }
 0x8ef   :  { %3023 = vadd.xlane.f32.xlu0 %v6042_v60 }
 0x8fa   :  { %v2901_v18 = vpop.permute.xlu2 %2900 }
 0x8fb   :  { %v3272_v39 = vmul.f32 %v6022_v2, %v2901_v18 }
 0x8fd   :  { %v3288_v19 = vadd.f32 %v3272_v39, %v2509_v46  ;;  %v941_v46 = vmul.f32 %v6012_v20, %v7229_v51  ;;  %v2499_v39 = vmul.f32 %v6016_v23, %v5631_v55  ;;  %v1723_v55 = vmul.f32 %v6010_v24, %v7231_v34 }
 0x8ff   :  { %3416 = vst [vmem:[#allocation2 + $0x68] sm:$0xff] %v3288_v19  ;;  %v1736_v56 = vadd.f32 %v1720_v4, %v941_v46  ;;  %v2506_v19 = vadd.f32 %v2490_v50, %v1727_v28  ;;  %v7233_v50 = vld [vmem:[#allocation60_spill] sm:$0xff]  ;;  %v7234_v46 = vld [vmem:[#allocation127_spill] sm:$0xff]  ;;  %v2958_v28 = vsub.f32 %v5886_v17, %v2901_v18  ;;  %v1716_v17 = vmul.f32 %v6010_v24, %v7235_v25 }
 0x900   :  { %v944_v51 = vmul.f32 %v6012_v20, %v7233_v50  ;;  %v7237_v50 = vld [vmem:[#allocation56_spill] sm:$0xff] }
 0x901   :  { %v2515_v27 = vadd.f32 %v2499_v39, %v1736_v56  ;;  %v2502_v39 = vmul.f32 %v6016_v23, %v5713_v26  ;;  %v1729_v56 = vadd.f32 %v1713_v29, %v934_v14  ;;  %v7240_v25 = vld [vmem:[#allocation88_spill] sm:$0xff] }
 0x902   :  { %v6058_v10 = vpop.permute.xlu2 %2915 }
 0x903   :  { %v3275_v44 = vmul.f32 %v6022_v2, %v6058_v10  ;;  %v2961_v14 = vsub.f32 %v5898_v8, %v6058_v10 }
 0x905   :  { %v3291_v53 = vadd.f32 %v3275_v44, %v2512_v38 }
 0x907   :  { %3419 = vst [vmem:[#allocation2 + $0x40] sm:$0xff] %v3291_v53 }
 0x90a   :  { %v6074_v35 = vpop.permute.xlu2 %2930  ;;  %v2886_v3 = vpop.permute.xlu1 %2885 }
 0x90b   :  { %v3278_v49 = vmul.f32 %v6022_v2, %v6074_v35  ;;  %v2955_v38 = vsub.f32 %v5874_v30, %v2886_v3  ;;  %v3269_v44 = vmul.f32 %v6022_v2, %v2886_v3  ;;  %v2492_v30 = vmul.f32 %v6016_v23, %v7234_v46 }
 0x90c   :  { %v1739_v3 = vadd.f32 %v1723_v55, %v944_v51  ;;  %v937_v51 = vmul.f32 %v6012_v20, %v7237_v50  ;;  %v7242_v50 = vld [vmem:[#allocation59_spill] sm:$0xff] }
 0x90d   :  { %v3294_v57 = vadd.f32 %v3278_v49, %v2515_v27  ;;  %v2973_v4 = vmul.f32 1.442695, %v2955_v38  ;;  %v3285_v53 = vadd.f32 %v3269_v44, %v2506_v19  ;;  %v2508_v19 = vadd.f32 %v2492_v30, %v1729_v56  ;;  %v7238_v30 = vld [vmem:[#allocation58_spill] sm:$0xff] }
 0x90e   :  { %v2518_v27 = vadd.f32 %v2502_v39, %v1739_v3  ;;  %v2979_v44 = vmul.f32 1.442695, %v2958_v28  ;;  %v936_v39 = vmul.f32 %v6012_v20, %v7238_v30  ;;  %v7239_v28 = vld [vmem:[#allocation128_spill] sm:$0xff]  ;;  %v1732_v8 = vadd.f32 %v1716_v17, %v937_v51  ;;  %v7241_v17 = vld [vmem:[#allocation89_spill] sm:$0xff] }
 0x90f   :  { %3422 = vst [vmem:[#allocation2 + $0x38] sm:$0xff] %v3294_v57  ;;  %3925 = vpow2.f32 %v2973_v4  ;;  %v7236_v4 = vld [vmem:[#allocation44_spill] sm:$0xff]  ;;  %v2494_v56 = vmul.f32 %v6016_v23, %v7239_v28  ;;  %v2985_v3 = vmul.f32 1.442695, %v2961_v14  ;;  %v2498_v51 = vmul.f32 %v6016_v23, %v5637_v6  ;;  %v7244_v30 = vld [vmem:[#allocation129_spill] sm:$0xff] }
 0x910   :  { %3413 = vst [vmem:[#allocation2 + $0x58] sm:$0xff] %v3285_v53  ;;  %v1715_v53 = vmul.f32 %v6010_v24, %v7236_v4  ;;  %3927 = vpow2.f32 %v2979_v44 }
 0x912   :  { %v6093_v49 = vpop.permute.xlu2 %2945  ;;  %v2896_v38 = vpop.permute.xlu1 %2895  ;;  %v1731_v10 = vadd.f32 %v1715_v53, %v936_v39  ;;  %v2497_v39 = vmul.f32 %v6016_v23, %v7244_v30 }
 0x913   :  { %v3281_v43 = vmul.f32 %v6022_v2, %v6093_v49  ;;  %v2957_v34 = vsub.f32 %v5890_v32, %v2896_v38  ;;  %v3271_v26 = vmul.f32 %v6022_v2, %v2896_v38  ;;  %v2495_v32 = vmul.f32 %v6016_v23, %v5619_v5 }
 0x915   :  { %v3297_v18 = vadd.f32 %v3281_v43, %v2518_v27  ;;  %v2977_v29 = vmul.f32 1.442695, %v2957_v34  ;;  %v3287_v55 = vadd.f32 %v3271_v26, %v2508_v19  ;;  %v3926_v57 = vpop.eup %3925  ;;  %v2511_v27 = vadd.f32 %v2495_v32, %v1732_v8  ;;  %v7243_v32 = vld [vmem:[#allocation61_spill] sm:$0xff] }
 0x916   :  { %3021 = vadd.xlane.f32.xlu1 %v3926_v57  ;;  %v3066_v46 = vpack.c.bf16 %v6042_v60, %v3926_v57  ;;  %v2510_v60 = vadd.f32 %v2494_v56, %v1731_v10  ;;  %v3928_v26 = vpop.eup %3927 }
 0x917   :  { %3425 = vst [vmem:[#allocation2 + $0x78] sm:$0xff] %v3297_v18  ;;  %3929 = vpow2.f32 %v2977_v29  ;;  %v1718_v18 = vmul.f32 %v6010_v24, %v7240_v25  ;;  %v1719_v29 = vmul.f32 %v6010_v24, %v7241_v17 }
 0x918   :  { %3415 = vst [vmem:[#allocation2 + $0x50] sm:$0xff] %v3287_v55  ;;  %3086 = vmatmul.bf16.gmra.mxu3 %v3066_v46  ;;  %3931 = vpow2.f32 %v2985_v3  ;;  %v939_v46 = vmul.f32 %v6012_v20, %v7243_v32 }
 0x91a   :  { %v2911_v19 = vpop.permute.xlu0 %2910 }
 0x91b   :  { %v2960_v5 = vsub.f32 %v5902_v12, %v2911_v19  ;;  %v3274_v38 = vmul.f32 %v6022_v2, %v2911_v19  ;;  %v2906_v44 = vpop.permute.xlu1 %2905  ;;  %v2964_v12 = vsub.f32 %v5910_v15, %v6074_v35  ;;  %v1734_v35 = vadd.f32 %v1718_v18, %v939_v46  ;;  %v7247_v18 = vld [vmem:[#allocation46_spill] sm:$0xff] }
 0x91c   :  { %v2959_v43 = vsub.f32 %v5852_v58, %v2906_v44  ;;  %v3273_v34 = vmul.f32 %v6022_v2, %v2906_v44  ;;  %v940_v58 = vmul.f32 %v6012_v20, %v7242_v50  ;;  %v7248_v50 = vld [vmem:[#allocation63_spill] sm:$0xff] }
 0x91d   :  { %v2983_v55 = vmul.f32 1.442695, %v2960_v5  ;;  %v3290_v57 = vadd.f32 %v3274_v38, %v2511_v27  ;;  %v3930_v4 = vpop.eup %3929  ;;  %v2991_v28 = vmul.f32 1.442695, %v2964_v12  ;;  %v7245_v27 = vld [vmem:[#allocation62_spill] sm:$0xff]  ;;  %v2513_v38 = vadd.f32 %v2497_v39, %v1734_v35 }
 0x91e   :  { %v2981_v53 = vmul.f32 1.442695, %v2959_v43  ;;  %v3289_v14 = vadd.f32 %v3273_v34, %v2510_v60  ;;  %3027 = vadd.xlane.f32.xlu1 %v3928_v26  ;;  %3025 = vadd.xlane.f32.xlu2 %v3930_v4  ;;  %v1735_v15 = vadd.f32 %v1719_v29, %v940_v58  ;;  %v6134_v19 = vpop.eup %3931  ;;  %v943_v5 = vmul.f32 %v6012_v20, %v7245_v27  ;;  %v7246_v34 = vld [vmem:[#allocation90_spill] sm:$0xff] }
 0x91f   :  { %3933 = vpow2.f32 %v2983_v55  ;;  %3418 = vst [vmem:[#allocation2 + $0x48] sm:$0xff] %v3290_v57  ;;  %v1721_v25 = vmul.f32 %v6010_v24, %v7246_v34  ;;  %v2967_v57 = vsub.f32 %v5921_v61, %v6093_v49  ;;  %v942_v58 = vmul.f32 %v6012_v20, %v7248_v50 }
 0x920   :  { %3935 = vpow2.f32 %v2981_v53  ;;  %3417 = vst [vmem:[#allocation2 + $0x8] sm:$0xff] %v3289_v14  ;;  %v2514_v8 = vadd.f32 %v2498_v51, %v1735_v15  ;;  %v3067_v14 = vpack.c.bf16 %v3928_v26, %v3930_v4  ;;  %v2500_v51 = vmul.f32 %v6016_v23, %v5651_v16 }
 0x921   :  { %3937 = vpow2.f32 %v2991_v28  ;;  %v1737_v49 = vadd.f32 %v1721_v25, %v942_v58  ;;  %v2828_v58 = vsub.f32 %v5941_v47, %v5944_v63  ;;  %v2831_v47 = vsub.f32 %v5722_v62, %v5970_v40 }
 0x922   :  { %v2926_v56 = vpop.permute.xlu0 %2925 }
 0x923   :  { %v2963_v10 = vsub.f32 %v5914_v22, %v2926_v56  ;;  %v3277_v6 = vmul.f32 %v6022_v2, %v2926_v56  ;;  %v2921_v3 = vpop.permute.xlu1 %2920  ;;  %v1722_v22 = vmul.f32 %v6010_v24, %v7247_v18  ;;  %v2516_v15 = vadd.f32 %v2500_v51, %v1737_v49 }
 0x924   :  { %v2962_v44 = vsub.f32 %v5860_v36, %v2921_v3  ;;  %v3276_v60 = vmul.f32 %v6022_v2, %v2921_v3  ;;  %v2501_v36 = vmul.f32 %v6016_v23, %v5647_v13  ;;  %v2997_v13 = vmul.f32 1.442695, %v2967_v57 }
 0x925   :  { %v6140_v43 = vpop.eup %3933  ;;  %v2989_v17 = vmul.f32 1.442695, %v2963_v10  ;;  %v3293_v29 = vadd.f32 %v3277_v6, %v2514_v8  ;;  %v1738_v61 = vadd.f32 %v1722_v22, %v943_v5  ;;  %v7249_v6 = vld [vmem:[#allocation52_spill] sm:$0xff] }
 0x926   :  { %v3936_v55 = vpop.eup %3935  ;;  %v2987_v12 = vmul.f32 1.442695, %v2962_v44  ;;  %v3292_v53 = vadd.f32 %v3276_v60, %v2513_v38  ;;  %3033 = vadd.xlane.f32.xlu1 %v6134_v19  ;;  %3031 = vadd.xlane.f32.xlu2 %v6140_v43  ;;  %v1724_v3 = vmul.f32 %v6010_v24, %v7249_v6  ;;  %v2503_v38 = vmul.f32 %v6016_v23, %v5736_v52 }
 0x927   :  { %3939 = vpow2.f32 %v2989_v17  ;;  %3421 = vst [vmem:[#allocation2 + $0x10] sm:$0xff] %v3293_v29  ;;  %3029 = vadd.xlane.f32.xlu0 %v3936_v55  ;;  %v2517_v46 = vadd.f32 %v2501_v36, %v1738_v61  ;;  %v6158_v4 = vpop.eup %3937  ;;  %v3068_v52 = vpack.c.bf16 %v6140_v43, %v3936_v55  ;;  %v2826_v36 = vsub.f32 %v5935_v31, %v5938_v41 }
 0x928   :  { %3941 = vpow2.f32 %v2987_v12  ;;  %3420 = vst [vmem:[#allocation2 + $0x20] sm:$0xff] %v3292_v53  ;;  %3091 = vmatmul.bf16.gmra.mxu3 %v3067_v14  ;;  %v2825_v53 = vsub.f32 %v5929_v7, %v5932_v11  ;;  %v2827_v43 = vsub.f32 %v5678_v42, %v5948_v48  ;;  %v2830_v7 = vsub.f32 %v5951_v0, %v5954_v54  ;;  %v7251_v48 = vld [vmem:[#allocation15_spill] sm:$0xff] }
 0x929   :  { %3943 = vpow2.f32 %v2997_v13  ;;  %v2843_v50 = vmul.f32 1.442695, %v2826_v36  ;;  %v2847_v11 = vmul.f32 1.442695, %v2828_v58  ;;  %v2829_v41 = vsub.f32 %v5697_v37, %v5957_v9  ;;  %v6253_v36 = vpop.f32.mrf.mxu1 }
 0x92a   :  { %v2941_v32 = vpop.permute.xlu0 %2940  ;;  %v2841_v14 = vmul.f32 1.442695, %v2825_v53  ;;  %v2845_v51 = vmul.f32 1.442695, %v2827_v43  ;;  %v2851_v31 = vmul.f32 1.442695, %v2830_v7  ;;  %v2833_v54 = vsub.f32 %v5961_v45, %v5964_v21 }
 0x92b   :  { %v2966_v30 = vsub.f32 %v5925_v1, %v2941_v32  ;;  %v3280_v39 = vmul.f32 %v6022_v2, %v2941_v32  ;;  %v2936_v26 = vpop.permute.xlu1 %2935  ;;  %v2849_v0 = vmul.f32 1.442695, %v2829_v41  ;;  %v2853_v37 = vmul.f32 1.442695, %v2831_v47  ;;  %v7253_v45 = vld [vmem:[#allocation14_spill] sm:$0xff]  ;;  %v7254_v21 = vld [vmem:[#allocation133_spill] sm:$0xff] }
 0x92c   :  { %v2965_v35 = vsub.f32 %v5866_v59, %v2936_v26  ;;  %v3279_v16 = vmul.f32 %v6022_v2, %v2936_v26  ;;  %v7250_v59 = vld [vmem:[#allocation64_spill] sm:$0xff]  ;;  %v2857_v9 = vmul.f32 1.442695, %v2833_v54  ;;  %v2834_v32 = vsub.f32 %v7254_v21, %v7253_v45 }
 0x92d   :  { %v6162_v28 = vpop.eup %3939  ;;  %v2995_v56 = vmul.f32 1.442695, %v2966_v30  ;;  %v3296_v8 = vadd.f32 %v3280_v39, %v2517_v46  ;;  %v945_v5 = vmul.f32 %v6012_v20, %v7250_v59  ;;  %v7255_v30 = vld [vmem:[#allocation7_spill] sm:$0xff]  ;;  %v7256_v39 = vld [vmem:[#allocation18_spill] sm:$0xff]  ;;  %v7265_v43 = vld [vmem:[#allocation16_spill] sm:$0xff] }
 0x92e   :  { %v3942_v10 = vpop.eup %3941  ;;  %v2993_v1 = vmul.f32 1.442695, %v2965_v35  ;;  %v3295_v27 = vadd.f32 %v3279_v16, %v2516_v15  ;;  %3039 = vadd.xlane.f32.xlu1 %v6158_v4  ;;  %3037 = vadd.xlane.f32.xlu2 %v6162_v28  ;;  %v3070_v40 = vpack.c.bf16 %v6158_v4, %v6162_v28  ;;  %v2836_v26 = vsub.f32 %v7256_v39, %v7255_v30  ;;  %v7257_v4 = vld [vmem:[#allocation21_spill] sm:$0xff]  ;;  %v7258_v28 = vld [vmem:[#allocation131_spill] sm:$0xff]  ;;  %v4049_v21 = vld [vmem:[#allocation3 + $0x28] sm:$0xff] }
 0x92f   :  { %3945 = vpow2.f32 %v2995_v56  ;;  %3424 = vst [vmem:[#allocation2 + $0x70] sm:$0xff] %v3296_v8  ;;  %3035 = vadd.xlane.f32.xlu0 %v3942_v10  ;;  %v1740_v44 = vadd.f32 %v1724_v3, %v945_v5  ;;  %v6172_v34 = vpop.eup %3943  ;;  %v3069_v55 = vpack.c.bf16 %v3942_v10, %v6134_v19  ;;  %v7252_v19 = vld [vmem:[#allocation130_spill] sm:$0xff]  ;;  %v2859_v35 = vmul.f32 1.442695, %v2834_v32  ;;  %v6234_v10 = vpop.f32.mrf.mxu0  ;;  %v7259_v3 = vld [vmem:[#allocation20_spill] sm:$0xff]  ;;  %v7261_v5 = vld [vmem:[#allocation17_spill] sm:$0xff] }
 0x930   :  { %3947 = vpow2.f32 %v2993_v1  ;;  %3423 = vst [vmem:[#allocation2 + $0x60] sm:$0xff] %v3295_v27  ;;  %v2832_v49 = vsub.f32 %v7252_v19, %v7251_v48  ;;  %v2863_v16 = vmul.f32 1.442695, %v2836_v26  ;;  %v2835_v56 = vsub.f32 %v7258_v28, %v7257_v4  ;;  %v7260_v1 = vld [vmem:[#allocation134_spill] sm:$0xff]  ;;  %v4051_v28 = vld [vmem:[#allocation3 + $0x10] sm:$0xff] }
 0x931   :  { %v2519_v25 = vadd.f32 %v2503_v38, %v1740_v44  ;;  %v2837_v27 = vsub.f32 %v7260_v1, %v7259_v3  ;;  %v7262_v38 = vld [vmem:[#allocation9_spill] sm:$0xff]  ;;  %v6274_v41 = vpop.f32.mrf.mxu1 }
 0x932   :  { %v2855_v46 = vmul.f32 1.442695, %v2832_v49  ;;  %v2861_v59 = vmul.f32 1.442695, %v2835_v56  ;;  %v2839_v44 = vsub.f32 %v7262_v38, %v7261_v5  ;;  %v4052_v38 = vld [vmem:[#allocation3 + $0x48] sm:$0xff] }
 0x933   :  { %v2951_v60 = vpop.permute.xlu1 %2950 }
 0x934   :  { %v2968_v18 = vsub.f32 %v5879_v33, %v2951_v60  ;;  %v3282_v22 = vmul.f32 %v6022_v2, %v2951_v60 }
 0x935   :  { %v6176_v17 = vpop.eup %3945 }
 0x936   :  { %v6178_v29 = vpop.eup %3947  ;;  %v2999_v57 = vmul.f32 1.442695, %v2968_v18  ;;  %v3298_v12 = vadd.f32 %v3282_v22, %v2519_v25  ;;  %3045 = vadd.xlane.f32.xlu1 %v6172_v34  ;;  %3043 = vadd.xlane.f32.xlu2 %v6176_v17  ;;  %v2865_v25 = vmul.f32 1.442695, %v2837_v27  ;;  %v2869_v18 = vmul.f32 1.442695, %v2839_v44 }
 0x937   :  { %3041 = vadd.xlane.f32.xlu0 %v6178_v29  ;;  %v7263_v22 = vld [vmem:[#allocation13_spill] sm:$0xff] }
 0x938   :  { %3949 = vpow2.f32 %v2999_v57  ;;  %3426 = vst [vmem:[#allocation2 + $0x28] sm:$0xff] %v3298_v12  ;;  %3096 = vmatmul.bf16.gmra.mxu3 %v3068_v52  ;;  %v7264_v57 = vld [vmem:[#allocation132_spill] sm:$0xff] }
 0x939   :  { %3951 = vpow2.f32 %v2841_v14  ;;  %v2838_v12 = vsub.f32 %v7264_v57, %v7263_v22  ;;  %v3071_v14 = vpack.c.bf16 %v6176_v17, %v6178_v29  ;;  %v6290_v30 = vpop.f32.mrf.mxu1 }
 0x93a   :  { %3953 = vpow2.f32 %v2843_v50  ;;  %v6258_v50 = vpop.f32.mrf.mxu0 }
 0x93b   :  { %3955 = vpow2.f32 %v2845_v51  ;;  %v6263_v51 = vpop.f32.mrf.mxu2  ;;  %v2867_v7 = vmul.f32 1.442695, %v2838_v12 }
 0x93c   :  { %3957 = vpow2.f32 %v2847_v11 }
 0x93d   :  { %3959 = vpow2.f32 %v2851_v31 }
 0x93e   :  { %v6184_v33 = vpop.eup %3949  ;;  %3961 = vpow2.f32 %v2849_v0 }
 0x93f   :  { %3047 = vadd.xlane.f32.xlu0 %v6184_v33  ;;  %v6200_v61 = vpop.eup %3951  ;;  %3963 = vpow2.f32 %v2853_v37  ;;  %v3072_v45 = vpack.c.bf16 %v6184_v33, %v6172_v34 }
 0x940   :  { %v6202_v42 = vpop.eup %3953  ;;  %3965 = vpow2.f32 %v2857_v9  ;;  %v4048_v9 = vld [vmem:[#allocation3 + $0x68] sm:$0xff]  ;;  %v3001_v32 = vmul.f32 %v4049_v21, %v6200_v61 }
 0x941   :  { %v6210_v63 = vpop.eup %3955  ;;  %3967 = vpow2.f32 %v2855_v46  ;;  %v3002_v48 = vmul.f32 %v4048_v9, %v6202_v42  ;;  %v6297_v34 = vpop.f32.mrf.mxu1 }
 0x942   :  { %v6215_v13 = vpop.eup %3957  ;;  %3969 = vpow2.f32 %v2859_v35  ;;  %v6276_v47 = vpop.f32.mrf.mxu0  ;;  %v4050_v35 = vld [vmem:[#allocation3 + $0x40] sm:$0xff]  ;;  %v3003_v56 = vmul.f32 %v4051_v28, %v6210_v63 }
 0x943   :  { %v6217_v62 = vpop.eup %3959  ;;  %3971 = vpow2.f32 %v2863_v16  ;;  %v6280_v54 = vpop.f32.mrf.mxu2  ;;  %v3004_v16 = vmul.f32 %v4050_v35, %v6215_v13 }
 0x944   :  { %v6227_v15 = vpop.eup %3961  ;;  %3973 = vpow2.f32 %v2861_v59 }
 0x945   :  { %v6232_v8 = vpop.eup %3963  ;;  %3975 = vpow2.f32 %v2865_v25  ;;  %v3005_v44 = vmul.f32 %v4052_v38, %v6227_v15  ;;  %v4053_v25 = vld [vmem:[#allocation3 + $0x30] sm:$0xff] }
 0x946   :  { %v6236_v6 = vpop.eup %3965  ;;  %3977 = vpow2.f32 %v2869_v18  ;;  %v3006_v18 = vmul.f32 %v4053_v25, %v6217_v62 }
 0x947   :  { %v6244_v60 = vpop.eup %3967  ;;  %3979 = vpow2.f32 %v2867_v7  ;;  %v4055_v7 = vld [vmem:[#allocation3 + $0x20] sm:$0xff] }
 0x948   :  { %3101 = vmatmul.bf16.gmra.mxu3 %v3069_v55  ;;  %v6249_v52 = vpop.eup %3969  ;;  %v7266_v55 = vld [vmem:[#allocation135_spill] sm:$0xff] }
 0x949   :  { %v6251_v53 = vpop.eup %3971  ;;  %v2840_v58 = vsub.f32 %v7266_v55, %v7265_v43  ;;  %v6306_v59 = vpop.f32.mrf.mxu1  ;;  %v4054_v55 = vld [vmem:[#allocation3 + $0x38] sm:$0xff] }
 0x94a   :  { %v6265_v11 = vpop.eup %3973 }
 0x94b   :  { %v2871_v31 = vmul.f32 1.442695, %v2840_v58  ;;  %v6268_v17 = vpop.eup %3975  ;;  %v6294_v39 = vpop.f32.mrf.mxu2  ;;  %v3008_v58 = vmul.f32 %v4054_v55, %v6244_v60 }
 0x94c   :  { %v6270_v29 = vpop.eup %3977 }
 0x94d   :  { %3981 = vpow2.f32 %v2871_v31  ;;  %v6278_v0 = vpop.eup %3979  ;;  %v3009_v31 = vmul.f32 %v4055_v7, %v6236_v6 }
 0x94e   :  { %3157 = vperm.xlu2 %3725, %v6200_v61  }
 0x94f   :  { %3162 = vperm.xlu1 %3726, %v6202_v42   ;;  %v6292_v42 = vpop.f32.mrf.mxu0 }
 0x951   :  { %v6316_v43 = vpop.f32.mrf.mxu1 }
 0x953   :  { %3167 = vperm.xlu0 %3724, %v6210_v63   ;;  %v6284_v49 = vpop.eup %3981  ;;  %v6301_v61 = vpop.f32.mrf.mxu2 }
 0x954   :  { %v3020_v37 = vpop.xlane.xlu2 %3019 }
 0x956   :  { %3172 = vperm.xlu2 %3725, %v6215_v13  }
 0x957   :  { %3182 = vperm.xlu1 %3726, %v6217_v62   ;;  %v6299_v33 = vpop.f32.mrf.mxu0 }
 0x958   :  { %3106 = vmatmul.bf16.gmra.mxu3 %v3070_v40  ;;  %v3050_v40 = vadd.f32 %v3020_v37, %v3002_v48  ;;  %v4056_v37 = vld [vmem:[#allocation3 + $0x70] sm:$0xff] }
 0x959   :  { %v3007_v62 = vmul.f32 %v4056_v37, %v6232_v8 }
 0x95a   :  { %v3018_v19 = vpop.xlane.xlu0 %3017 }
 0x95b   :  { %3177 = vperm.xlu0 %3724, %v6227_v15   ;;  %v3049_v46 = vadd.f32 %v3018_v19, %v3001_v32  ;;  %v6310_v13 = vpop.f32.mrf.mxu2 }
 0x95e   :  { %3187 = vperm.xlu2 %3725, %v6232_v8  }
 0x95f   :  { %3197 = vperm.xlu1 %3726, %v6236_v6   ;;  %v6308_v5 = vpop.f32.mrf.mxu0 }
 0x962   :  { %v3024_v26 = vpop.xlane.xlu0 %3023 }
 0x963   :  { %3192 = vperm.xlu0 %3724, %v6244_v60   ;;  %v3052_v4 = vadd.f32 %v3024_v26, %v3004_v16  ;;  %v6323_v21 = vpop.f32.mrf.mxu2  ;;  %v4057_v60 = vld [vmem:[#allocation3 + $0x18] sm:$0xff] }
 0x964   :  { %v3011_v6 = vmul.f32 %v4057_v60, %v6265_v11  ;;  %v4058_v26 = vld [vmem:[#allocation3 + $0x58] sm:$0xff] }
 0x965   :  { %v3012_v8 = vmul.f32 %v4058_v26, %v6251_v53  ;;  %v4059_v16 = vld [vmem:[#allocation3 + $0x78] sm:$0xff]  ;;  %v786_v26 = vmul.f32 %v6012_v20, %v6234_v10  ;;  %v788_v10 = vmul.f32 %v6012_v20, %v6276_v47  ;;  %v7271_v47 = vld [vmem:[#allocation36_spill] sm:$0xff] }
 0x966   :  { %3202 = vperm.xlu2 %3725, %v6249_v52  }
 0x967   :  { %3212 = vperm.xlu1 %3726, %v6251_v53   ;;  %v6321_v48 = vpop.f32.mrf.mxu0  ;;  %v4060_v53 = vld [vmem:[#allocation3 + $0x8] sm:$0xff] }
 0x968   :  { %3111 = vmatmul.bf16.gmra.mxu3 %v3071_v14 }
 0x96b   :  { %3207 = vperm.xlu0 %3724, %v6265_v11   ;;  %v6336_v11 = vpop.f32.mrf.mxu2 }
 0x96c   :  { %v6304_v3 = vpop.f32.mrf.mxu3 }
 0x96e   :  { %3217 = vperm.xlu2 %3725, %v6268_v17  }
 0x96f   :  { %3227 = vperm.xlu1 %3726, %v6270_v29  }
 0x973   :  { %3222 = vperm.xlu0 %3724, %v6278_v0  }
 0x974   :  { %v6314_v14 = vpop.f32.mrf.mxu3 }
 0x976   :  { %3232 = vperm.xlu2 %3725, %v6284_v49  }
 0x977   :  { %3306 = vperm.xlu1 %3726, %v3050_v40  }
 0x978   :  { %3116 = vmatmul.bf16.gmra.mxu3 %v3072_v45 }
 0x97b   :  { %3301 = vperm.xlu0 %3724, %v3049_v46  }
 0x983   :  { %3316 = vperm.xlu0 %3724, %v3052_v4   ;;  %v3010_v4 = vmul.f32 %v4059_v16, %v6249_v52  ;;  %v4061_v52 = vld [vmem:[#allocation3 + $0x60] sm:$0xff] }
 0x989   :  { %v3022_v1 = vpop.xlane.xlu1 %3021 }
 0x98a   :  { %v3051_v27 = vadd.f32 %v3022_v1, %v3003_v56  ;;  %v6330_v56 = vpop.f32.mrf.mxu1 }
 0x98c   :  { %3311 = vperm.xlu2 %3725, %v3051_v27  }
 0x991   :  { %v3026_v22 = vpop.xlane.xlu2 %3025  ;;  %v3028_v57 = vpop.xlane.xlu1 %3027 }
 0x992   :  { %v3053_v63 = vadd.f32 %v3026_v22, %v3005_v44  ;;  %v3054_v12 = vadd.f32 %v3028_v57, %v3006_v18  ;;  %v6334_v18 = vpop.f32.mrf.mxu0  ;;  %v3014_v22 = vmul.f32 %v4060_v53, %v6278_v0  ;;  %v3015_v57 = vmul.f32 %v4061_v52, %v6270_v29  ;;  %v7268_v29 = vld [vmem:[#allocation38_spill] sm:$0xff] }
 0x993   :  { %v898_v0 = vmul.f32 %v7268_v29, %v6012_v20  ;;  %v787_v53 = vmul.f32 %v6012_v20, %v6258_v50  ;;  %v6377_v50 = vmul.f32 %v6012_v20, %v6308_v5  ;;  %v792_v5 = vmul.f32 %v6012_v20, %v6321_v48  ;;  %v7274_v29 = vld [vmem:[#allocation24_spill] sm:$0xff] }
 0x994   :  { %3321 = vperm.xlu1 %3726, %v3053_v63   ;;  %3326 = vperm.xlu2 %3725, %v3054_v12   ;;  %v4062_v12 = vld [vmem:[#allocation3] sm:$0xff]  ;;  %v2347_v48 = vmul.f32 %v6016_v23, %v6301_v61 }
 0x995   :  { %v3013_v55 = vmul.f32 %v4062_v12, %v6268_v17  ;;  %v1565_v17 = vmul.f32 %v6010_v24, %v6253_v36  ;;  %v3123_v36 = vmul.f32 %v6022_v2, %v6304_v3 }
 0x999   :  { %v3032_v15 = vpop.xlane.xlu2 %3031  ;;  %v3034_v9 = vpop.xlane.xlu1 %3033 }
 0x99a   :  { %v3056_v19 = vadd.f32 %v3032_v15, %v3008_v58  ;;  %v3030_v40 = vpop.xlane.xlu0 %3029  ;;  %v3057_v45 = vadd.f32 %v3034_v9, %v3009_v31  ;;  %v7267_v9 = vld [vmem:[#allocation91_spill] sm:$0xff] }
 0x99b   :  { %v3055_v32 = vadd.f32 %v3030_v40, %v3007_v62  ;;  %v6325_v46 = vpop.f32.mrf.mxu3  ;;  %v6345_v40 = vpop.f32.mrf.mxu1 }
 0x99c   :  { %3336 = vperm.xlu1 %3726, %v3056_v19   ;;  %3341 = vperm.xlu2 %3725, %v3057_v45   ;;  %v1677_v19 = vmul.f32 %v7267_v9, %v6010_v24  ;;  %v765_v45 = vpop.f32.mrf.mxu0 }
 0x99d   :  { %3331 = vperm.xlu0 %3724, %v3055_v32   ;;  %v7269_v32 = vld [vmem:[#allocation136_spill] sm:$0xff] }
 0x99e   :  { %v2456_v60 = vmul.f32 %v7269_v32, %v6016_v23  ;;  %v7276_v32 = vld [vmem:[#allocation33_spill] sm:$0xff] }
 0x9a1   :  { %v3038_v35 = vpop.xlane.xlu2 %3037  ;;  %v3040_v28 = vpop.xlane.xlu1 %3039 }
 0x9a2   :  { %v3059_v1 = vadd.f32 %v3038_v35, %v3011_v6  ;;  %v3036_v27 = vpop.xlane.xlu0 %3035  ;;  %v3060_v38 = vadd.f32 %v3040_v28, %v3012_v8  ;;  %v6353_v6 = vpop.f32.mrf.mxu2  ;;  %v1693_v8 = vadd.f32 %v1677_v19, %v898_v0  ;;  %v2344_v35 = vmul.f32 %v6016_v23, %v6263_v51 }
 0x9a3   :  { %v3058_v44 = vadd.f32 %v3036_v27, %v3010_v4  ;;  %v6332_v25 = vpop.f32.mrf.mxu3  ;;  %v4063_v4 = vld [vmem:[#allocation3 + $0x50] sm:$0xff]  ;;  %v904_v0 = vmul.f32 %v7274_v29, %v6012_v20 }
 0x9a4   :  { %3351 = vperm.xlu1 %3726, %v3059_v1   ;;  %3356 = vperm.xlu2 %3725, %v3060_v38   ;;  %v3016_v28 = vmul.f32 %v4063_v4, %v6284_v49  ;;  %v1581_v1 = vadd.f32 %v1565_v17, %v786_v26  ;;  %v2472_v27 = vadd.f32 %v2456_v60, %v1693_v8  ;;  %v7275_v17 = vld [vmem:[#allocation42_spill] sm:$0xff]  ;;  %v7277_v26 = vld [vmem:[#allocation37_spill] sm:$0xff] }
 0x9a5   :  { %3346 = vperm.xlu0 %3724, %v3058_v44   ;;  %v789_v49 = vmul.f32 %v6012_v20, %v6292_v42  ;;  %v7272_v42 = vld [vmem:[#allocation23_spill] sm:$0xff]  ;;  %v6399_v60 = vmul.f32 %v7276_v32, %v6012_v20  ;;  %v6403_v8 = vmul.f32 %v7277_v26, %v6012_v20  ;;  %v3126_v61 = vmul.f32 %v6022_v2, %v6332_v25 }
 0x9a6   :  { %v2360_v3 = vadd.f32 %v2344_v35, %v1581_v1  ;;  %v767_v35 = vpop.f32.mrf.mxu0  ;;  %v1571_v25 = vmul.f32 %v6010_v24, %v6330_v56 }
 0x9a9   :  { %v3044_v63 = vpop.xlane.xlu2 %3043  ;;  %v3046_v58 = vpop.xlane.xlu1 %3045 }
 0x9aa   :  { %v3062_v7 = vadd.f32 %v3044_v63, %v3014_v22  ;;  %v3042_v31 = vpop.xlane.xlu0 %3041  ;;  %v3063_v15 = vadd.f32 %v3046_v58, %v3015_v57  ;;  %v215_v22 = vld [vmem:[#allocation4 + $0x8] sm:$0xff]  ;;  %v7270_v57 = vld [vmem:[#allocation29_spill] sm:$0xff]  ;;  %v901_v58 = vmul.f32 %v7271_v47, %v6012_v20 }
 0x9ab   :  { %v3061_v37 = vadd.f32 %v3042_v31, %v3013_v55  ;;  %v6341_v62 = vpop.f32.mrf.mxu3  ;;  %v1680_v63 = vmul.f32 %v7270_v57, %v6010_v24  ;;  %v790_v55 = vmul.f32 %v6012_v20, %v6299_v33  ;;  %v899_v31 = vmul.f32 %v7272_v42, %v6012_v20 }
 0x9ac   :  { %3366 = vperm.xlu1 %3726, %v3062_v7   ;;  %3371 = vperm.xlu2 %3725, %v3063_v15   ;;  %v1568_v7 = vmul.f32 %v6010_v24, %v6297_v34  ;;  %v6385_v15 = vpop.f32.mrf.mxu1  ;;  %v3139_v33 = vadd.f32 %v3123_v36, %v2360_v3  ;;  %v6395_v34 = vmul.f32 %v7275_v17, %v6012_v20  ;;  %v7283_v17 = vld [vmem:[#allocation144_spill] sm:$0xff] }
 0x9ad   :  { %3361 = vperm.xlu0 %3724, %v3061_v37   ;;  %v7273_v37 = vld [vmem:[#allocation137_spill] sm:$0xff]  ;;  %v1567_v36 = vmul.f32 %v6010_v24, %v6290_v30  ;;  %v6421_v3 = vmul.f32 %v6012_v20, %v765_v45  ;;  %v2457_v32 = vmul.f32 %v7283_v17, %v6016_v23 }
 0x9ae   :  { %v2459_v9 = vmul.f32 %v7273_v37, %v6016_v23 }
 0x9af   :  { %v1583_v29 = vadd.f32 %v1567_v36, %v788_v10  ;;  %v1587_v10 = vadd.f32 %v1571_v25, %v792_v5 }
 0x9b1   :  { %v3158_v16 = vpop.permute.xlu2 %3157 }
 0x9b2   :  { %v3235_v38 = vmul.f32 %v3158_v16, %v6022_v2  ;;  %v3048_v44 = vpop.xlane.xlu0 %3047  ;;  %v1696_v16 = vadd.f32 %v1680_v63, %v901_v58 }
 0x9b3   :  { %v3064_v51 = vadd.f32 %v3048_v44, %v3016_v28  ;;  %v6367_v52 = vpop.f32.mrf.mxu3  ;;  %v7278_v28 = vld [vmem:[#allocation31_spill] sm:$0xff]  ;;  %v6413_v44 = vpop.f32.mrf.mxu2 }
 0x9b4   :  { %v3251_v12 = vadd.f32 %v3235_v38, %v2472_v27  ;;  %v900_v1 = vmul.f32 %v7278_v28, %v6012_v20  ;;  %v1566_v27 = vmul.f32 %v6010_v24, %v6274_v41  ;;  %v1584_v38 = vadd.f32 %v1568_v7, %v789_v49  ;;  %v7279_v41 = vld [vmem:[#allocation26_spill] sm:$0xff] }
 0x9b5   :  { %3376 = vperm.xlu0 %3724, %v3064_v51   ;;  %v1569_v51 = vmul.f32 %v6010_v24, %v6306_v59  ;;  %v2475_v57 = vadd.f32 %v2459_v9, %v1696_v16  ;;  %v902_v30 = vmul.f32 %v7279_v41, %v6012_v20  ;;  %v6426_v49 = vmul.f32 %v6012_v20, %v767_v35  ;;  %v218_v59 = vld [vmem:[#allocation4 + $0x60] sm:$0xff]  ;;  %v7281_v7 = vld [vmem:[#allocation102_spill] sm:$0xff] }
 0x9b6   :  { %v3443_v19 = vmul.f32 %v3251_v12, %v215_v22  ;;  %v7280_v12 = vld [vmem:[#allocation65_spill] sm:$0xff]  ;;  %v1683_v42 = vmul.f32 %v7281_v7, %v6010_v24  ;;  %v2363_v37 = vadd.f32 %v2347_v48, %v1584_v38  ;;  %v7282_v9 = vld [vmem:[#allocation30_spill] sm:$0xff]  ;;  %v7284_v35 = vld [vmem:[#allocation143_spill] sm:$0xff]  ;;  %v1570_v48 = vmul.f32 %v6010_v24, %v6316_v43 }
 0x9b7   :  { %v1678_v47 = vmul.f32 %v7280_v12, %v6010_v24  ;;  %v6440_v26 = vadd.f32 %v1569_v51, %v790_v55  ;;  %v2462_v16 = vmul.f32 %v7284_v35, %v6016_v23  ;;  %v7285_v38 = vld [vmem:[#allocation97_spill] sm:$0xff]  ;;  %v2350_v55 = vmul.f32 %v6016_v23, %v6336_v11 }
 0x9b8   :  { %v3459_v4 = vadd.f32 %v3443_v19, %v3139_v33  ;;  %v6436_v33 = vmul.f32 %v7282_v9, %v6012_v20  ;;  %v1582_v19 = vadd.f32 %v1566_v27, %v787_v53  ;;  %v3142_v56 = vadd.f32 %v3126_v61, %v2363_v37  ;;  %v1546_v27 = vpop.f32.mrf.mxu1  ;;  %v7287_v43 = vld [vmem:[#allocation141_spill] sm:$0xff]  ;;  %v216_v9 = vld [vmem:[#allocation4] sm:$0xff] }
 0x9b9   :  { %v3173_v22 = vpop.permute.xlu2 %3172  ;;  %v1694_v28 = vadd.f32 %v1678_v47, %v899_v31  ;;  %v2345_v53 = vmul.f32 %v6016_v23, %v6280_v54  ;;  %v1699_v36 = vadd.f32 %v1683_v42, %v904_v0  ;;  %v2458_v31 = vmul.f32 %v7287_v43, %v6016_v23 }
 0x9ba   :  { %3475 = vst [vmem:[#allocation4 + $0x8] sm:$0xff] %v3459_v4  ;;  %v3238_v63 = vmul.f32 %v3173_v22, %v6022_v2  ;;  %v1679_v22 = vmul.f32 %v7285_v38, %v6010_v24  ;;  %v3124_v41 = vmul.f32 %v6022_v2, %v6314_v14  ;;  %v2346_v37 = vmul.f32 %v6016_v23, %v6294_v39  ;;  %v221_v14 = vld [vmem:[#allocation4 + $0x10] sm:$0xff] }
 0x9bb   :  { %v3097_v58 = vpop.f32.mrf.mxu3  ;;  %v2478_v54 = vadd.f32 %v2462_v16, %v1699_v36  ;;  %v2361_v42 = vadd.f32 %v2345_v53, %v1582_v19  ;;  %v3125_v19 = vmul.f32 %v6022_v2, %v6325_v46 }
 0x9bc   :  { %v3254_v45 = vadd.f32 %v3238_v63, %v2475_v57  ;;  %v7286_v57 = vld [vmem:[#allocation93_spill] sm:$0xff]  ;;  %v2473_v63 = vadd.f32 %v2457_v32, %v1694_v28  ;;  %v3129_v5 = vmul.f32 %v6022_v2, %v3097_v58  ;;  %v1695_v7 = vadd.f32 %v1679_v22, %v900_v1 }
 0x9bd   :  { %v1681_v61 = vmul.f32 %v7286_v57, %v6010_v24  ;;  %v1586_v58 = vadd.f32 %v1570_v48, %v6377_v50  ;;  %v2366_v32 = vadd.f32 %v2350_v55, %v1587_v10  ;;  %v3140_v1 = vadd.f32 %v3124_v41, %v2361_v42  ;;  %v217_v55 = vld [vmem:[#allocation4 + $0x48] sm:$0xff]  ;;  %v7290_v41 = vld [vmem:[#allocation95_spill] sm:$0xff] }
 0x9be   :  { %v3446_v4 = vmul.f32 %v3254_v45, %v218_v59  ;;  %v7288_v59 = vld [vmem:[#allocation66_spill] sm:$0xff]  ;;  %v6465_v45 = vpop.f32.mrf.mxu2  ;;  %v2474_v28 = vadd.f32 %v2458_v31, %v1695_v7  ;;  %v6477_v50 = vmul.f32 %v6010_v24, %v6345_v40  ;;  %v2362_v10 = vadd.f32 %v2346_v37, %v1583_v29  ;;  %v6482_v31 = vpop.f32.mrf.mxu0  ;;  %v7293_v42 = vld [vmem:[#allocation27_spill] sm:$0xff] }
 0x9bf   :  { %v1682_v25 = vmul.f32 %v7288_v59, %v6010_v24  ;;  %v3145_v38 = vadd.f32 %v3129_v5, %v2366_v32  ;;  %v2349_v57 = vmul.f32 %v6016_v23, %v6323_v21  ;;  %v3128_v21 = vmul.f32 %v6022_v2, %v6367_v52  ;;  %v220_v32 = vld [vmem:[#allocation4 + $0x18] sm:$0xff] }
 0x9c0   :  { %v3462_v51 = vadd.f32 %v3446_v4, %v3142_v56  ;;  %v7289_v56 = vld [vmem:[#allocation138_spill] sm:$0xff]  ;;  %v3141_v5 = vadd.f32 %v3125_v19, %v2362_v10  ;;  %v1574_v7 = vmul.f32 %v6010_v24, %v1546_v27  ;;  %v1685_v37 = vmul.f32 %v7293_v42, %v6010_v24 }
 0x9c1   :  { %v3188_v12 = vpop.permute.xlu2 %3187  ;;  %v3163_v47 = vpop.permute.xlu1 %3162  ;;  %v2461_v4 = vmul.f32 %v7289_v56, %v6016_v23  ;;  %v1698_v48 = vadd.f32 %v1682_v25, %v6395_v34  ;;  %v1573_v25 = vmul.f32 %v6010_v24, %v6385_v15  ;;  %v2348_v52 = vmul.f32 %v6016_v23, %v6310_v13  ;;  %v7295_v15 = vld [vmem:[#allocation139_spill] sm:$0xff] }
 0x9c2   :  { %3478 = vst [vmem:[#allocation4 + $0x60] sm:$0xff] %v3462_v51  ;;  %v3241_v0 = vmul.f32 %v3188_v12, %v6022_v2  ;;  %v3236_v11 = vmul.f32 %v3163_v47, %v6022_v2  ;;  %v1697_v51 = vadd.f32 %v1681_v61, %v902_v30  ;;  %v1684_v12 = vmul.f32 %v7290_v41, %v6010_v24  ;;  %v7291_v30 = vld [vmem:[#allocation105_spill] sm:$0xff]  ;;  %v7292_v47 = vld [vmem:[#allocation99_spill] sm:$0xff]  ;;  %v7296_v41 = vld [vmem:[#allocation104_spill] sm:$0xff] }
 0x9c3   :  { %v6467_v17 = vpop.f32.mrf.mxu3  ;;  %v1686_v61 = vmul.f32 %v7291_v30, %v6010_v24  ;;  %v2477_v40 = vadd.f32 %v2461_v4, %v1698_v48  ;;  %v2460_v34 = vmul.f32 %v7292_v47, %v6016_v23  ;;  %v2464_v27 = vmul.f32 %v7295_v15, %v6016_v23 }
 0x9c4   :  { %v3257_v35 = vadd.f32 %v3241_v0, %v2478_v54  ;;  %v3252_v16 = vadd.f32 %v3236_v11, %v2473_v63  ;;  %v6490_v54 = vpop.f32.mrf.mxu1  ;;  %v2352_v48 = vmul.f32 %v6016_v23, %v6413_v44 }
 0x9c5   :  { %v3168_v39 = vpop.permute.xlu0 %3167  ;;  %v2476_v19 = vadd.f32 %v2460_v34, %v1697_v51  ;;  %v219_v51 = vld [vmem:[#allocation4 + $0x68] sm:$0xff] }
 0x9c6   :  { %v3449_v22 = vmul.f32 %v3257_v35, %v221_v14  ;;  %v3444_v53 = vmul.f32 %v3252_v16, %v216_v9  ;;  %v3237_v36 = vmul.f32 %v3168_v39, %v6022_v2  ;;  %v7294_v14 = vld [vmem:[#allocation146_spill] sm:$0xff]  ;;  %v2365_v16 = vadd.f32 %v2349_v57, %v1586_v58  ;;  %v772_v34 = vpop.f32.mrf.mxu0 }
 0x9c7   :  { %v2465_v9 = vmul.f32 %v7294_v14, %v6016_v23  ;;  %v2353_v57 = vmul.f32 %v6016_v23, %v6465_v45  ;;  %v793_v45 = vmul.f32 %v6012_v20, %v6334_v18 }
 0x9c8   :  { %v3465_v63 = vadd.f32 %v3449_v22, %v3145_v38  ;;  %v3460_v46 = vadd.f32 %v3444_v53, %v3140_v1  ;;  %v3253_v43 = vadd.f32 %v3237_v36, %v2474_v28  ;;  %v1702_v28 = vadd.f32 %v1686_v61, %v6399_v60  ;;  %v6507_v1 = vpop.f32.mrf.mxu2 }
 0x9c9   :  { %v3183_v29 = vpop.permute.xlu1 %3182  ;;  %v3203_v11 = vpop.permute.xlu2 %3202  ;;  %v3127_v22 = vmul.f32 %v6022_v2, %v6341_v62  ;;  %v3144_v53 = vadd.f32 %v3128_v21, %v2365_v16  ;;  %v1589_v36 = vadd.f32 %v1573_v25, %v6421_v3  ;;  %v1701_v60 = vadd.f32 %v1685_v37, %v6403_v8  ;;  %v223_v21 = vld [vmem:[#allocation4 + $0x40] sm:$0xff]  ;;  %v7297_v16 = vld [vmem:[#allocation98_spill] sm:$0xff] }
 0x9ca   :  { %3481 = vst [vmem:[#allocation4 + $0x10] sm:$0xff] %v3465_v63  ;;  %v3445_v0 = vmul.f32 %v3253_v43, %v217_v55  ;;  %v3240_v59 = vmul.f32 %v3183_v29, %v6022_v2  ;;  %v3244_v39 = vmul.f32 %v3203_v11, %v6022_v2  ;;  %v2481_v10 = vadd.f32 %v2465_v9, %v1702_v28  ;;  %v222_v28 = vld [vmem:[#allocation4 + $0x38] sm:$0xff] }
 0x9cb   :  { %3476 = vst [vmem:[#allocation4] sm:$0xff] %v3460_v46  ;;  %v3102_v35 = vpop.f32.mrf.mxu3  ;;  %v2364_v55 = vadd.f32 %v2348_v52, %v6440_v26  ;;  %v1590_v46 = vadd.f32 %v1574_v7, %v6426_v49  ;;  %v2480_v43 = vadd.f32 %v2464_v27, %v1701_v60  ;;  %v2463_v3 = vmul.f32 %v7296_v41, %v6016_v23 }
 0x9cc   :  { %v3461_v56 = vadd.f32 %v3445_v0, %v3141_v5  ;;  %v3256_v4 = vadd.f32 %v3240_v59, %v2477_v40  ;;  %v3260_v30 = vadd.f32 %v3244_v39, %v2481_v10  ;;  %v224_v40 = vld [vmem:[#allocation4 + $0x28] sm:$0xff]  ;;  %v3131_v44 = vmul.f32 %v6022_v2, %v3102_v35  ;;  %v1551_v11 = vpop.f32.mrf.mxu1 }
 0x9cd   :  { %v3178_v38 = vpop.permute.xlu0 %3177  ;;  %v3143_v61 = vadd.f32 %v3127_v22, %v2364_v55  ;;  %v1700_v49 = vadd.f32 %v1684_v12, %v6436_v33  ;;  %v2351_v29 = vmul.f32 %v6016_v23, %v6353_v6  ;;  %v2368_v5 = vadd.f32 %v2352_v48, %v1589_v36  ;;  %v7298_v39 = vld [vmem:[#allocation92_spill] sm:$0xff] }
 0x9ce   :  { %3477 = vst [vmem:[#allocation4 + $0x48] sm:$0xff] %v3461_v56  ;;  %v3448_v13 = vmul.f32 %v3256_v4, %v220_v32  ;;  %v3239_v58 = vmul.f32 %v3178_v38, %v6022_v2  ;;  %v2369_v59 = vadd.f32 %v2353_v57, %v1590_v46  ;;  %v1588_v14 = vadd.f32 %v6477_v50, %v793_v45  ;;  %v7301_v10 = vld [vmem:[#allocation28_spill] sm:$0xff]  ;;  %v775_v41 = vpop.f32.mrf.mxu0 }
 0x9cf   :  { %v2479_v18 = vadd.f32 %v2463_v3, %v1700_v49  ;;  %v3130_v33 = vmul.f32 %v6022_v2, %v6467_v17  ;;  %v3452_v12 = vmul.f32 %v3260_v30, %v224_v40  ;;  %v3147_v6 = vadd.f32 %v3131_v44, %v2368_v5  ;;  %v225_v49 = vld [vmem:[#allocation4 + $0x70] sm:$0xff] }
 0x9d0   :  { %v3464_v62 = vadd.f32 %v3448_v13, %v3144_v53  ;;  %v3255_v63 = vadd.f32 %v3239_v58, %v2476_v19  ;;  %v1687_v56 = vmul.f32 %v7297_v16, %v6010_v24  ;;  %v2330_v4 = vpop.f32.mrf.mxu2  ;;  %v2367_v15 = vadd.f32 %v2351_v29, %v1588_v14  ;;  %v7299_v53 = vld [vmem:[#allocation39_spill] sm:$0xff]  ;;  %v7300_v58 = vld [vmem:[#allocation150_spill] sm:$0xff] }
 0x9d1   :  { %v3198_v8 = vpop.permute.xlu1 %3197  ;;  %v6530_v7 = vpop.permute.xlu2 %3217  ;;  %v1575_v17 = vmul.f32 %v6010_v24, %v6490_v54  ;;  %v1688_v38 = vmul.f32 %v7298_v39, %v6010_v24  ;;  %v908_v13 = vmul.f32 %v7299_v53, %v6012_v20  ;;  %v2466_v36 = vmul.f32 %v7300_v58, %v6016_v23  ;;  %v7310_v39 = vld [vmem:[#allocation147_spill] sm:$0xff] }
 0x9d2   :  { %3480 = vst [vmem:[#allocation4 + $0x18] sm:$0xff] %v3464_v62  ;;  %v3447_v47 = vmul.f32 %v3255_v63, %v219_v51  ;;  %v3243_v26 = vmul.f32 %v3198_v8, %v6022_v2  ;;  %v3146_v60 = vadd.f32 %v3130_v33, %v2367_v15  ;;  %v909_v51 = vmul.f32 %v7301_v10, %v6012_v20  ;;  %v7302_v63 = vld [vmem:[#allocation140_spill] sm:$0xff]  ;;  %v7309_v15 = vld [vmem:[#allocation107_spill] sm:$0xff] }
 0x9d3   :  { %v3104_v0 = vpop.f32.mrf.mxu3  ;;  %v796_v55 = vmul.f32 %v6012_v20, %v6482_v31  ;;  %v1703_v57 = vadd.f32 %v1687_v56, %v908_v13  ;;  %v2354_v62 = vmul.f32 %v6016_v23, %v6507_v1  ;;  %v2467_v46 = vmul.f32 %v7302_v63, %v6016_v23  ;;  %v7311_v13 = vld [vmem:[#allocation67_spill] sm:$0xff] }
 0x9d4   :  { %v3463_v25 = vadd.f32 %v3447_v47, %v3143_v61  ;;  %v3259_v42 = vadd.f32 %v3243_v26, %v2480_v43  ;;  %v3132_v37 = vmul.f32 %v6022_v2, %v3104_v0  ;;  %v1576_v30 = vmul.f32 %v6010_v24, %v1551_v11  ;;  %v1554_v40 = vpop.f32.mrf.mxu1  ;;  %v7303_v11 = vld [vmem:[#allocation40_spill] sm:$0xff] }
 0x9d5   :  { %v3193_v9 = vpop.permute.xlu0 %3192  ;;  %v1591_v3 = vadd.f32 %v1575_v17, %v796_v55  ;;  %v1704_v8 = vadd.f32 %v1688_v38, %v909_v51  ;;  %v2482_v44 = vadd.f32 %v2466_v36, %v1703_v57  ;;  %v797_v45 = vmul.f32 %v6012_v20, %v772_v34  ;;  %v7312_v51 = vld [vmem:[#allocation145_spill] sm:$0xff] }
 0x9d6   :  { %3479 = vst [vmem:[#allocation4 + $0x68] sm:$0xff] %v3463_v25  ;;  %v3451_v32 = vmul.f32 %v3259_v42, %v223_v21  ;;  %v3148_v35 = vadd.f32 %v3132_v37, %v2369_v59  ;;  %v3242_v52 = vmul.f32 %v3193_v9, %v6022_v2  ;;  %v2355_v21 = vmul.f32 %v6016_v23, %v2330_v4  ;;  %v7304_v25 = vld [vmem:[#allocation35_spill] sm:$0xff]  ;;  %v7305_v37 = vld [vmem:[#allocation109_spill] sm:$0xff]  ;;  %v7308_v4 = vld [vmem:[#allocation96_spill] sm:$0xff] }
 0x9d7   :  { %v2370_v29 = vadd.f32 %v2354_v62, %v1591_v3  ;;  %v2483_v5 = vadd.f32 %v2467_v46, %v1704_v8  ;;  %v910_v59 = vmul.f32 %v7303_v11, %v6012_v20  ;;  %v1044_v42 = vmul.f32 %v7304_v25, %v6012_v20  ;;  %v7313_v46 = vld [vmem:[#allocation71_spill] sm:$0xff] }
 0x9d8   :  { %v3467_v27 = vadd.f32 %v3451_v32, %v3147_v6  ;;  %v3468_v50 = vadd.f32 %v3452_v12, %v3148_v35  ;;  %v3258_v19 = vadd.f32 %v3242_v52, %v2479_v18  ;;  %v1689_v14 = vmul.f32 %v7305_v37, %v6010_v24  ;;  %v7306_v18 = vld [vmem:[#allocation114_spill] sm:$0xff]  ;;  %v2333_v12 = vpop.f32.mrf.mxu2  ;;  %v7307_v52 = vld [vmem:[#allocation41_spill] sm:$0xff] }
 0x9d9   :  { %v3213_v22 = vpop.permute.xlu1 %3212  ;;  %v6556_v31 = vpop.permute.xlu2 %3232  ;;  %v1823_v33 = vmul.f32 %v7306_v18, %v6010_v24  ;;  %v1592_v9 = vadd.f32 %v1576_v30, %v797_v45  ;;  %v1047_v16 = vmul.f32 %v7307_v52, %v6012_v20  ;;  %v798_v56 = vmul.f32 %v6012_v20, %v775_v41  ;;  %v7314_v41 = vld [vmem:[#allocation108_spill] sm:$0xff] }
 0x9da   :  { %3483 = vst [vmem:[#allocation4 + $0x40] sm:$0xff] %v3467_v27  ;;  %v3450_v48 = vmul.f32 %v3258_v19, %v222_v28  ;;  %v3246_v47 = vmul.f32 %v3213_v22, %v6022_v2  ;;  %v1822_v28 = vmul.f32 %v7308_v4, %v6010_v24  ;;  %v2602_v27 = vmul.f32 %v7309_v15, %v6016_v23 }
 0x9db   :  { %3484 = vst [vmem:[#allocation4 + $0x28] sm:$0xff] %v3468_v50  ;;  %v3107_v54 = vpop.f32.mrf.mxu3  ;;  %v226_v50 = vld [vmem:[#allocation4 + $0x20] sm:$0xff]  ;;  %v2371_v17 = vadd.f32 %v2355_v21, %v1592_v9  ;;  %v2468_v38 = vmul.f32 %v7310_v39, %v6016_v23  ;;  %v1043_v58 = vmul.f32 %v7311_v13, %v6012_v20  ;;  %v1577_v36 = vmul.f32 %v6010_v24, %v1554_v40 }
 0x9dc   :  { %v3466_v43 = vadd.f32 %v3450_v48, %v3146_v60  ;;  %v3133_v26 = vmul.f32 %v6022_v2, %v3107_v54  ;;  %v3262_v6 = vadd.f32 %v3246_v47, %v2483_v5  ;;  %v1705_v60 = vadd.f32 %v1689_v14, %v910_v59  ;;  %v1556_v40 = vpop.f32.mrf.mxu1  ;;  %v7317_v5 = vld [vmem:[#allocation116_spill] sm:$0xff] }
 0x9dd   :  { %v3208_v61 = vpop.permute.xlu0 %3207  ;;  %v1839_v48 = vadd.f32 %v1823_v33, %v1044_v42  ;;  %v2601_v55 = vmul.f32 %v7312_v51, %v6016_v23  ;;  %v3247_v54 = vmul.f32 %v6530_v7, %v6022_v2  ;;  %v1821_v3 = vmul.f32 %v7314_v41, %v6010_v24  ;;  %v7318_v14 = vld [vmem:[#allocation68_spill] sm:$0xff]  ;;  %v7322_v51 = vld [vmem:[#allocation111_spill] sm:$0xff] }
 0x9de   :  { %3482 = vst [vmem:[#allocation4 + $0x38] sm:$0xff] %v3466_v43  ;;  %v3245_v1 = vmul.f32 %v3208_v61, %v6022_v2  ;;  %v3149_v32 = vadd.f32 %v3133_v26, %v2370_v29  ;;  %v3454_v57 = vmul.f32 %v3262_v6, %v226_v50  ;;  %v1042_v43 = vmul.f32 %v7313_v46, %v6012_v20  ;;  %v777_v61 = vpop.f32.mrf.mxu0  ;;  %v7319_v6 = vld [vmem:[#allocation152_spill] sm:$0xff] }
 0x9df   :  { %v2618_v30 = vadd.f32 %v2602_v27, %v1839_v48  ;;  %v2356_v47 = vmul.f32 %v6016_v23, %v2333_v12  ;;  %v2484_v26 = vadd.f32 %v2468_v38, %v1705_v60  ;;  %v2600_v21 = vmul.f32 %v7317_v5, %v6016_v23  ;;  %v7321_v60 = vld [vmem:[#allocation74_spill] sm:$0xff] }
 0x9e0   :  { %v3261_v0 = vadd.f32 %v3245_v1, %v2482_v44  ;;  %v1838_v44 = vadd.f32 %v1822_v28, %v1043_v58  ;;  %v7315_v1 = vld [vmem:[#allocation103_spill] sm:$0xff]  ;;  %v1593_v59 = vadd.f32 %v1577_v36, %v798_v56  ;;  %v911_v18 = vmul.f32 %v7318_v14, %v6012_v20  ;;  %v2335_v9 = vpop.f32.mrf.mxu2  ;;  %v7320_v56 = vld [vmem:[#allocation153_spill] sm:$0xff] }
 0x9e1   :  { %v6571_v34 = vpop.permute.xlu1 %3227  ;;  %v1690_v45 = vmul.f32 %v7315_v1, %v6010_v24  ;;  %v3263_v42 = vadd.f32 %v3247_v54, %v2484_v26  ;;  %v799_v33 = vmul.f32 %v6012_v20, %v777_v61  ;;  %v1837_v12 = vadd.f32 %v1821_v3, %v1042_v43  ;;  %v7323_v43 = vld [vmem:[#allocation94_spill] sm:$0xff]  ;;  %v7324_v3 = vld [vmem:[#allocation119_spill] sm:$0xff] }
 0x9e2   :  { %v3453_v35 = vmul.f32 %v3261_v0, %v225_v49  ;;  %v7316_v49 = vld [vmem:[#allocation117_spill] sm:$0xff]  ;;  %v2617_v25 = vadd.f32 %v2601_v55, %v1838_v44  ;;  %v2372_v4 = vadd.f32 %v2356_v47, %v1593_v59  ;;  %v2469_v28 = vmul.f32 %v7320_v56, %v6016_v23 }
 0x9e3   :  { %v3109_v19 = vpop.f32.mrf.mxu3  ;;  %v1826_v29 = vmul.f32 %v7316_v49, %v6010_v24  ;;  %v1706_v50 = vadd.f32 %v1690_v45, %v911_v18  ;;  %v2616_v39 = vadd.f32 %v2600_v21, %v1837_v12  ;;  %v1045_v48 = vmul.f32 %v7321_v60, %v6012_v20  ;;  %v7327_v45 = vld [vmem:[#allocation32_spill] sm:$0xff]  ;;  %v7328_v21 = vld [vmem:[#allocation155_spill] sm:$0xff] }
 0x9e4   :  { %v3469_v22 = vadd.f32 %v3453_v35, %v3149_v32  ;;  %v3134_v53 = vmul.f32 %v6022_v2, %v3109_v19  ;;  %v2605_v32 = vmul.f32 %v7319_v6, %v6016_v23  ;;  %v227_v35 = vld [vmem:[#allocation4 + $0x58] sm:$0xff]  ;;  %v1578_v19 = vmul.f32 %v6010_v24, %v1556_v40 }
 0x9e5   :  { %v3223_v10 = vpop.permute.xlu0 %3222  ;;  %v1824_v55 = vmul.f32 %v7322_v51, %v6010_v24  ;;  %v1691_v41 = vmul.f32 %v7323_v43, %v6010_v24  ;;  %v1050_v49 = vmul.f32 %v7327_v45, %v6012_v20 }
 0x9e6   :  { %3485 = vst [vmem:[#allocation4 + $0x70] sm:$0xff] %v3469_v22  ;;  %v3150_v62 = vadd.f32 %v3134_v53, %v2371_v17  ;;  %v3312_v63 = vpop.permute.xlu2 %3311  ;;  %v1842_v17 = vadd.f32 %v1826_v29, %v1047_v16  ;;  %v3455_v22 = vmul.f32 %v3263_v42, %v227_v35  ;;  %v3248_v53 = vmul.f32 %v3223_v10, %v6022_v2  ;;  %v1559_v16 = vpop.f32.mrf.mxu1 }
 0x9e7   :  { %v3381_v8 = vmul.f32 %v3312_v63, %v6022_v2  ;;  %v2485_v63 = vadd.f32 %v2469_v28, %v1706_v50  ;;  %v780_v44 = vpop.f32.mrf.mxu0  ;;  %v1594_v47 = vadd.f32 %v1578_v19, %v799_v33  ;;  %v1840_v29 = vadd.f32 %v1824_v55, %v1045_v48  ;;  %v7332_v48 = vld [vmem:[#allocation69_spill] sm:$0xff]  ;;  %v7333_v55 = vld [vmem:[#allocation156_spill] sm:$0xff] }
 0x9e8   :  { %v3470_v7 = vadd.f32 %v3454_v57, %v3150_v62  ;;  %v2621_v54 = vadd.f32 %v2605_v32, %v1842_v17  ;;  %v2357_v62 = vmul.f32 %v6016_v23, %v2335_v9  ;;  %v2338_v5 = vpop.f32.mrf.mxu2  ;;  %v1579_v33 = vmul.f32 %v6010_v24, %v1559_v16 }
 0x9e9   :  { %v3397_v0 = vadd.f32 %v3381_v8, %v2618_v30  ;;  %v3307_v11 = vpop.permute.xlu1 %3306  ;;  %v1829_v30 = vmul.f32 %v7324_v3, %v6010_v24  ;;  %v7325_v8 = vld [vmem:[#allocation157_spill] sm:$0xff]  ;;  %v3264_v26 = vadd.f32 %v3248_v53, %v2485_v63  ;;  %v3249_v32 = vmul.f32 %v6571_v34, %v6022_v2 }
 0x9ea   :  { %3486 = vst [vmem:[#allocation4 + $0x20] sm:$0xff] %v3470_v7  ;;  %v3380_v37 = vmul.f32 %v3307_v11, %v6022_v2  ;;  %v2603_v61 = vmul.f32 %v7325_v8, %v6016_v23  ;;  %v7326_v7 = vld [vmem:[#allocation34_spill] sm:$0xff]  ;;  %v228_v11 = vld [vmem:[#allocation4 + $0x30] sm:$0xff]  ;;  %v800_v28 = vmul.f32 %v6012_v20, %v780_v44  ;;  %v2358_v19 = vmul.f32 %v6016_v23, %v2338_v5 }
 0x9eb   :  { %3429 = vst [vmem:[#allocation3 + $0x10] sm:$0xff] %v3397_v0  ;;  %v3112_v52 = vpop.f32.mrf.mxu3  ;;  %v912_v1 = vmul.f32 %v7326_v7, %v6012_v20  ;;  %v2608_v0 = vmul.f32 %v7328_v21, %v6016_v23  ;;  %v1845_v12 = vadd.f32 %v1829_v30, %v1050_v49  ;;  %v3456_v35 = vmul.f32 %v3264_v26, %v228_v11 }
 0x9ec   :  { %v3396_v15 = vadd.f32 %v3380_v37, %v2617_v25  ;;  %v3135_v27 = vmul.f32 %v6022_v2, %v3112_v52  ;;  %v7329_v25 = vld [vmem:[#allocation142_spill] sm:$0xff]  ;;  %v2373_v37 = vadd.f32 %v2357_v62, %v1594_v47  ;;  %v2619_v9 = vadd.f32 %v2603_v61, %v1840_v29  ;;  %v7334_v62 = vld [vmem:[#allocation25_spill] sm:$0xff] }
 0x9ed   :  { %v3302_v38 = vpop.permute.xlu0 %3301  ;;  %v2470_v42 = vmul.f32 %v7329_v25, %v6016_v23  ;;  %v1707_v18 = vadd.f32 %v1691_v41, %v912_v1  ;;  %v1595_v34 = vadd.f32 %v1579_v33, %v800_v28  ;;  %v1053_v51 = vmul.f32 %v7332_v48, %v6012_v20  ;;  %v7339_v33 = vld [vmem:[#allocation72_spill] sm:$0xff] }
 0x9ee   :  { %3428 = vst [vmem:[#allocation3 + $0x68] sm:$0xff] %v3396_v15  ;;  %v3151_v13 = vadd.f32 %v3135_v27, %v2372_v4  ;;  %v3379_v58 = vmul.f32 %v3302_v38, %v6022_v2  ;;  %v3327_v36 = vpop.permute.xlu2 %3326  ;;  %v2624_v15 = vadd.f32 %v2608_v0, %v1845_v12  ;;  %v7330_v38 = vld [vmem:[#allocation121_spill] sm:$0xff]  ;;  %v913_v63 = vmul.f32 %v7334_v62, %v6012_v20 }
 0x9ef   :  { %v3384_v57 = vmul.f32 %v3327_v36, %v6022_v2  ;;  %v2486_v50 = vadd.f32 %v2470_v42, %v1707_v18  ;;  %v782_v3 = vpop.f32.mrf.mxu0  ;;  %v3250_v44 = vmul.f32 %v6556_v31, %v6022_v2  ;;  %v7336_v0 = vld [vmem:[#allocation101_spill] sm:$0xff]  ;;  %v1056_v12 = vmul.f32 %v7339_v33, %v6012_v20 }
 0x9f0   :  { %v3471_v46 = vadd.f32 %v3455_v22, %v3151_v13  ;;  %v3395_v10 = vadd.f32 %v3379_v58, %v2616_v39  ;;  %v1832_v22 = vmul.f32 %v7330_v38, %v6010_v24  ;;  %v1561_v13 = vpop.f32.mrf.mxu1  ;;  %v7331_v58 = vld [vmem:[#allocation112_spill] sm:$0xff]  ;;  %v2340_v61 = vpop.f32.mrf.mxu2  ;;  %v801_v49 = vmul.f32 %v6012_v20, %v782_v3 }
 0x9f1   :  { %v3400_v40 = vadd.f32 %v3384_v57, %v2621_v54  ;;  %v1692_v36 = vmul.f32 %v7331_v58, %v6010_v24  ;;  %v3265_v60 = vadd.f32 %v3249_v32, %v2486_v50  ;;  %v2611_v54 = vmul.f32 %v7333_v55, %v6016_v23  ;;  %v229_v57 = vld [vmem:[#allocation4 + $0x50] sm:$0xff]  ;;  %v7341_v32 = vld [vmem:[#allocation158_spill] sm:$0xff] }
 0x9f2   :  { %3487 = vst [vmem:[#allocation4 + $0x58] sm:$0xff] %v3471_v46  ;;  %v2374_v46 = vadd.f32 %v2358_v19, %v1595_v34  ;;  %v1580_v30 = vmul.f32 %v6010_v24, %v1561_v13  ;;  %v1848_v8 = vadd.f32 %v1832_v22, %v1053_v51  ;;  %v2359_v29 = vmul.f32 %v6016_v23, %v2340_v61  ;;  %v7342_v58 = vld [vmem:[#allocation106_spill] sm:$0xff]  ;;  %v7343_v51 = vld [vmem:[#allocation115_spill] sm:$0xff] }
 0x9f3   :  { %3427 = vst [vmem:[#allocation3 + $0x28] sm:$0xff] %v3395_v10  ;;  %v3114_v59 = vpop.f32.mrf.mxu3  ;;  %v7335_v10 = vld [vmem:[#allocation148_spill] sm:$0xff]  ;;  %v3457_v47 = vmul.f32 %v3265_v60, %v229_v57  ;;  %v1825_v11 = vmul.f32 %v7336_v0, %v6010_v24  ;;  %v1827_v55 = vmul.f32 %v7343_v51, %v6010_v24  ;;  %v7351_v0 = vld [vmem:[#allocation151_spill] sm:$0xff] }
 0x9f4   :  { %3432 = vst [vmem:[#allocation3 + $0x30] sm:$0xff] %v3400_v40  ;;  %v3136_v14 = vmul.f32 %v6022_v2, %v3114_v59  ;;  %v2471_v43 = vmul.f32 %v7335_v10, %v6016_v23  ;;  %v1708_v40 = vadd.f32 %v1692_v36, %v913_v63  ;;  %v2627_v1 = vadd.f32 %v2611_v54, %v1848_v8  ;;  %v7337_v59 = vld [vmem:[#allocation123_spill] sm:$0xff]  ;;  %v7344_v54 = vld [vmem:[#allocation73_spill] sm:$0xff]  ;;  %v7347_v10 = vld [vmem:[#allocation8_spill] sm:$0xff] }
 0x9f5   :  { %v3317_v6 = vpop.permute.xlu0 %3316  ;;  %v1835_v25 = vmul.f32 %v7337_v59, %v6010_v24  ;;  %v1596_v31 = vadd.f32 %v1580_v30, %v801_v49  ;;  %v1828_v36 = vmul.f32 %v7342_v58, %v6010_v24  ;;  %v1049_v57 = vmul.f32 %v7344_v54, %v6012_v20  ;;  %v7346_v63 = vld [vmem:[#allocation77_spill] sm:$0xff]  ;;  %v7352_v59 = vld [vmem:[#allocation80_spill] sm:$0xff] }
 0x9f6   :  { %v3152_v52 = vadd.f32 %v3136_v14, %v2373_v37  ;;  %v3382_v4 = vmul.f32 %v3317_v6, %v6022_v2  ;;  %v3342_v56 = vpop.permute.xlu2 %3341  ;;  %v2487_v5 = vadd.f32 %v2471_v43, %v1708_v40  ;;  %v7338_v14 = vld [vmem:[#allocation70_spill] sm:$0xff]  ;;  %v2606_v43 = vmul.f32 %v7347_v10, %v6016_v23  ;;  %v7362_v10 = vld [vmem:[#allocation12_spill] sm:$0xff] }
 0x9f7   :  { %v3387_v27 = vmul.f32 %v3342_v56, %v6022_v2  ;;  %v1046_v18 = vmul.f32 %v7338_v14, %v6012_v20  ;;  %v2375_v56 = vadd.f32 %v2359_v29, %v1596_v31 }
 0x9f8   :  { %v3472_v17 = vadd.f32 %v3456_v35, %v3152_v52  ;;  %v3398_v39 = vadd.f32 %v3382_v4, %v2619_v9  ;;  %v3266_v37 = vadd.f32 %v3250_v44, %v2487_v5  ;;  %v7340_v9 = vld [vmem:[#allocation100_spill] sm:$0xff]  ;;  %v2614_v35 = vmul.f32 %v7341_v32, %v6016_v23  ;;  %v230_v52 = vld [vmem:[#allocation4 + $0x78] sm:$0xff] }
 0x9f9   :  { %v3403_v53 = vadd.f32 %v3387_v27, %v2624_v15  ;;  %v2604_v6 = vmul.f32 %v7340_v9, %v6016_v23  ;;  %v1841_v15 = vadd.f32 %v1825_v11, %v1046_v18  ;;  %v1851_v27 = vadd.f32 %v1835_v25, %v1056_v12  ;;  %v7350_v5 = vld [vmem:[#allocation76_spill] sm:$0xff] }
 0x9fa   :  { %3488 = vst [vmem:[#allocation4 + $0x30] sm:$0xff] %v3472_v17  ;;  %v3458_v50 = vmul.f32 %v3266_v37, %v230_v52  ;;  %v2610_v11 = vmul.f32 %v7351_v0, %v6016_v23  ;;  %v1051_v25 = vmul.f32 %v7352_v59, %v6012_v20 }
 0x9fb   :  { %3430 = vst [vmem:[#allocation3 + $0x40] sm:$0xff] %v3398_v39  ;;  %v3117_v16 = vpop.f32.mrf.mxu3  ;;  %v2620_v38 = vadd.f32 %v2604_v6, %v1841_v15  ;;  %v2630_v22 = vadd.f32 %v2614_v35, %v1851_v27  ;;  %v7354_v35 = vld [vmem:[#allocation113_spill] sm:$0xff]  ;;  %v7356_v27 = vld [vmem:[#allocation79_spill] sm:$0xff] }
 0x9fc   :  { %3435 = vst [vmem:[#allocation3 + $0x20] sm:$0xff] %v3403_v53  ;;  %v3137_v41 = vmul.f32 %v6022_v2, %v3117_v16  ;;  %v7345_v16 = vld [vmem:[#allocation149_spill] sm:$0xff]  ;;  %v1834_v52 = vmul.f32 %v7354_v35, %v6010_v24 }
 0x9fd   :  { %v2607_v62 = vmul.f32 %v7345_v16, %v6016_v23 }
 0x9fe   :  { %v3153_v26 = vadd.f32 %v3137_v41, %v2374_v46  ;;  %v3357_v7 = vpop.permute.xlu2 %3356  ;;  %v1048_v46 = vmul.f32 %v7346_v63, %v6012_v20  ;;  %v1844_v41 = vadd.f32 %v1828_v36, %v1049_v57  ;;  %v7360_v57 = vld [vmem:[#allocation122_spill] sm:$0xff]  ;;  %v7361_v63 = vld [vmem:[#allocation43_spill] sm:$0xff] }
 0x9ff   :  { %v3390_v45 = vmul.f32 %v3357_v7, %v6022_v2  ;;  %v1836_v16 = vmul.f32 %v7360_v57, %v6010_v24 }
 0xa00   :  { %v3473_v21 = vadd.f32 %v3457_v47, %v3153_v26  ;;  %v1843_v3 = vadd.f32 %v1827_v55, %v1048_v46  ;;  %v2623_v8 = vadd.f32 %v2607_v62, %v1844_v41  ;;  %v7348_v26 = vld [vmem:[#allocation110_spill] sm:$0xff]  ;;  %v1057_v46 = vmul.f32 %v7361_v63, %v6012_v20 }
 0xa01   :  { %v3406_v42 = vadd.f32 %v3390_v45, %v2627_v1  ;;  %v1831_v7 = vmul.f32 %v7348_v26, %v6010_v24  ;;  %v7349_v45 = vld [vmem:[#allocation118_spill] sm:$0xff] }
 0xa02   :  { %3489 = vst [vmem:[#allocation4 + $0x50] sm:$0xff] %v3473_v21  ;;  %v2622_v44 = vadd.f32 %v2606_v43, %v1843_v3  ;;  %v1830_v49 = vmul.f32 %v7349_v45, %v6010_v24  ;;  %v1052_v21 = vmul.f32 %v7350_v5, %v6012_v20  ;;  %v2615_v43 = vmul.f32 %v7362_v10, %v6016_v23 }
 0xa03   :  { %3438 = vst [vmem:[#allocation3 + $0x58] sm:$0xff] %v3406_v42  ;;  %v3119_v4 = vpop.f32.mrf.mxu3  ;;  %v7353_v42 = vld [vmem:[#allocation10_spill] sm:$0xff]  ;;  %v1852_v41 = vadd.f32 %v1836_v16, %v1057_v46 }
 0xa04   :  { %v3138_v28 = vmul.f32 %v6022_v2, %v3119_v4  ;;  %v2609_v31 = vmul.f32 %v7353_v42, %v6016_v23  ;;  %v1847_v37 = vadd.f32 %v1831_v7, %v1052_v21  ;;  %v1846_v14 = vadd.f32 %v1830_v49, %v1051_v25 }
 0xa06   :  { %v3154_v19 = vadd.f32 %v3138_v28, %v2375_v56  ;;  %v3372_v17 = vpop.permute.xlu2 %3371  ;;  %v3322_v39 = vpop.permute.xlu1 %3321  ;;  %v2626_v33 = vadd.f32 %v2610_v11, %v1847_v37  ;;  %v2625_v6 = vadd.f32 %v2609_v31, %v1846_v14  ;;  %v7355_v56 = vld [vmem:[#allocation120_spill] sm:$0xff] }
 0xa07   :  { %v3393_v53 = vmul.f32 %v3372_v17, %v6022_v2  ;;  %v3383_v34 = vmul.f32 %v3322_v39, %v6022_v2  ;;  %v1833_v28 = vmul.f32 %v7355_v56, %v6010_v24  ;;  %v7358_v39 = vld [vmem:[#allocation81_spill] sm:$0xff] }
 0xa08   :  { %v3474_v13 = vadd.f32 %v3458_v50, %v3154_v19  ;;  %v1055_v50 = vmul.f32 %v7356_v27, %v6012_v20  ;;  %v7357_v19 = vld [vmem:[#allocation154_spill] sm:$0xff] }
 0xa09   :  { %v3409_v60 = vadd.f32 %v3393_v53, %v2630_v22  ;;  %v3399_v48 = vadd.f32 %v3383_v34, %v2620_v38  ;;  %v2613_v17 = vmul.f32 %v7357_v19, %v6016_v23  ;;  %v1054_v38 = vmul.f32 %v7358_v39, %v6012_v20  ;;  %v7359_v22 = vld [vmem:[#allocation11_spill] sm:$0xff] }
 0xa0a   :  { %3490 = vst [vmem:[#allocation4 + $0x78] sm:$0xff] %v3474_v13  ;;  %v2612_v53 = vmul.f32 %v7359_v22, %v6016_v23  ;;  %v1850_v34 = vadd.f32 %v1834_v52, %v1055_v50 }
 0xa0b   :  { %3441 = vst [vmem:[#allocation3 + $0x60] sm:$0xff] %v3409_v60  ;;  %v1849_v13 = vadd.f32 %v1833_v28, %v1054_v38 }
 0xa0c   :  { %3431 = vst [vmem:[#allocation3 + $0x48] sm:$0xff] %v3399_v48  ;;  %v2629_v36 = vadd.f32 %v2613_v17, %v1850_v34 }
 0xa0d   :  { %v2628_v51 = vadd.f32 %v2612_v53, %v1849_v13 }
 0xa0e   :  { %v3337_v30 = vpop.permute.xlu1 %3336 }
 0xa0f   :  { %v3332_v61 = vpop.permute.xlu0 %3331  ;;  %v3386_v40 = vmul.f32 %v3337_v30, %v6022_v2  ;;  %v2631_v30 = vadd.f32 %v2615_v43, %v1852_v41 }
 0xa10   :  { %v3385_v47 = vmul.f32 %v3332_v61, %v6022_v2 }
 0xa11   :  { %v3402_v1 = vadd.f32 %v3386_v40, %v2623_v8 }
 0xa12   :  { %v3401_v29 = vadd.f32 %v3385_v47, %v2622_v44 }
 0xa13   :  { %3434 = vst [vmem:[#allocation3 + $0x38] sm:$0xff] %v3402_v1 }
 0xa14   :  { %3433 = vst [vmem:[#allocation3 + $0x70] sm:$0xff] %v3401_v29 }
 0xa16   :  { %v3352_v18 = vpop.permute.xlu1 %3351 }
 0xa17   :  { %v3347_v12 = vpop.permute.xlu0 %3346  ;;  %v3389_v9 = vmul.f32 %v3352_v18, %v6022_v2 }
 0xa18   :  { %v3388_v32 = vmul.f32 %v3347_v12, %v6022_v2 }
 0xa19   :  { %v3405_v4 = vadd.f32 %v3389_v9, %v2626_v33 }
 0xa1a   :  { %v3404_v15 = vadd.f32 %v3388_v32, %v2625_v6 }
 0xa1b   :  { %3437 = vst [vmem:[#allocation3 + $0x18] sm:$0xff] %v3405_v4 }
 0xa1c   :  { %3436 = vst [vmem:[#allocation3 + $0x78] sm:$0xff] %v3404_v15 }
 0xa1e   :  { %v3367_v58 = vpop.permute.xlu1 %3366 }
 0xa1f   :  { %v3362_v60 = vpop.permute.xlu0 %3361  ;;  %v3392_v48 = vmul.f32 %v3367_v58, %v6022_v2 }
 0xa20   :  { %v3391_v55 = vmul.f32 %v3362_v60, %v6022_v2 }
 0xa21   :  { %v3408_v54 = vadd.f32 %v3392_v48, %v2629_v36 }
 0xa22   :  { %v3407_v62 = vadd.f32 %v3391_v55, %v2628_v51 }
 0xa23   :  { %3440 = vst [vmem:[#allocation3 + $0x8] sm:$0xff] %v3408_v54 }
 0xa24   :  { %3439 = vst [vmem:[#allocation3] sm:$0xff] %v3407_v62 }
 0xa27   :  { %v3377_v3 = vpop.permute.xlu0 %3376 }
 0xa28   :  { %v3394_v8 = vmul.f32 %v3377_v3, %v6022_v2 }
 0xa2a   :  { %v3410_v61 = vadd.f32 %v3394_v8, %v2631_v30 }
 0xa2c   :  { %3442 = vst [vmem:[#allocation3 + $0x50] sm:$0xff] %v3410_v61 }
 0xa2d PF:  { %v3494_v40 = vld [vmem:[#allocation3 + $0x28] sm:$0xff]  ;;  %v3496_v44 = vld [vmem:[#allocation3 + $0x10] sm:$0xff]  ;;  %v3497_v47 = vld [vmem:[#allocation3 + $0x40] sm:$0xff] }
 0xa2e   :  { %4065 = vrcp.f32 %v3494_v40  ;;  %v3495_v24 = vld [vmem:[#allocation3 + $0x68] sm:$0xff]  ;;  %v3499_v26 = vld [vmem:[#allocation3 + $0x30] sm:$0xff]  ;;  %v3501_v1 = vld [vmem:[#allocation3 + $0x38] sm:$0xff] }
 0xa2f   :  { %4067 = vrcp.f32 %v3495_v24  ;;  %v3498_v20 = vld [vmem:[#allocation3 + $0x48] sm:$0xff]  ;;  %v3500_v23 = vld [vmem:[#allocation3 + $0x70] sm:$0xff]  ;;  %v6728_v2 = vld [vmem:[%s6799_s5] ss:$0 sm:$0xff] }
 0xa30   :  { %4069 = vrcp.f32 %v3496_v44  ;;  %v3526_v7 = vld [vmem:[#allocation4 + $0x8] sm:$0xff]  ;;  %v3527_v45 = vld [vmem:[#allocation4] sm:$0xff]  ;;  %v3503_v21 = vld [vmem:[#allocation3 + $0x78] sm:$0xff] }
 0xa31   :  { %4071 = vrcp.f32 %v3497_v47  ;;  %v3502_v49 = vld [vmem:[#allocation3 + $0x20] sm:$0xff]  ;;  %v3528_v5 = vld [vmem:[#allocation4 + $0x48] sm:$0xff]  ;;  %v3504_v25 = vld [vmem:[#allocation3 + $0x18] sm:$0xff] }
 0xa32   :  { %4073 = vrcp.f32 %v3498_v20  ;;  %v3529_v59 = vld [vmem:[#allocation4 + $0x60] sm:$0xff]  ;;  %v3530_v37 = vld [vmem:[#allocation4 + $0x68] sm:$0xff]  ;;  %v3505_v14 = vld [vmem:[#allocation3 + $0x58] sm:$0xff] }
 0xa33   :  { %4075 = vrcp.f32 %v3499_v26  ;;  %v3531_v9 = vld [vmem:[#allocation4 + $0x18] sm:$0xff]  ;;  %v3506_v6 = vld [vmem:[#allocation3] sm:$0xff]  ;;  %v3532_v4 = vld [vmem:[#allocation4 + $0x10] sm:$0xff] }
 0xa34   :  { %v4066_v29 = vpop.eup %4065  ;;  %4077 = vrcp.f32 %v3500_v23  ;;  %v3507_v56 = vld [vmem:[#allocation3 + $0x8] sm:$0xff]  ;;  %v3533_v19 = vld [vmem:[#allocation4 + $0x38] sm:$0xff]  ;;  %v3508_v17 = vld [vmem:[#allocation3 + $0x60] sm:$0xff] }
 0xa35   :  { %v4068_v0 = vpop.eup %4067  ;;  %v3542_v11 = vmul.f32 %v4066_v29, %v3526_v7  ;;  %4079 = vrcp.f32 %v3501_v1  ;;  %v3534_v34 = vld [vmem:[#allocation4 + $0x40] sm:$0xff]  ;;  %v3509_v13 = vld [vmem:[#allocation3 + $0x50] sm:$0xff]  ;;  %v3535_v51 = vld [vmem:[#allocation4 + $0x28] sm:$0xff] }
 0xa36   :  { %v4070_v42 = vpop.eup %4069  ;;  %v3543_v31 = vmul.f32 %v4068_v0, %v3527_v45  ;;  %4081 = vrcp.f32 %v3502_v49  ;;  %v3536_v62 = vld [vmem:[#allocation4 + $0x70] sm:$0xff]  ;;  %v3537_v41 = vld [vmem:[#allocation4 + $0x20] sm:$0xff]  ;;  %v3538_v40 = vld [vmem:[#allocation4 + $0x58] sm:$0xff] }
 0xa37   :  { %v4072_v18 = vpop.eup %4071  ;;  %v3562_v33 = vadd.f32 %v6728_v2, %v3542_v11  ;;  %v3544_v12 = vmul.f32 %v4070_v42, %v3528_v5  ;;  %4083 = vrcp.f32 %v3503_v21  ;;  %v3539_v26 = vld [vmem:[#allocation4 + $0x30] sm:$0xff]  ;;  %v3541_v11 = vld [vmem:[#allocation4 + $0x78] sm:$0xff] }
 0xa38   :  { %v4074_v32 = vpop.eup %4073  ;;  %v3563_v35 = vadd.f32 %v6728_v2, %v3543_v31  ;;  %v3545_v52 = vmul.f32 %v4072_v18, %v3529_v59  ;;  %4085 = vrcp.f32 %v3504_v25  ;;  %v3540_v49 = vld [vmem:[#allocation4 + $0x50] sm:$0xff] }
 0xa39   :  { %v4076_v28 = vpop.eup %4075  ;;  %v3578_v15 = vmax.f32 %v3562_v33, 0.0  ;;  %v3564_v27 = vadd.f32 %v6728_v2, %v3544_v12  ;;  %v3546_v50 = vmul.f32 %v4074_v32, %v3530_v37  ;;  %4087 = vrcp.f32 %v3505_v14 }
 0xa3a   :  { %v4078_v39 = vpop.eup %4077  ;;  %v3579_v38 = vmax.f32 %v3563_v35, 0.0  ;;  %v3565_v22 = vadd.f32 %v6728_v2, %v3545_v52  ;;  %v3547_v53 = vmul.f32 %v4076_v28, %v3531_v9  ;;  %4089 = vrcp.f32 %v3506_v6 }
 0xa3b   :  { %v4080_v58 = vpop.eup %4079  ;;  %3594 = vst [vmem:[%s6801_s7] sm:$0xff] %v3578_v15  ;;  %v3580_v36 = vmax.f32 %v3564_v27, 0.0  ;;  %v3566_v60 = vadd.f32 %v6728_v2, %v3546_v50  ;;  %v3548_v48 = vmul.f32 %v4078_v39, %v3532_v4  ;;  %4091 = vrcp.f32 %v3507_v56 }
 0xa3c   :  { %v4082_v55 = vpop.eup %4081  ;;  %3595 = vst [vmem:[%s6801_s7 + $0x8] sm:$0xff] %v3579_v38  ;;  %v3581_v54 = vmax.f32 %v3565_v22, 0.0  ;;  %v3567_v57 = vadd.f32 %v6728_v2, %v3547_v53  ;;  %v3549_v16 = vmul.f32 %v4080_v58, %v3533_v19  ;;  %4093 = vrcp.f32 %v3508_v17 }
 0xa3d   :  { %v4084_v63 = vpop.eup %4083  ;;  %3596 = vst [vmem:[%s6801_s7 + $0x10] sm:$0xff] %v3580_v36  ;;  %v3582_v46 = vmax.f32 %v3566_v60, 0.0  ;;  %v3568_v10 = vadd.f32 %v6728_v2, %v3548_v48  ;;  %v3550_v43 = vmul.f32 %v4082_v55, %v3534_v34  ;;  %4095 = vrcp.f32 %v3509_v13 }
 0xa3e   :  { %v4086_v3 = vpop.eup %4085  ;;  %3597 = vst [vmem:[%s6801_s7 + $0x18] sm:$0xff] %v3581_v54  ;;  %v3583_v30 = vmax.f32 %v3567_v57, 0.0  ;;  %v3569_v8 = vadd.f32 %v6728_v2, %v3549_v16  ;;  %v3551_v61 = vmul.f32 %v4084_v63, %v3535_v51 }
 0xa3f   :  { %v4088_v24 = vpop.eup %4087  ;;  %3598 = vst [vmem:[%s6801_s7 + $0x20] sm:$0xff] %v3582_v46  ;;  %v3584_v44 = vmax.f32 %v3568_v10, 0.0  ;;  %v3570_v47 = vadd.f32 %v6728_v2, %v3550_v43  ;;  %v3552_v20 = vmul.f32 %v4086_v3, %v3536_v62 }
 0xa40   :  { %v4090_v23 = vpop.eup %4089  ;;  %3599 = vst [vmem:[%s6801_s7 + $0x28] sm:$0xff] %v3583_v30  ;;  %v3585_v7 = vmax.f32 %v3569_v8, 0.0  ;;  %v3571_v1 = vadd.f32 %v6728_v2, %v3551_v61  ;;  %v3553_v45 = vmul.f32 %v4088_v24, %v3537_v41 }
 0xa41   :  { %v4092_v29 = vpop.eup %4091  ;;  %3600 = vst [vmem:[%s6801_s7 + $0x30] sm:$0xff] %v3584_v44  ;;  %v3586_v5 = vmax.f32 %v3570_v47, 0.0  ;;  %v3572_v21 = vadd.f32 %v6728_v2, %v3552_v20  ;;  %v3554_v0 = vmul.f32 %v4090_v23, %v3538_v40 }
 0xa42   :  { %v4094_v59 = vpop.eup %4093  ;;  %3601 = vst [vmem:[%s6801_s7 + $0x38] sm:$0xff] %v3585_v7  ;;  %v3587_v25 = vmax.f32 %v3571_v1, 0.0  ;;  %v3573_v42 = vadd.f32 %v6728_v2, %v3553_v45  ;;  %v3555_v31 = vmul.f32 %v4092_v29, %v3539_v26 }
 0xa43   :  { %v4096_v37 = vpop.eup %4095  ;;  %3602 = vst [vmem:[%s6801_s7 + $0x40] sm:$0xff] %v3586_v5  ;;  %v3588_v14 = vmax.f32 %v3572_v21, 0.0  ;;  %v3574_v18 = vadd.f32 %v6728_v2, %v3554_v0  ;;  %v3556_v33 = vmul.f32 %v4094_v59, %v3540_v49 }
 0xa44   :  { %3603 = vst [vmem:[%s6801_s7 + $0x48] sm:$0xff] %v3587_v25  ;;  %v3589_v12 = vmax.f32 %v3573_v42, 0.0  ;;  %v3575_v9 = vadd.f32 %v6728_v2, %v3555_v31  ;;  %v3557_v6 = vmul.f32 %v4096_v37, %v3541_v11 }
 0xa45   :  { %3604 = vst [vmem:[%s6801_s7 + $0x50] sm:$0xff] %v3588_v14  ;;  %v3590_v32 = vmax.f32 %v3574_v18, 0.0  ;;  %v3576_v35 = vadd.f32 %v6728_v2, %v3556_v33 }
 0xa46   :  { %3605 = vst [vmem:[%s6801_s7 + $0x58] sm:$0xff] %v3589_v12  ;;  %v3591_v52 = vmax.f32 %v3575_v9, 0.0  ;;  %v3577_v4 = vadd.f32 %v6728_v2, %v3557_v6 }
 0xa47   :  { %3606 = vst [vmem:[%s6801_s7 + $0x60] sm:$0xff] %v3590_v32  ;;  %v3592_v56 = vmax.f32 %v3576_v35, 0.0 }
 0xa48   :  { %3607 = vst [vmem:[%s6801_s7 + $0x68] sm:$0xff] %v3591_v52  ;;  %v3593_v28 = vmax.f32 %v3577_v4, 0.0 }
 0xa49   :  { %3608 = vst [vmem:[%s6801_s7 + $0x70] sm:$0xff] %v3592_v56 }
 0xa4a   :  { %3609 = vst [vmem:[%s6801_s7 + $0x78] sm:$0xff] %v3593_v28 }

</bundles_post_ra>
